<compile_context>
chip_gen: v6e
topology: v6e:2x2x1
jax: 0.10.0
libtpu: 0.0.40
codegen_flags: <defaults>
</compile_context>

<pallas_src>
import functools

import jax
import jax.numpy as jnp
from jax.experimental import pallas as pl
from jax.experimental.pallas import tpu as pltpu


def _att_kernel(m_ref, x_ref, o_ref, *, sub):
    # m_ref : VMEM (2*HW, HW) f32  zero-padded Toeplitz conv matrix (borders baked in)
    # x_ref : VMEM (Nb, C, HW)     lane-dense input block
    # o_ref : VMEM (Nb, HW)        lane-dense output block
    Nb, C, HW = x_ref.shape
    n_sub = Nb // sub
    inv_c = 1.0 / C

    # Channel-reduce chunk matched to the dtype's sublane packing
    # (f32 -> 8 rows/vreg, bf16 -> 16, int8/fp8 -> 32).
    pack = max(1, 4 // jnp.dtype(x_ref.dtype).itemsize)
    CC = min(C, 8 * pack)

    def body(i, carry):
        base = pl.multiple_of(i * sub, sub)

        # --- channel reduction (mean + max), chunked over C to bound live vregs ---
        xs = x_ref[pl.ds(base, sub), pl.ds(0, CC), :].astype(jnp.float32)
        csum = jnp.sum(xs, axis=1)
        cmax = jnp.max(xs, axis=1)
        c0 = CC
        while c0 < C:                      # static (trace-time) chunk loop
            cc = min(CC, C - c0)
            xs = x_ref[pl.ds(base, sub), pl.ds(c0, cc), :].astype(jnp.float32)
            csum = csum + jnp.sum(xs, axis=1)
            cmax = jnp.maximum(cmax, jnp.max(xs, axis=1))
            c0 += cc
        avg = csum * inv_c                 # (sub, HW)

        # --- 3x3 SAME conv as MXU matmuls against the resident conv matrix ---
        acc = jnp.dot(avg, m_ref[pl.ds(0, HW), :],
                      preferred_element_type=jnp.float32,
                      precision=jax.lax.Precision.HIGHEST)
        acc = acc + jnp.dot(cmax, m_ref[pl.ds(HW, HW), :],
                            preferred_element_type=jnp.float32,
                            precision=jax.lax.Precision.HIGHEST)

        o_ref[pl.ds(base, sub), :] = jax.nn.sigmoid(acc).astype(o_ref.dtype)
        return carry

    jax.lax.fori_loop(0, n_sub, body, 0, unroll=(n_sub <= 8))


def _make_conv_matrix(conv_weight, H, W):
    """Expand a (1,2,3,3) conv weight into a (2*HW, HW) Toeplitz matrix.

    out_flat[p] = sum_q feats_flat[q] * M[q, p], feats_flat = [avg_flat; max_flat],
    SAME padding handled by simply omitting out-of-range taps (zeros in M).
    """
    HW = H * W
    rows, cols, taps = [], [], []
    for p in range(HW):
        r, c = divmod(p, W)
        for ci in range(2):
            for kh in range(3):
                for kw in range(3):
                    rr, cc = r + kh - 1, c + kw - 1
                    if 0 <= rr < H and 0 <= cc < W:
                        rows.append(ci * HW + rr * W + cc)
                        cols.append(p)
                        taps.append(ci * 9 + kh * 3 + kw)
    w_flat = conv_weight.reshape(-1).astype(jnp.float32)     # (18,)
    m = jnp.zeros((2 * HW, HW), jnp.float32)
    m = m.at[jnp.asarray(rows), jnp.asarray(cols)].add(w_flat[jnp.asarray(taps)])
    return m


def _pick_block_batch(n, per_row_vmem_bytes, target_bytes=4 << 20):
    """Batch rows per grid step.

    per_row_vmem_bytes must already include the ceil(C/8) sublane padding;
    Pallas double-buffers the block (x2), covered by vmem_limit_bytes below.
    """
    if n < 8:
        return n                                   # tiny batch: one layout-legal block
    nb = max(8, int(target_bytes // max(per_row_vmem_bytes, 1)))
    nb = min(nb, n)
    nb -= nb % 8                                   # multiple of 8 sublanes
    nb = max(nb, 8)
    if nb >= n and n >= 16:
        # Force >= 2 grid steps: v7x megacore sharding + DMA/compute overlap.
        nb = -(-(n // 2) // 8) * 8
    return nb


def att_forward(x, conv_weight):
    """x: (N, C, H, W); conv_weight: (1, 2, 3, 3) -> (N, 1, H, W)."""
    N, C, H, W = x.shape
    HW = H * W

    conv_m = _make_conv_matrix(conv_weight, H, W)            # (2*HW, HW) f32
    x_flat = x.reshape(N, C, HW)                             # lane-dense view

    c_pad = -(-C // 8) * 8                                   # sublane-padded channels
    per_row_bytes = c_pad * HW * x.dtype.itemsize
    nb = _pick_block_batch(N, per_row_bytes)

    n_pad = -(-N // nb) * nb
    if n_pad != N:
        x_flat = jnp.pad(x_flat, ((0, n_pad - N), (0, 0), (0, 0)))
    grid = (n_pad // nb,)
    sub = 8 if nb % 8 == 0 else nb                           # in-kernel sub-tile rows

    kernel = functools.partial(_att_kernel, sub=sub)

    out_flat = pl.pallas_call(
        kernel,
        out_shape=jax.ShapeDtypeStruct((n_pad, HW), x.dtype),
        grid_spec=pltpu.PrefetchScalarGridSpec(
            num_scalar_prefetch=0,
            grid=grid,
            in_specs=[
                pl.BlockSpec((2 * HW, HW), lambda n: (0, 0)),    # conv matrix (resident)
                pl.BlockSpec((nb, C, HW), lambda n: (n, 0, 0)),  # x block
            ],
            out_specs=pl.BlockSpec((nb, HW), lambda n: (n, 0)),
        ),
        compiler_params=pltpu.CompilerParams(
            dimension_semantics=("parallel",),
            vmem_limit_bytes=32 * 1024 * 1024,
        ),
    )(conv_m, x_flat)

    return out_flat[:N].reshape(N, 1, H, W)


def _reference(x, conv_weight):
    """Pure-JAX reference matching the PyTorch forward."""
    avg_out = jnp.mean(x, axis=1, keepdims=True)
    max_out = jnp.max(x, axis=1, keepdims=True)
    feat = jnp.concatenate([avg_out, max_out], axis=1)       # (N, 2, H, W)
    out = jax.lax.conv_general_dilated(
        feat, conv_weight, window_strides=(1, 1), padding="SAME",
        dimension_numbers=("NCHW", "OIHW", "NCHW"),
        precision=jax.lax.Precision.HIGHEST)
    return jax.nn.sigmoid(out)


if __name__ == "__main__":
    key = jax.random.PRNGKey(0)
    kx, kw = jax.random.split(key)

    # Small shapes consistent with the module: batch=2, channels=4, spatial=16.
    x = jax.random.normal(kx, (2, 4, 16, 16), dtype=jnp.float32)
    # Conv2d(2, 1, 3, bias=False) weight -> (1, 2, 3, 3).
    conv_weight = 0.3 * jax.random.normal(kw, (1, 2, 3, 3), dtype=jnp.float32)

    out = att_forward(x, conv_weight)
    out = jax.block_until_ready(out)

    ref = _reference(x, conv_weight)
    assert out.shape == (2, 1, 16, 16)
    assert jnp.allclose(out, ref, atol=1e-4, rtol=1e-4)

    print("KERNEL_OK")
</pallas_src>

<mosaic_0001>
module attributes {stable_mosaic.version = 11 : i64} {
  func.func @_att_kernel(%arg0: i32, %arg1: memref<512x256xf32, #tpu.memory_space<vmem>>, %arg2: memref<2x4x256xf32, #tpu.memory_space<vmem>>, %arg3: memref<2x256xf32, #tpu.memory_space<vmem>>) attributes {dimension_semantics = [#tpu.dimension_semantics<parallel>], iteration_bounds = array<i64: 1>, scalar_prefetch = 0 : i64, scratch_operands = 0 : i64, tpu.core_type = #tpu.core_type<tc>, window_params = [{pipeline_mode = #tpu.pipeline_mode<synchronous>, transform_indices = @transform_0, window_bounds = array<i64: 512, 256>}, {transform_indices = @transform_1, window_bounds = array<i64: 2, 4, 256>}, {transform_indices = @transform_2, window_bounds = array<i64: 2, 256>}]} {
    %c0_i32 = arith.constant 0 : i32
    %c2_i32 = arith.constant 2 : i32
    %0 = arith.muli %c0_i32, %c2_i32 : i32
    %1 = tpu.assume_multiple %0, 2 : i32
    %2 = arith.index_cast %1 : i32 to index
    %c0 = arith.constant 0 : index
    %c0_0 = arith.constant 0 : index
    %3 = vector.load %arg2[%2, %c0, %c0_0] : memref<2x4x256xf32, #tpu.memory_space<vmem>>, vector<2x4x256xf32>
    %cst = arith.constant dense<0.000000e+00> : vector<2x256xf32>
    %4 = vector.multi_reduction <add>, %3, %cst [1] : vector<2x4x256xf32> to vector<2x256xf32>
    %cst_1 = arith.constant dense<0xFF800000> : vector<2x256xf32>
    %5 = vector.multi_reduction <maximumf>, %3, %cst_1 [1] : vector<2x4x256xf32> to vector<2x256xf32>
    %cst_2 = arith.constant 2.500000e-01 : f32
    %6 = vector.broadcast %cst_2 : f32 to vector<2x256xf32>
    %7 = arith.mulf %4, %6 : vector<2x256xf32>
    %c0_3 = arith.constant 0 : index
    %c0_4 = arith.constant 0 : index
    %8 = vector.load %arg1[%c0_3, %c0_4] : memref<512x256xf32, #tpu.memory_space<vmem>>, vector<256x256xf32>
    %cst_5 = arith.constant dense<0.000000e+00> : vector<2x256xf32>
    %9 = tpu.matmul %7, %8, %cst_5 {dimension_numbers = #tpu.dot_dimension_numbers<[1], [0], [0], [1], [0, 0, 1, 1], [], []>, precision = #tpu.contract_precision<fp32>} : vector<2x256xf32>, vector<256x256xf32>, vector<2x256xf32> -> vector<2x256xf32>
    %c256 = arith.constant 256 : index
    %c0_6 = arith.constant 0 : index
    %10 = vector.load %arg1[%c256, %c0_6] : memref<512x256xf32, #tpu.memory_space<vmem>>, vector<256x256xf32>
    %cst_7 = arith.constant dense<0.000000e+00> : vector<2x256xf32>
    %11 = tpu.matmul %5, %10, %cst_7 {dimension_numbers = #tpu.dot_dimension_numbers<[1], [0], [0], [1], [0, 0, 1, 1], [], []>, precision = #tpu.contract_precision<fp32>} : vector<2x256xf32>, vector<256x256xf32>, vector<2x256xf32> -> vector<2x256xf32>
    %12 = arith.addf %9, %11 : vector<2x256xf32>
    %13 = arith.negf %12 : vector<2x256xf32>
    %14 = math.exp %13 : vector<2x256xf32>
    %cst_8 = arith.constant 1.000000e+00 : f32
    %15 = vector.broadcast %cst_8 : f32 to vector<2x256xf32>
    %16 = arith.addf %15, %14 : vector<2x256xf32>
    %17 = arith.divf %15, %16 : vector<2x256xf32>
    %18 = arith.index_cast %1 : i32 to index
    %c0_9 = arith.constant 0 : index
    %19 = vector.load %arg3[%18, %c0_9] : memref<2x256xf32, #tpu.memory_space<vmem>>, vector<2x256xf32>
    tpu.vector_store %arg3[%18, %c0_9], %17 {strides = array<i32>} : memref<2x256xf32, #tpu.memory_space<vmem>>, vector<2x256xf32>,
    %c1_i32 = arith.constant 1 : i32
    return
  }
  func.func @transform_0(%arg0: i32) -> (i32, i32) {
    %c0_i32 = arith.constant 0 : i32
    %c0_i32_0 = arith.constant 0 : i32
    %c0_i32_1 = arith.constant 0 : i32
    return %c0_i32, %c0_i32_0 : i32, i32
  }
  func.func @transform_1(%arg0: i32) -> (i32, i32, i32) {
    %c0_i32 = arith.constant 0 : i32
    %c0_i32_0 = arith.constant 0 : i32
    %c0_i32_1 = arith.constant 0 : i32
    return %arg0, %c0_i32, %c0_i32_0 : i32, i32, i32
  }
  func.func @transform_2(%arg0: i32) -> (i32, i32) {
    %c0_i32 = arith.constant 0 : i32
    %c0_i32_0 = arith.constant 0 : i32
    return %arg0, %c0_i32 : i32, i32
  }
}

</mosaic_0001>

<bundles_post_ra>
// kernel: tpu_custom_call.1
= control target key start
LH: loop header
LB: loop body
LE: loop exit
PB: predicated region body
PF: predicated region fallthrough
CT: control target
= control target key end

     0   :  { %7 = vsyncpa [#allocation3], 0  ;;  %s5431_s0 = inlined_call_operand.hbm [shape: f32[512,256], index: 0, kind: input, shape index: {}]   ;;  %s5432_s1 = inlined_call_operand.hbm [shape: f32[2,4,256], index: 1, kind: input, shape index: {}]   ;;  %s5433_s2 = inlined_call_operand.hbm [shape: f32[2,256], index: 2, kind: output, shape index: {}]  }
   0x1   :  { %8 = vsyncpa [#allocation6], 0 }
   0x2   :  { %9 = vsyncpa [#allocation4], 0  ;;  %s2954_s9 = smov [#allocation2]  }
   0x3   :  { %s15_s10 = sshll.u32 %s2954_s9, 4  ;;  %s16_s10 = int_to_ptr.vmem [resolvable:$true] %s15_s10 }
   0x4   :  { %s2896_s11 = scalar_lea.vmem %s16_s10, 16384  ;;  %p2901_p1 = scmp.lt.s32.totalorder %s16_s10, %s16_s10 }
   0x5   :  { %p2897_p0 = scmp.ne.s32.totalorder %s16_s10, %s2896_s11  ;;  %p2902_p2 = scmp.lt.s32.totalorder %s2896_s11, %s2896_s11 }
   0x7   :  { %p2903_p3 = por %p2902_p2, %p2901_p1 }
   0x9   :  { %p2904_p4 = pnand %p2903_p3, %p2897_p0 }
   0xb   :  { %2907 = shalt.err (!%p2904_p4)
}
   0xc   :  { %s2955_s12 = smov 256   ;;  %s2956_s13 = smov 16  }
   0xd   :  { %21 = dma.hbm_to_vmem [thread:$0]  %s5431_s0, 16384, %s16_s10, [#allocation3], %s2955_s12, %s2955_s12, %s2956_s13  }
   0xe   :  { %s2957_s16 = smov [#allocation5]  }
   0xf   :  { %s27_s17 = sshll.u32 %s2957_s16, 4  ;;  %s28_s17 = int_to_ptr.vmem [resolvable:$true] %s27_s17 }
  0x10   :  { %s2916_s18 = scalar_lea.vmem %s28_s17, 256  ;;  %p2921_p6 = scmp.lt.s32.totalorder %s28_s17, %s28_s17 }
  0x11   :  { %p2917_p5 = scmp.ne.s32.totalorder %s28_s17, %s2916_s18  ;;  %p2922_p7 = scmp.lt.s32.totalorder %s2916_s18, %s2916_s18 }
  0x13   :  { %p2923_p8 = por %p2922_p7, %p2921_p6 }
  0x15   :  { %p2924_p9 = pnand %p2923_p8, %p2917_p5 }
  0x17   :  { %2927 = shalt.err (!%p2924_p9)
}
  0x18   :  { %s2958_s19 = smov 128   ;;  %s2959_s20 = smov 8  }
  0x19   :  { %33 = dma.hbm_to_vmem [thread:$0]  %s5432_s1, 256, %s28_s17, [#allocation6], %s2958_s19, %s2958_s19, %s2959_s20  }
  0x1a   :  { %2948 = dma.done.wait [#allocation3], 16384  }
  0x1b   :  { %2949 = vsyncadd [#allocation3], 4294950912 }
  0x1c   :  { %2950 = dma.done.wait [#allocation6], 256  }
  0x1d   :  { %2951 = vsyncadd [#allocation6], 4294967040  ;;  %v207_v0 = vld [vmem:[#allocation2 + $0x2f8] sm:$0xff]  ;;  %v206_v1 = vld [vmem:[#allocation2 + $0x2f0] sm:$0xff]  ;;  %vm51_vm0 = vcmask 1043456   ;;  %vm244_vm1 = vcmask 1041409  }
  0x1e   :  { %v205_v2 = vld [vmem:[#allocation2 + $0x2e8] sm:$0xff]  ;;  %v2982_v3 = vand.u32 4294901760, %v207_v0  ;;  %v2984_v4 = vand.u32 4294901760, %v206_v1  ;;  %v204_v6 = vld [vmem:[#allocation2 + $0x2e0] sm:$0xff]  ;;  %v203_v7 = vld [vmem:[#allocation2 + $0x2d8] sm:$0xff]  ;;  %s2960_s0 = smov [#allocation7]  }
  0x1f   :  { %v2986_v5 = vand.u32 4294901760, %v205_v2  ;;  %v202_v8 = vld [vmem:[#allocation2 + $0x2d0] sm:$0xff]  ;;  %v2988_v9 = vand.u32 4294901760, %v204_v6  ;;  %v2990_v10 = vand.u32 4294901760, %v203_v7  ;;  %v201_v12 = vld [vmem:[#allocation2 + $0x2c8] sm:$0xff]  ;;  %v200_v13 = vld [vmem:[#allocation2 + $0x2c0] sm:$0xff] }
  0x20   :  { %v2992_v11 = vand.u32 4294901760, %v202_v8  ;;  %v199_v14 = vld [vmem:[#allocation2 + $0x2b8] sm:$0xff]  ;;  %250 = vmatprep.subr.mxu0 %v2982_v3  ;;  %v2995_v15 = vand.u32 4294901760, %v201_v12  ;;  %v2997_v16 = vand.u32 4294901760, %v200_v13  ;;  %v3002_v18 = vsub.f32 %v207_v0, %v2982_v3  ;;  %v3004_v19 = vld [vmem:[#allocation2 + $0x2b0] sm:$0xff]  ;;  %v3006_v20 = vld [vmem:[#allocation2 + $0x2a8] sm:$0xff] }
  0x21   :  { %v2999_v17 = vand.u32 4294901760, %v199_v14  ;;  %v3008_v21 = vld [vmem:[#allocation2 + $0x2a0] sm:$0xff]  ;;  %252 = vmatpush1.msra.mxu0 %v2984_v4  ;;  %v3012_v22 = vand.u32 4294901760, %v3004_v19  ;;  %v3015_v23 = vsub.f32 %v206_v1, %v2984_v4  ;;  %v3018_v24 = vand.u32 4294901760, %v3006_v20  ;;  %v3023_v26 = vld [vmem:[#allocation2 + $0x298] sm:$0xff]  ;;  %v3025_v27 = vld [vmem:[#allocation2 + $0x290] sm:$0xff] }
  0x22   :  { %5851 = vst [vmem:[#allocation11_spill] sm:$0xff] %v3002_v18  ;;  %v3021_v25 = vsub.f32 %v205_v2, %v2986_v5  ;;  %v3027_v28 = vld [vmem:[#allocation2 + $0x288] sm:$0xff]  ;;  %254 = vmatprep.subr.mxu0 %v2986_v5  ;;  %v5447_v29 = vand.u32 4294901760, %v3002_v18  ;;  %v3032_v30 = vand.u32 4294901760, %v3008_v21  ;;  %v3035_v31 = vsub.f32 %v204_v6, %v2988_v9  ;;  %v3049_v37 = vld [vmem:[#allocation2 + $0x280] sm:$0xff]  ;;  %v3073_v46 = vld [vmem:[#allocation2 + $0x278] sm:$0xff] }
  0x23   :  { %v3038_v32 = vand.u32 4294901760, %v3023_v26  ;;  %256 = vmatpush1.msra.mxu0 %v2988_v9  ;;  %v5445_v33 = vand.u32 4294901760, %v3015_v23  ;;  %v3044_v35 = vsub.f32 %v203_v7, %v2990_v10  ;;  %v3047_v36 = vand.u32 4294901760, %v3025_v27  ;;  %v3083_v51 = vld [vmem:[#allocation2 + $0x270] sm:$0xff]  ;;  %v3090_v56 = vld [vmem:[#allocation2 + $0x268] sm:$0xff]  ;;  %v3102_v61 = vld [vmem:[#allocation2 + $0x260] sm:$0xff] }
  0x24   :  { %v5444_v34 = vand.u32 4294901760, %v3021_v25  ;;  %258 = vmatprep.subr.mxu0 %v2990_v10  ;;  %v397_v38 = vsub.f32 %v3002_v18, %v5447_v29  ;;  %v5442_v39 = vand.u32 4294901760, %v3035_v31  ;;  %v3057_v40 = vsub.f32 %v202_v8, %v2992_v11  ;;  %v3114_v2 = vld [vmem:[#allocation2 + $0x258] sm:$0xff]  ;;  %s2858_s1 = sshll.u32 %s2960_s0, 4  ;;  %s2859_s1 = int_to_ptr.vmem [resolvable:$true] %s2858_s1 }
  0x25   :  { %v3060_v41 = vand.u32 4294901760, %v3027_v28  ;;  %260 = vmatpush1.msra.mxu0 %v2992_v11  ;;  %v403_v42 = vsub.f32 %v3015_v23, %v5445_v33  ;;  %v5440_v44 = vand.u32 4294901760, %v3044_v35  ;;  %v3071_v45 = vsub.f32 %v201_v12, %v2995_v15  ;;  %s2928_s23 = scalar_lea.vmem %s2859_s1, 64  ;;  %p2933_p11 = scmp.lt.s32.totalorder %s2859_s1, %s2859_s1 }
  0x26   :  { %v409_v43 = vsub.f32 %v3021_v25, %v5444_v34  ;;  %262 = vmatprep.subr.mxu0 %v2995_v15  ;;  %v398_v47 = vand.u32 4294901760, %v397_v38  ;;  %v415_v48 = vsub.f32 %v3035_v31, %v5442_v39  ;;  %v5439_v49 = vand.u32 4294901760, %v3057_v40  ;;  %v3205_v39 = vld [vmem:[#allocation2 + $0x228] sm:$0xff]  ;;  %v3215_v34 = vld [vmem:[#allocation2 + $0x220] sm:$0xff]  ;;  %p2929_p10 = scmp.ne.s32.totalorder %s2859_s1, %s2928_s23  ;;  %p2934_p12 = scmp.lt.s32.totalorder %s2928_s23, %s2928_s23 }
  0x27   :  { %v3081_v50 = vand.u32 4294901760, %v3049_v37  ;;  %264 = vmatpush1.msra.mxu0 %v2997_v16  ;;  %v404_v52 = vand.u32 4294901760, %v403_v42  ;;  %v421_v54 = vsub.f32 %v3044_v35, %v5440_v44  ;;  %v5437_v55 = vand.u32 4294901760, %v3071_v45 }
  0x28   :  { %v410_v53 = vand.u32 4294901760, %v409_v43  ;;  %266 = vmatprep.subr.mxu0 %v2999_v17  ;;  %399 = vmatprep.subr.mxu1 %v398_v47  ;;  %v416_v57 = vand.u32 4294901760, %v415_v48  ;;  %v427_v58 = vsub.f32 %v3057_v40, %v5439_v49  ;;  %v3097_v59 = vsub.f32 %v200_v13, %v2997_v16  ;;  %v3125_v13 = vld [vmem:[#allocation2 + $0x250] sm:$0xff]  ;;  %p2935_p13 = por %p2934_p12, %p2933_p11 }
  0x29   :  { %v3100_v60 = vand.u32 4294901760, %v3073_v46  ;;  %268 = vmatpush1.msra.mxu0 %v3012_v22  ;;  %405 = vmatpush1.msra.mxu1 %v404_v52  ;;  %v422_v62 = vand.u32 4294901760, %v421_v54  ;;  %v433_v63 = vsub.f32 %v3071_v45, %v5437_v55  ;;  %v3109_v0 = vsub.f32 %v199_v14, %v2999_v17  ;;  %v3192_v49 = vld [vmem:[#allocation2 + $0x230] sm:$0xff] }
  0x2a   :  { %v3112_v1 = vand.u32 4294901760, %v3083_v51  ;;  %270 = vmatprep.subr.mxu0 %v3018_v24  ;;  %411 = vmatprep.subr.mxu1 %v410_v53  ;;  %v428_v6 = vand.u32 4294901760, %v427_v58  ;;  %v5435_v7 = vand.u32 4294901760, %v3097_v59  ;;  %v3120_v8 = vsub.f32 %v3004_v19, %v3012_v22  ;;  %p2936_p0 = pnand %p2935_p13, %p2929_p10 }
  0x2b   :  { %5852 = vst [vmem:[#allocation12_spill] sm:$0xff] %v3100_v60  ;;  %v3123_v12 = vand.u32 4294901760, %v3090_v56  ;;  %272 = vmatpush1.msra.mxu0 %v3032_v30  ;;  %417 = vmatpush1.msra.mxu1 %v416_v57  ;;  %v434_v14 = vand.u32 4294901760, %v433_v63  ;;  %v5434_v38 = vand.u32 4294901760, %v3109_v0  ;;  %v3131_v42 = vsub.f32 %v3006_v20, %v3018_v24  ;;  %v3148_v20 = vld [vmem:[#allocation2 + $0x248] sm:$0xff] }
  0x2c   :  { %5853 = vst [vmem:[#allocation13_spill] sm:$0xff] %v3112_v1  ;;  %v3134_v43 = vand.u32 4294901760, %v3102_v61  ;;  %274 = vmatprep.subr.mxu0 %v3038_v32  ;;  %423 = vmatprep.subr.mxu1 %v422_v62  ;;  %v439_v19 = vsub.f32 %v3097_v59, %v5435_v7  ;;  %v5436_v47 = vand.u32 4294901760, %v3120_v8  ;;  %v3143_v48 = vsub.f32 %v3008_v21, %v3032_v30 }
  0x2d   :  { %5854 = vst [vmem:[#allocation14_spill] sm:$0xff] %v3123_v12  ;;  %v3146_v52 = vand.u32 4294901760, %v3114_v2  ;;  %276 = vmatpush1.msra.mxu0 %v3047_v36  ;;  %429 = vmatpush1.msra.mxu1 %v428_v6  ;;  %v445_v53 = vsub.f32 %v3109_v0, %v5434_v38  ;;  %v5438_v54 = vand.u32 4294901760, %v3131_v42  ;;  %v3157_v57 = vsub.f32 %v3023_v26, %v3038_v32  ;;  %v3171_v38 = vld [vmem:[#allocation2 + $0x240] sm:$0xff] }
  0x2e   :  { %5855 = vst [vmem:[#allocation15_spill] sm:$0xff] %v3134_v43  ;;  %v3160_v21 = vand.u32 4294901760, %v3125_v13  ;;  %278 = vmatprep.subr.mxu0 %v3060_v41  ;;  %435 = vmatprep.subr.mxu1 %v434_v14  ;;  %v440_v58 = vand.u32 4294901760, %v439_v19  ;;  %v451_v62 = vsub.f32 %v3120_v8, %v5436_v47  ;;  %v5441_v63 = vand.u32 4294901760, %v3143_v48  ;;  %v3181_v47 = vld [vmem:[#allocation2 + $0x238] sm:$0xff] }
  0x2f   :  { %5856 = vst [vmem:[#allocation16_spill] sm:$0xff] %v3146_v52  ;;  %5857 = vst [vmem:[#allocation17_spill] sm:$0xff] %v3157_v57  ;;  %v3169_v6 = vsub.f32 %v3025_v27, %v3047_v36  ;;  %280 = vmatpush1.msra.mxu0 %v3081_v50  ;;  %v446_v26 = vand.u32 4294901760, %v445_v53  ;;  %v457_v14 = vsub.f32 %v3131_v42, %v5438_v54  ;;  %v5443_v19 = vand.u32 4294901760, %v3157_v57 }
  0x30   :  { %5858 = vst [vmem:[#allocation18_spill] sm:$0xff] %v3160_v21  ;;  %v3179_v7 = vand.u32 4294901760, %v3148_v20  ;;  %441 = vmatpush1.msra.mxu1 %v440_v58  ;;  %282 = vmatprep.subr.mxu0 %v3100_v60  ;;  %v452_v27 = vand.u32 4294901760, %v451_v62  ;;  %v463_v55 = vsub.f32 %v3143_v48, %v5441_v63  ;;  %v3190_v54 = vsub.f32 %v3027_v28, %v3060_v41 }
  0x31   :  { %5859 = vst [vmem:[#allocation19_spill] sm:$0xff] %v3169_v6  ;;  %v5446_v53 = vand.u32 4294901760, %v3169_v6  ;;  %447 = vmatprep.subr.mxu1 %v446_v26  ;;  %284 = vmatpush1.msra.mxu0 %v3112_v1  ;;  %v458_v44 = vand.u32 4294901760, %v457_v14  ;;  %v469_v58 = vsub.f32 %v3157_v57, %v5443_v19  ;;  %v3199_v62 = vand.u32 4294901760, %v3171_v38 }
  0x32   :  { %5860 = vst [vmem:[#allocation20_spill] sm:$0xff] %v3179_v7  ;;  %5861 = vst [vmem:[#allocation21_spill] sm:$0xff] %v3190_v54  ;;  %v3203_v63 = vsub.f32 %v3049_v37, %v3081_v50  ;;  %453 = vmatpush1.msra.mxu1 %v452_v27  ;;  %286 = vmatprep.subr.mxu0 %v3123_v12  ;;  %v464_v28 = vand.u32 4294901760, %v463_v55  ;;  %v5450_v14 = vand.u32 4294901760, %v3190_v54  ;;  %v3213_v19 = vand.u32 4294901760, %v3181_v47 }
  0x33   :  { %5862 = vst [vmem:[#allocation22_spill] sm:$0xff] %v3199_v62  ;;  %v475_v26 = vsub.f32 %v3169_v6, %v5446_v53  ;;  %459 = vmatprep.subr.mxu1 %v458_v44  ;;  %288 = vmatpush1.msra.mxu0 %v3134_v43  ;;  %v470_v37 = vand.u32 4294901760, %v469_v58  ;;  %v3221_v55 = vsub.f32 %v3073_v46, %v3100_v60  ;;  %v3224_v33 = vand.u32 4294901760, %v3192_v49  ;;  %v3226_v53 = vld [vmem:[#allocation2 + $0x218] sm:$0xff] }
  0x34   :  { %5863 = vst [vmem:[#allocation23_spill] sm:$0xff] %v3203_v63  ;;  %5864 = vst [vmem:[#allocation24_spill] sm:$0xff] %v3213_v19  ;;  %v5453_v27 = vand.u32 4294901760, %v3203_v63  ;;  %465 = vmatpush1.msra.mxu1 %v464_v28  ;;  %290 = vmatprep.subr.mxu0 %v3146_v52  ;;  %v481_v44 = vsub.f32 %v3190_v54, %v5450_v14  ;;  %v3234_v58 = vsub.f32 %v3083_v51, %v3112_v1  ;;  %v3251_v51 = vld [vmem:[#allocation2 + $0x210] sm:$0xff] }
  0x35   :  { %5865 = vst [vmem:[#allocation25_spill] sm:$0xff] %v3221_v55  ;;  %5866 = vst [vmem:[#allocation26_spill] sm:$0xff] %v3224_v33  ;;  %v476_v29 = vand.u32 4294901760, %v475_v26  ;;  %v3237_v46 = vand.u32 4294901760, %v3205_v39  ;;  %471 = vmatprep.subr.mxu1 %v470_v37  ;;  %292 = vmatpush1.msra.mxu0 %v3160_v21  ;;  %v3246_v6 = vsub.f32 %v3090_v56, %v3123_v12  ;;  %v3249_v14 = vand.u32 4294901760, %v3215_v34  ;;  %v3262_v56 = vld [vmem:[#allocation2 + $0x208] sm:$0xff] }
  0x36   :  { %5867 = vst [vmem:[#allocation27_spill] sm:$0xff] %v3234_v58  ;;  %v487_v28 = vsub.f32 %v3203_v63, %v5453_v27  ;;  %294 = vmatprep.subr.mxu0 %v3179_v7  ;;  %v482_v37 = vand.u32 4294901760, %v481_v44  ;;  %v3257_v27 = vsub.f32 %v3102_v61, %v3134_v43  ;;  %v3260_v26 = vand.u32 4294901760, %v3226_v53  ;;  %v3285_v44 = vld [vmem:[#allocation2 + $0x200] sm:$0xff] }
  0x37   :  { %5868 = vst [vmem:[#allocation28_spill] sm:$0xff] %v3237_v46  ;;  %5869 = vst [vmem:[#allocation29_spill] sm:$0xff] %v3246_v6  ;;  %477 = vmatpush1.msra.mxu1 %v476_v29  ;;  %296 = vmatpush1.msra.mxu0 %v3199_v62  ;;  %v5873_v12 = vand.u32 4294901760, %v3221_v55  ;;  %v3271_v54 = vsub.f32 %v3114_v2, %v3146_v52  ;;  %v5875_v61 = vand.u32 4294901760, %v3234_v58  ;;  %v3293_v1 = vand.u32 4294901760, %v3262_v56 }
  0x38   :  { %5870 = vst [vmem:[#allocation30_spill] sm:$0xff] %v3249_v14  ;;  %5871 = vst [vmem:[#allocation31_spill] sm:$0xff] %v3257_v27  ;;  %v488_v63 = vand.u32 4294901760, %v487_v28  ;;  %483 = vmatprep.subr.mxu1 %v482_v37  ;;  %298 = vmatprep.subr.mxu0 %v3213_v19  ;;  %v3279_v28 = vand.u32 4294901760, %v3251_v51  ;;  %v5878_v37 = vand.u32 4294901760, %v3246_v6  ;;  %v3313_v60 = vand.u32 4294901760, %v3285_v44 }
  0x39   :  { %5872 = vst [vmem:[#allocation32_spill] sm:$0xff] %v3260_v26  ;;  %v493_v29 = vsub.f32 %v3221_v55, %v5873_v12  ;;  %5874 = vst [vmem:[#allocation33_spill] sm:$0xff] %v3271_v54  ;;  %v499_v43 = vsub.f32 %v3234_v58, %v5875_v61  ;;  %v3283_v12 = vsub.f32 %v3125_v13, %v3160_v21  ;;  %300 = vmatpush1.msra.mxu0 %v3224_v33  ;;  %v3295_v58 = vld [vmem:[#allocation2 + $0x3f8] sm:$0xff] }
  0x3a   :  { %5876 = vst [vmem:[#allocation34_spill] sm:$0xff] %v3279_v28  ;;  %489 = vmatpush1.msra.mxu1 %v488_v63  ;;  %v505_v52 = vsub.f32 %v3246_v6, %v5878_v37  ;;  %5879 = vst [vmem:[#allocation36_spill] sm:$0xff] %v3293_v1  ;;  %302 = vmatprep.subr.mxu0 %v3237_v46  ;;  %v5880_v13 = vand.u32 4294901760, %v3257_v27  ;;  %v3304_v21 = vsub.f32 %v3148_v20, %v3179_v7  ;;  %v3306_v37 = vld [vmem:[#allocation2 + $0x3f0] sm:$0xff] }
  0x3b   :  { %5877 = vst [vmem:[#allocation35_spill] sm:$0xff] %v3283_v12  ;;  %v494_v2 = vand.u32 4294901760, %v493_v29  ;;  %v500_v55 = vand.u32 4294901760, %v499_v43  ;;  %304 = vmatpush1.msra.mxu0 %v3249_v14  ;;  %v5882_v43 = vand.u32 4294901760, %v3271_v54  ;;  %5883 = vst [vmem:[#allocation38_spill] sm:$0xff] %v3313_v60  ;;  %v3319_v29 = vld [vmem:[#allocation2 + $0x3e8] sm:$0xff] }
  0x3c   :  { %v511_v63 = vsub.f32 %v3257_v27, %v5880_v13  ;;  %5881 = vst [vmem:[#allocation37_spill] sm:$0xff] %v3304_v21  ;;  %v506_v61 = vand.u32 4294901760, %v505_v52  ;;  %v3317_v13 = vsub.f32 %v3171_v38, %v3199_v62  ;;  %306 = vmatprep.subr.mxu0 %v3260_v26  ;;  %v5885_v52 = vand.u32 4294901760, %v3283_v12 }
  0x3d   :  { %495 = vmatprep.subr.mxu1 %v494_v2  ;;  %v517_v6 = vsub.f32 %v3271_v54, %v5882_v43  ;;  %v3327_v43 = vand.u32 4294901760, %v3295_v58  ;;  %v3329_v54 = vld [vmem:[#allocation2 + $0x3e0] sm:$0xff]  ;;  %308 = vmatpush1.msra.mxu0 %v3279_v28  ;;  %v3338_v62 = vand.u32 4294901760, %v3306_v37 }
  0x3e   :  { %5884 = vst [vmem:[#allocation39_spill] sm:$0xff] %v3317_v13  ;;  %501 = vmatpush1.msra.mxu1 %v500_v55  ;;  %v512_v20 = vand.u32 4294901760, %v511_v63  ;;  %v523_v2 = vsub.f32 %v3283_v12, %v5885_v52  ;;  %v3335_v63 = vsub.f32 %v3181_v47, %v3213_v19  ;;  %v3340_v52 = vld [vmem:[#allocation2 + $0x3d8] sm:$0xff]  ;;  %310 = vmatprep.subr.mxu0 %v3293_v1  ;;  %v3351_v47 = vand.u32 4294901760, %v3319_v29 }
  0x3f   :  { %5886 = vst [vmem:[#allocation40_spill] sm:$0xff] %v3327_v43  ;;  %507 = vmatprep.subr.mxu1 %v506_v61  ;;  %v518_v38 = vand.u32 4294901760, %v517_v6  ;;  %5888 = vst [vmem:[#allocation42_spill] sm:$0xff] %v3338_v62  ;;  %v5889_v61 = vand.u32 4294901760, %v3304_v21  ;;  %v3348_v55 = vsub.f32 %v3192_v49, %v3224_v33  ;;  %312 = vmatpush1.msra.mxu0 %v3313_v60  ;;  %v5892_v12 = vand.u32 4294901760, %v3317_v13  ;;  %v3365_v49 = vld [vmem:[#allocation2 + $0x3d0] sm:$0xff] }
  0x40   :  { %5887 = vst [vmem:[#allocation41_spill] sm:$0xff] %v3335_v63  ;;  %513 = vmatpush1.msra.mxu1 %v512_v20  ;;  %v524_v27 = vand.u32 4294901760, %v523_v2  ;;  %5891 = vst [vmem:[#allocation44_spill] sm:$0xff] %v3351_v47  ;;  %v3360_v19 = vsub.f32 %v3205_v39, %v3237_v46  ;;  %314 = vmatprep.subr.mxu0 %v3327_v43  ;;  %v3374_v2 = vand.u32 4294901760, %v3340_v52  ;;  %v3376_v39 = vld [vmem:[#allocation2 + $0x3c8] sm:$0xff]  ;;  %v5897_v46 = vand.u32 4294901760, %v3335_v63 }
  0x41   :  { %v529_v6 = vsub.f32 %v3304_v21, %v5889_v61  ;;  %5890 = vst [vmem:[#allocation43_spill] sm:$0xff] %v3348_v55  ;;  %519 = vmatprep.subr.mxu1 %v518_v38  ;;  %v535_v20 = vsub.f32 %v3317_v13, %v5892_v12  ;;  %v3363_v61 = vand.u32 4294901760, %v3329_v54  ;;  %v5496_v38 = vand.u32 4294901760, %v3348_v55  ;;  %316 = vmatpush2.msra.mxu0 %v3338_v62 }
  0x42   :  { %5893 = vst [vmem:[#allocation45_spill] sm:$0xff] %v3360_v19  ;;  %525 = vmatpush1.msra.mxu1 %v524_v27  ;;  %v3371_v12 = vsub.f32 %v3215_v34, %v3249_v14  ;;  %5896 = vst [vmem:[#allocation48_spill] sm:$0xff] %v3374_v2  ;;  %v541_v33 = vsub.f32 %v3335_v63, %v5897_v46  ;;  %318 = vmatprep.subr.mxu0 %v3351_v47  ;;  %v3393_v14 = vand.u32 4294901760, %v3365_v49  ;;  %v3399_v27 = vld [vmem:[#allocation2 + $0x3c0] sm:$0xff] }
  0x43   :  { %5894 = vst [vmem:[#allocation46_spill] sm:$0xff] %v3363_v61  ;;  %v530_v21 = vand.u32 4294901760, %v529_v6  ;;  %v536_v13 = vand.u32 4294901760, %v535_v20  ;;  %v3385_v6 = vsub.f32 %v3226_v53, %v3260_v26  ;;  %v547_v34 = vsub.f32 %v3348_v55, %v5496_v38  ;;  %320 = vmatpush2.msra.mxu0 %v3363_v61  ;;  %v3409_v55 = vld [vmem:[#allocation2 + $0x3b8] sm:$0xff] }
  0x44   :  { %5895 = vst [vmem:[#allocation47_spill] sm:$0xff] %v3371_v12  ;;  %5899 = vst [vmem:[#allocation50_spill] sm:$0xff] %v3393_v14  ;;  %v3397_v46 = vsub.f32 %v3251_v51, %v3279_v28  ;;  %v542_v53 = vand.u32 4294901760, %v541_v33  ;;  %v3407_v20 = vand.u32 4294901760, %v3376_v39  ;;  %v5903_v51 = vand.u32 4294901760, %v3371_v12  ;;  %322 = vmatprep.subr.mxu0 %v3374_v2 }
  0x45   :  { %5898 = vst [vmem:[#allocation49_spill] sm:$0xff] %v3385_v6  ;;  %531 = vmatprep.subr.mxu1 %v530_v21  ;;  %v5901_v21 = vand.u32 4294901760, %v3360_v19  ;;  %v548_v63 = vand.u32 4294901760, %v547_v34  ;;  %324 = vmatpush2.msra.mxu0 %v3393_v14  ;;  %v3431_v33 = vsub.f32 %v3285_v44, %v3313_v60 }
  0x46   :  { %5900 = vst [vmem:[#allocation51_spill] sm:$0xff] %v3397_v46  ;;  %537 = vmatpush1.msra.mxu1 %v536_v13  ;;  %5902 = vst [vmem:[#allocation52_spill] sm:$0xff] %v3407_v20  ;;  %v559_v28 = vsub.f32 %v3371_v12, %v5903_v51  ;;  %v3418_v13 = vsub.f32 %v3262_v56, %v3293_v1  ;;  %v3427_v51 = vand.u32 4294901760, %v3399_v27  ;;  %v3433_v12 = vld [vmem:[#allocation2 + $0x3a8] sm:$0xff]  ;;  %326 = vmatprep.subr.mxu0 %v3407_v20  ;;  %v3443_v1 = vld [vmem:[#allocation2 + $0x3a0] sm:$0xff] }
  0x47   :  { %v553_v26 = vsub.f32 %v3360_v19, %v5901_v21  ;;  %v3420_v21 = vld [vmem:[#allocation2 + $0x3b0] sm:$0xff]  ;;  %543 = vmatprep.subr.mxu1 %v542_v53  ;;  %v5905_v19 = vand.u32 4294901760, %v3385_v6  ;;  %5907 = vst [vmem:[#allocation55_spill] sm:$0xff] %v3431_v33  ;;  %v5908_v53 = vand.u32 4294901760, %v3397_v46 }
  0x48   :  { %5904 = vst [vmem:[#allocation53_spill] sm:$0xff] %v3418_v13  ;;  %5906 = vst [vmem:[#allocation54_spill] sm:$0xff] %v3427_v51  ;;  %549 = vmatpush1.msra.mxu1 %v548_v63  ;;  %v560_v56 = vand.u32 4294901760, %v559_v28  ;;  %328 = vmatpush2.msra.mxu0 %v3427_v51  ;;  %v5519_v63 = vand.u32 4294901760, %v3431_v33  ;;  %v3449_v28 = vsub.f32 %v3295_v58, %v3327_v43  ;;  %v5912_v60 = vand.u32 4294901760, %v3418_v13 }
  0x49   :  { %v554_v38 = vand.u32 4294901760, %v553_v26  ;;  %v565_v34 = vsub.f32 %v3385_v6, %v5905_v19  ;;  %v571_v26 = vsub.f32 %v3397_v46, %v5908_v53  ;;  %v3441_v6 = vand.u32 4294901760, %v3409_v55  ;;  %v3454_v46 = vld [vmem:[#allocation2 + $0x398] sm:$0xff] }
  0x4a   :  { %5910 = vst [vmem:[#allocation57_spill] sm:$0xff] %v3449_v28  ;;  %v3452_v53 = vand.u32 4294901760, %v3420_v21  ;;  %v3465_v58 = vand.u32 4294901760, %v3433_v12  ;;  %v583_v43 = vsub.f32 %v3431_v33, %v5519_v63  ;;  %v3485_v63 = vsub.f32 %v3329_v54, %v3363_v61 }
  0x4b   :  { %5909 = vst [vmem:[#allocation56_spill] sm:$0xff] %v3441_v6  ;;  %555 = vmatprep.subr.mxu1 %v554_v38  ;;  %v566_v44 = vand.u32 4294901760, %v565_v34  ;;  %v572_v19 = vand.u32 4294901760, %v571_v26  ;;  %v577_v38 = vsub.f32 %v3418_v13, %v5912_v60  ;;  %330 = vmatprep.subr.mxu0 %v3441_v6  ;;  %v3462_v34 = vsub.f32 %v3306_v37, %v3338_v62  ;;  %v3479_v37 = vld [vmem:[#allocation2 + $0x390] sm:$0xff] }
  0x4c   :  { %5911 = vst [vmem:[#allocation58_spill] sm:$0xff] %v3452_v53  ;;  %561 = vmatpush1.msra.mxu1 %v560_v56  ;;  %5914 = vst [vmem:[#allocation60_spill] sm:$0xff] %v3465_v58  ;;  %332 = vmatpush2.msra.mxu0 %v3452_v53  ;;  %v3474_v60 = vsub.f32 %v3319_v29, %v3351_v47  ;;  %v3477_v26 = vand.u32 4294901760, %v3443_v1  ;;  %v3488_v56 = vand.u32 4294901760, %v3454_v46  ;;  %v3490_v29 = vld [vmem:[#allocation2 + $0x388] sm:$0xff]  ;;  %v584_v33 = vand.u32 4294901760, %v583_v43 }
  0x4d   :  { %5913 = vst [vmem:[#allocation59_spill] sm:$0xff] %v3462_v34  ;;  %567 = vmatprep.subr.mxu1 %v566_v44  ;;  %v578_v13 = vand.u32 4294901760, %v577_v38  ;;  %v5530_v44 = vand.u32 4294901760, %v3462_v34  ;;  %334 = vmatprep.subr.mxu0 %v3465_v58  ;;  %5917 = vst [vmem:[#allocation63_spill] sm:$0xff] %v3485_v63  ;;  %v5919_v47 = vand.u32 4294901760, %v3449_v28  ;;  %v3499_v38 = vsub.f32 %v3340_v52, %v3374_v2 }
  0x4e   :  { %5915 = vst [vmem:[#allocation61_spill] sm:$0xff] %v3474_v60  ;;  %5916 = vst [vmem:[#allocation62_spill] sm:$0xff] %v3477_v26  ;;  %573 = vmatpush1.msra.mxu1 %v572_v19  ;;  %336 = vmatpush2.msra.mxu0 %v3477_v26  ;;  %v3507_v43 = vand.u32 4294901760, %v3479_v37  ;;  %v3513_v19 = vld [vmem:[#allocation2 + $0x380] sm:$0xff]  ;;  %v3520_v61 = vand.u32 4294901760, %v3490_v29  ;;  %v5925_v7 = vand.u32 4294901760, %v3485_v63 }
  0x4f   :  { %5918 = vst [vmem:[#allocation64_spill] sm:$0xff] %v3488_v56  ;;  %v589_v62 = vsub.f32 %v3449_v28, %v5919_v47  ;;  %5920 = vst [vmem:[#allocation65_spill] sm:$0xff] %v3499_v38  ;;  %579 = vmatprep.subr.mxu1 %v578_v13  ;;  %v595_v54 = vsub.f32 %v3462_v34, %v5530_v44  ;;  %338 = vmatprep.subr.mxu0 %v3488_v56  ;;  %v5923_v13 = vand.u32 4294901760, %v3474_v60  ;;  %v3522_v34 = vld [vmem:[#allocation2 + $0x378] sm:$0xff] }
  0x50   :  { %5921 = vst [vmem:[#allocation66_spill] sm:$0xff] %v3507_v43  ;;  %v3511_v47 = vsub.f32 %v3365_v49, %v3393_v14  ;;  %585 = vmatpush1.msra.mxu1 %v584_v33  ;;  %5924 = vst [vmem:[#allocation68_spill] sm:$0xff] %v3520_v61  ;;  %v607_v49 = vsub.f32 %v3485_v63, %v5925_v7  ;;  %340 = vmatpush2.msra.mxu0 %v3507_v43  ;;  %v3540_v7 = vand.u32 4294901760, %v3513_v19  ;;  %v3546_v63 = vld [vmem:[#allocation2 + $0x368] sm:$0xff] }
  0x51   :  { %v590_v52 = vand.u32 4294901760, %v589_v62  ;;  %v601_v2 = vsub.f32 %v3474_v60, %v5923_v13  ;;  %v596_v28 = vand.u32 4294901760, %v595_v54  ;;  %v3531_v33 = vsub.f32 %v3376_v39, %v3407_v20  ;;  %v3533_v13 = vld [vmem:[#allocation2 + $0x370] sm:$0xff]  ;;  %342 = vmatprep.subr.mxu0 %v3520_v61 }
  0x52   :  { %5922 = vst [vmem:[#allocation67_spill] sm:$0xff] %v3511_v47  ;;  %v5927_v60 = vand.u32 4294901760, %v3499_v38  ;;  %5928 = vst [vmem:[#allocation70_spill] sm:$0xff] %v3540_v7  ;;  %v3544_v62 = vsub.f32 %v3399_v27, %v3427_v51  ;;  %v608_v39 = vand.u32 4294901760, %v607_v49  ;;  %344 = vmatpush2.msra.mxu0 %v3540_v7  ;;  %v3564_v49 = vand.u32 4294901760, %v3533_v13 }
  0x53   :  { %5926 = vst [vmem:[#allocation69_spill] sm:$0xff] %v3531_v33  ;;  %591 = vmatprep.subr.mxu1 %v590_v52  ;;  %v602_v44 = vand.u32 4294901760, %v601_v2  ;;  %v5930_v52 = vand.u32 4294901760, %v3511_v47 }
  0x54   :  { %v613_v54 = vsub.f32 %v3499_v38, %v5927_v60  ;;  %5929 = vst [vmem:[#allocation71_spill] sm:$0xff] %v3544_v62  ;;  %597 = vmatpush2.msra.mxu1 %v596_v28  ;;  %v3553_v60 = vand.u32 4294901760, %v3522_v34  ;;  %v3555_v38 = vld [vmem:[#allocation2 + $0x360] sm:$0xff]  ;;  %v5553_v27 = vand.u32 4294901760, %v3544_v62  ;;  %v3561_v28 = vsub.f32 %v3409_v55, %v3441_v6  ;;  %5933 = vst [vmem:[#allocation74_spill] sm:$0xff] %v3564_v49 }
  0x55   :  { %v619_v2 = vsub.f32 %v3511_v47, %v5930_v52  ;;  %603 = vmatprep.subr.mxu1 %v602_v44  ;;  %v3566_v52 = vld [vmem:[#allocation2 + $0x358] sm:$0xff]  ;;  %v5934_v47 = vand.u32 4294901760, %v3531_v33  ;;  %v3577_v55 = vand.u32 4294901760, %v3546_v63 }
  0x56   :  { %5931 = vst [vmem:[#allocation72_spill] sm:$0xff] %v3553_v60  ;;  %v614_v14 = vand.u32 4294901760, %v613_v54  ;;  %5932 = vst [vmem:[#allocation73_spill] sm:$0xff] %v3561_v28  ;;  %609 = vmatpush2.msra.mxu1 %v608_v39  ;;  %346 = vmatprep.subr.mxu0 %v3553_v60  ;;  %v3574_v54 = vsub.f32 %v3420_v21, %v3452_v53  ;;  %v631_v6 = vsub.f32 %v3544_v62, %v5553_v27  ;;  %v3591_v21 = vld [vmem:[#allocation2 + $0x350] sm:$0xff] }
  0x57   :  { %v620_v20 = vand.u32 4294901760, %v619_v2  ;;  %v625_v44 = vsub.f32 %v3531_v33, %v5934_v47  ;;  %5936 = vst [vmem:[#allocation76_spill] sm:$0xff] %v3577_v55  ;;  %348 = vmatpush2.msra.mxu0 %v3564_v49  ;;  %v3586_v47 = vsub.f32 %v3433_v12, %v3465_v58  ;;  %v3589_v2 = vand.u32 4294901760, %v3555_v38  ;;  %v3602_v12 = vld [vmem:[#allocation2 + $0x348] sm:$0xff] }
  0x58   :  { %5935 = vst [vmem:[#allocation75_spill] sm:$0xff] %v3574_v54  ;;  %615 = vmatprep.subr.mxu1 %v614_v14  ;;  %v5564_v14 = vand.u32 4294901760, %v3574_v54  ;;  %350 = vmatprep.subr.mxu0 %v3577_v55  ;;  %v3597_v27 = vsub.f32 %v3443_v1, %v3477_v26  ;;  %v3600_v39 = vand.u32 4294901760, %v3566_v52  ;;  %v632_v62 = vand.u32 4294901760, %v631_v6 }
  0x59   :  { %5937 = vst [vmem:[#allocation77_spill] sm:$0xff] %v3586_v47  ;;  %5938 = vst [vmem:[#allocation78_spill] sm:$0xff] %v3589_v2  ;;  %621 = vmatpush2.msra.mxu1 %v620_v20  ;;  %v626_v33 = vand.u32 4294901760, %v625_v44  ;;  %v5941_v58 = vand.u32 4294901760, %v3561_v28  ;;  %352 = vmatpush2.msra.mxu0 %v3589_v2  ;;  %v3611_v44 = vsub.f32 %v3454_v46, %v3488_v56  ;;  %v3619_v6 = vand.u32 4294901760, %v3591_v21  ;;  %v3625_v20 = vld [vmem:[#allocation2 + $0x340] sm:$0xff] }
  0x5a   :  { %5939 = vst [vmem:[#allocation79_spill] sm:$0xff] %v3597_v27  ;;  %5940 = vst [vmem:[#allocation80_spill] sm:$0xff] %v3600_v39  ;;  %v643_v1 = vsub.f32 %v3574_v54, %v5564_v14  ;;  %354 = vmatprep.subr.mxu0 %v3600_v39  ;;  %v3632_v26 = vand.u32 4294901760, %v3602_v12  ;;  %v3634_v54 = vld [vmem:[#allocation2 + $0x338] sm:$0xff]  ;;  %v5947_v51 = vand.u32 4294901760, %v3597_v27 }
  0x5b   :  { %v637_v53 = vsub.f32 %v3561_v28, %v5941_v58  ;;  %5942 = vst [vmem:[#allocation81_spill] sm:$0xff] %v3611_v44  ;;  %627 = vmatprep.subr.mxu1 %v626_v33  ;;  %5943 = vst [vmem:[#allocation82_spill] sm:$0xff] %v3619_v6  ;;  %v3623_v58 = vsub.f32 %v3479_v37, %v3507_v43  ;;  %v5945_v33 = vand.u32 4294901760, %v3586_v47  ;;  %356 = vmatpush2.msra.mxu0 %v3619_v6 }
  0x5c   :  { %633 = vmatpush2.msra.mxu1 %v632_v62  ;;  %5946 = vst [vmem:[#allocation84_spill] sm:$0xff] %v3632_v26  ;;  %v644_v28 = vand.u32 4294901760, %v643_v1  ;;  %v655_v37 = vsub.f32 %v3597_v27, %v5947_v51  ;;  %v3643_v62 = vsub.f32 %v3490_v29, %v3520_v61  ;;  %358 = vmatprep.subr.mxu0 %v3632_v26  ;;  %v3652_v51 = vand.u32 4294901760, %v3625_v20  ;;  %v3658_v27 = vld [vmem:[#allocation2 + $0x328] sm:$0xff] }
  0x5d   :  { %5944 = vst [vmem:[#allocation83_spill] sm:$0xff] %v3623_v58  ;;  %v638_v46 = vand.u32 4294901760, %v637_v53  ;;  %v649_v56 = vsub.f32 %v3586_v47, %v5945_v33  ;;  %v3645_v33 = vld [vmem:[#allocation2 + $0x330] sm:$0xff]  ;;  %v5949_v47 = vand.u32 4294901760, %v3611_v44  ;;  %v3656_v53 = vsub.f32 %v3513_v19, %v3540_v7 }
  0x5e   :  { %5948 = vst [vmem:[#allocation85_spill] sm:$0xff] %v3643_v62  ;;  %v656_v29 = vand.u32 4294901760, %v655_v37  ;;  %360 = vmatpush2.msra.mxu0 %v3652_v51  ;;  %v3676_v37 = vand.u32 4294901760, %v3645_v33 }
  0x5f   :  { %639 = vmatprep.subr.mxu1 %v638_v46  ;;  %v650_v14 = vand.u32 4294901760, %v649_v56  ;;  %v661_v1 = vsub.f32 %v3611_v44, %v5949_v47  ;;  %5950 = vst [vmem:[#allocation86_spill] sm:$0xff] %v3656_v53  ;;  %v5951_v46 = vand.u32 4294901760, %v3623_v58  ;;  %v3665_v47 = vand.u32 4294901760, %v3634_v54  ;;  %v3667_v44 = vld [vmem:[#allocation2 + $0x320] sm:$0xff] }
  0x60   :  { %645 = vmatpush2.msra.mxu1 %v644_v28  ;;  %v5587_v19 = vand.u32 4294901760, %v3656_v53  ;;  %v3673_v28 = vsub.f32 %v3522_v34, %v3553_v60  ;;  %5953 = vst [vmem:[#allocation88_spill] sm:$0xff] %v3676_v37  ;;  %v3689_v34 = vand.u32 4294901760, %v3658_v27 }
  0x61   :  { %v667_v56 = vsub.f32 %v3623_v58, %v5951_v46  ;;  %651 = vmatprep.subr.mxu1 %v650_v14  ;;  %v662_v43 = vand.u32 4294901760, %v661_v1  ;;  %v3678_v46 = vld [vmem:[#allocation2 + $0x318] sm:$0xff]  ;;  %v5954_v58 = vand.u32 4294901760, %v3643_v62  ;;  %362 = vmatprep.subr.mxu0 %v3665_v47  ;;  %v3686_v1 = vsub.f32 %v3533_v13, %v3564_v49 }
  0x62   :  { %5952 = vst [vmem:[#allocation87_spill] sm:$0xff] %v3673_v28  ;;  %657 = vmatpush2.msra.mxu1 %v656_v29  ;;  %5956 = vst [vmem:[#allocation90_spill] sm:$0xff] %v3689_v34  ;;  %v679_v29 = vsub.f32 %v3656_v53, %v5587_v19  ;;  %364 = vmatpush2.msra.mxu0 %v3676_v37  ;;  %v3701_v13 = vand.u32 4294901760, %v3667_v44  ;;  %v3709_v19 = vsub.f32 %v3555_v38, %v3589_v2 }
  0x63   :  { %v668_v61 = vand.u32 4294901760, %v667_v56  ;;  %v673_v14 = vsub.f32 %v3643_v62, %v5954_v58  ;;  %5955 = vst [vmem:[#allocation89_spill] sm:$0xff] %v3686_v1  ;;  %663 = vmatprep.subr.mxu1 %v662_v43  ;;  %v3698_v58 = vsub.f32 %v3546_v63, %v3577_v55  ;;  %v3703_v62 = vld [vmem:[#allocation2 + $0x310] sm:$0xff]  ;;  %v5598_v43 = vand.u32 4294901760, %v3686_v1  ;;  %366 = vmatprep.subr.mxu0 %v3689_v34  ;;  %v3714_v63 = vld [vmem:[#allocation2 + $0x308] sm:$0xff] }
  0x64   :  { %5958 = vst [vmem:[#allocation92_spill] sm:$0xff] %v3701_v13  ;;  %5959 = vst [vmem:[#allocation93_spill] sm:$0xff] %v3709_v19  ;;  %v3712_v56 = vand.u32 4294901760, %v3678_v46  ;;  %v680_v53 = vand.u32 4294901760, %v679_v29  ;;  %v5960_v55 = vand.u32 4294901760, %v3673_v28  ;;  %368 = vmatpush2.msra.mxu0 %v3701_v13  ;;  %v3731_v29 = vand.u32 4294901760, %v3703_v62 }
  0x65   :  { %5957 = vst [vmem:[#allocation91_spill] sm:$0xff] %v3698_v58  ;;  %669 = vmatpush2.msra.mxu1 %v668_v61  ;;  %v674_v49 = vand.u32 4294901760, %v673_v14  ;;  %v3723_v14 = vsub.f32 %v3566_v52, %v3600_v39  ;;  %v691_v38 = vsub.f32 %v3686_v1, %v5598_v43  ;;  %v3737_v61 = vld [vmem:[#allocation2 + $0x300] sm:$0xff]  ;;  %v3744_v2 = vand.u32 4294901760, %v3714_v63 }
  0x66   :  { %v685_v60 = vsub.f32 %v3673_v28, %v5960_v55  ;;  %370 = vmatprep.subr.mxu0 %v3712_v56  ;;  %5962 = vst [vmem:[#allocation95_spill] sm:$0xff] %v3731_v29  ;;  %v3735_v55 = vsub.f32 %v3591_v21, %v3619_v6  ;;  %v43_v1 = vld [vmem:[#allocation5] sm:$0xff]  ;;  %v5965_v7 = vand.u32 4294901760, %v3709_v19 }
  0x67   :  { %5961 = vst [vmem:[#allocation94_spill] sm:$0xff] %v3723_v14  ;;  %675 = vmatprep.subr.mxu1 %v674_v49  ;;  %v5963_v49 = vand.u32 4294901760, %v3698_v58  ;;  %5964 = vst [vmem:[#allocation96_spill] sm:$0xff] %v3744_v2  ;;  %v692_v28 = vand.u32 4294901760, %v691_v38  ;;  %372 = vmatpush2.msra.mxu0 %v3731_v29  ;;  %v3760_v38 = vand.u32 4294901760, %v3737_v61  ;;  %v3773_v57 = vsel %vm51_vm0, %v43_v1, 0.0 }
  0x68   :  { %681 = vmatpush2.msra.mxu1 %v680_v53  ;;  %v686_v52 = vand.u32 4294901760, %v685_v60  ;;  %v703_v21 = vsub.f32 %v3709_v19, %v5965_v7  ;;  %v3753_v60 = vsub.f32 %v3602_v12, %v3632_v26  ;;  %374 = vmatprep.subr.mxu0 %v3744_v2  ;;  %v3764_v7 = vsub.f32 %v3625_v20, %v3652_v51 }
  0x69   :  { %v697_v39 = vsub.f32 %v3698_v58, %v5963_v49  ;;  %v44_v49 = vld [vmem:[#allocation5 + $0x8] sm:$0xff]  ;;  %v5967_v58 = vand.u32 4294901760, %v3723_v14  ;;  %5968 = vst [vmem:[#allocation98_spill] sm:$0xff] %v3760_v38  ;;  %v5970_v12 = vand.u32 4294901760, %v3735_v55  ;;  %v47_v19 = vcombine.high %v43_v1, %v43_v1  ;;  %376 = vmatpush2.msra.mxu0 %v3760_v38  ;;  %5971 = vst [vmem:[#allocation100_spill] sm:$0xff] %v3773_v57 }
  0x6a   :  { %5966 = vst [vmem:[#allocation97_spill] sm:$0xff] %v3753_v60  ;;  %687 = vmatprep.subr.mxu1 %v686_v52  ;;  %5969 = vst [vmem:[#allocation99_spill] sm:$0xff] %v3764_v7  ;;  %v704_v53 = vand.u32 4294901760, %v703_v21  ;;  %v48_v26 = vcombine.high %v44_v49, %v44_v49  ;;  %789 = vmatprep.subr.mxu0 %v3002_v18  ;;  %v80_v18 = vsel %vm51_vm0, %v43_v1, -inf }
  0x6b   :  { %v698_v43 = vand.u32 4294901760, %v697_v39  ;;  %v709_v6 = vsub.f32 %v3723_v14, %v5967_v58  ;;  %693 = vmatpush2.msra.mxu1 %v692_v28  ;;  %v715_v52 = vsub.f32 %v3735_v55, %v5970_v12  ;;  %v5617_v39 = vand.u32 4294901760, %v3753_v60 }
  0x6c   :  { %v5620_v14 = vand.u32 4294901760, %v3764_v7  ;;  %v3779_v21 = vsel %vm51_vm0, %v47_v19, 0.0  ;;  %v3811_v1 = vsub.f32 %v3667_v44, %v3701_v13 }
  0x6d   :  { %699 = vmatprep.subr.mxu1 %v698_v43  ;;  %v710_v58 = vand.u32 4294901760, %v709_v6  ;;  %v716_v20 = vand.u32 4294901760, %v715_v52  ;;  %v721_v28 = vsub.f32 %v3753_v60, %v5617_v39  ;;  %5972 = vst [vmem:[#allocation101_spill] sm:$0xff] %v3779_v21  ;;  %v3786_v43 = vsel %vm51_vm0, %v44_v49, 0.0 }
  0x6e   :  { %705 = vmatpush2.msra.mxu1 %v704_v53  ;;  %v727_v6 = vsub.f32 %v3764_v7, %v5620_v14  ;;  %5973 = vst [vmem:[#allocation102_spill] sm:$0xff] %v3786_v43  ;;  %v3789_v53 = vsel %vm51_vm0, %v48_v26, 0.0  ;;  %v87_v52 = vsel %vm51_vm0, %v47_v19, -inf  ;;  %v101_v21 = vsel %vm51_vm0, %v48_v26, -inf }
  0x6f   :  { %711 = vmatprep.subr.mxu1 %v710_v58  ;;  %5974 = vst [vmem:[#allocation103_spill] sm:$0xff] %v3789_v53  ;;  %v722_v12 = vand.u32 4294901760, %v721_v28  ;;  %v88_v57 = vrot.slane %v87_v52, 4  ;;  %v3795_v58 = vsub.f32 %v3634_v54, %v3665_v47  ;;  %v102_v14 = vrot.slane %v101_v21, 4 }
  0x70   :  { %717 = vmatpush2.msra.mxu1 %v716_v20  ;;  %v728_v39 = vand.u32 4294901760, %v727_v6  ;;  %v94_v43 = vsel %vm51_vm0, %v44_v49, -inf  ;;  %v3801_v20 = vsub.f32 %v3645_v33, %v3676_v37  ;;  %v81_v26 = vrot.slane %v80_v18, 4 }
  0x71   :  { %723 = vmatprep.subr.mxu1 %v722_v12  ;;  %v89_v19 = vmax.f32 %v87_v52, %v88_v57  ;;  %v5636_v28 = vand.u32 4294901760, %v3795_v58  ;;  %v95_v6 = vrot.slane %v94_v43, 4  ;;  %v103_v53 = vmax.f32 %v101_v21, %v102_v14 }
  0x72   :  { %729 = vmatpush2.msra.mxu1 %v728_v39  ;;  %v5634_v54 = vand.u32 4294901760, %v3801_v20  ;;  %v3807_v12 = vsub.f32 %v3658_v27, %v3689_v34  ;;  %v82_v49 = vmax.f32 %v80_v18, %v81_v26  ;;  %v5637_v27 = vand.u32 4294901760, %v3811_v1 }
  0x73   :  { %v90_v33 = vrot.slane %v89_v19, 2  ;;  %v733_v57 = vsub.f32 %v3795_v58, %v5636_v28  ;;  %v96_v39 = vmax.f32 %v94_v43, %v95_v6  ;;  %v104_v52 = vrot.slane %v103_v53, 2 }
  0x74   :  { %v739_v14 = vsub.f32 %v3801_v20, %v5634_v54  ;;  %v5635_v21 = vand.u32 4294901760, %v3807_v12  ;;  %v83_v44 = vrot.slane %v82_v49, 2  ;;  %v751_v43 = vsub.f32 %v3811_v1, %v5637_v27 }
  0x75   :  { %v91_v34 = vmax.f32 %v89_v19, %v90_v33  ;;  %v734_v7 = vand.u32 4294901760, %v733_v57  ;;  %v97_v13 = vrot.slane %v96_v39, 2  ;;  %v105_v37 = vmax.f32 %v103_v53, %v104_v52 }
  0x76   :  { %v740_v60 = vand.u32 4294901760, %v739_v14  ;;  %v745_v18 = vsub.f32 %v3807_v12, %v5635_v21  ;;  %v84_v6 = vmax.f32 %v82_v49, %v83_v44  ;;  %v3829_v19 = vsub.f32 %v3678_v46, %v3712_v56 }
  0x77   :  { %v92_v26 = vrot.slane %v91_v34, 1  ;;  %735 = vmatprep.subr.mxu1 %v734_v7  ;;  %v98_v54 = vmax.f32 %v96_v39, %v97_v13  ;;  %v106_v33 = vrot.slane %v105_v37, 1  ;;  %v752_v57 = vand.u32 4294901760, %v751_v43 }
  0x78   :  { %741 = vmatpush2.msra.mxu1 %v740_v60  ;;  %v746_v53 = vand.u32 4294901760, %v745_v18  ;;  %v3833_v52 = vsub.f32 %v3703_v62, %v3731_v29  ;;  %v85_v21 = vrot.slane %v84_v6, 1  ;;  %v5641_v27 = vand.u32 4294901760, %v3829_v19 }
  0x79   :  { %v93_v14 = vmax.f32 %v91_v34, %v92_v26  ;;  %v99_v28 = vrot.slane %v98_v54, 1  ;;  %v107_v7 = vmax.f32 %v105_v37, %v106_v33  ;;  %v3839_v46 = vsub.f32 %v3714_v63, %v3744_v2 }
  0x7a   :  { %747 = vmatprep.subr.mxu1 %v746_v53  ;;  %v5640_v13 = vand.u32 4294901760, %v3833_v52  ;;  %v3843_v60 = vsub.f32 %v3737_v61, %v3760_v38  ;;  %v86_v49 = vmax.f32 %v84_v6, %v85_v21  ;;  %v757_v34 = vsub.f32 %v3829_v19, %v5641_v27  ;;  %v5995_v27 = vld [vmem:[#allocation33_spill] sm:$0xff] }
  0x7b   :  { %5975 = vst [vmem:[#allocation104_spill] sm:$0xff] %v3839_v46  ;;  %v100_v62 = vmax.f32 %v98_v54, %v99_v28  ;;  %753 = vmatpush2.msra.mxu1 %v752_v57  ;;  %v246_v37 = vsel %vm244_vm1, %v107_v7, %v93_v14  ;;  %v5639_v63 = vand.u32 4294901760, %v3839_v46 }
  0x7c   :  { %5976 = vst [vmem:[#allocation105_spill] sm:$0xff] %v3843_v60  ;;  %v763_v39 = vsub.f32 %v3833_v52, %v5640_v13  ;;  %v5638_v44 = vand.u32 4294901760, %v3843_v60  ;;  %v3854_v18 = vand.u32 4294901760, %v246_v37  ;;  %v758_v28 = vand.u32 4294901760, %v757_v34  ;;  %v5994_v13 = vld [vmem:[#allocation22_spill] sm:$0xff] }
  0x7d   :  { %v245_v61 = vsel %vm244_vm1, %v100_v62, %v86_v49  ;;  %v769_v43 = vsub.f32 %v3839_v46, %v5639_v63  ;;  %v5993_v63 = vld [vmem:[#allocation31_spill] sm:$0xff] }
  0x7e   :  { %5977 = vst [vmem:[#allocation106_spill] sm:$0xff] %v3854_v18  ;;  %v3857_v54 = vand.u32 4294901760, %v245_v61  ;;  %v764_v21 = vand.u32 4294901760, %v763_v39  ;;  %v775_v26 = vsub.f32 %v3843_v60, %v5638_v44  ;;  %v3866_v6 = vsub.f32 %v246_v37, %v3854_v18  ;;  %759 = vmatprep.subr.mxu1 %v758_v28  ;;  %779 = vmatprep.mubr.f32.mxu1 %v3854_v18  ;;  %v5979_v39 = vld [vmem:[#allocation17_spill] sm:$0xff]  ;;  %v5981_v28 = vld [vmem:[#allocation19_spill] sm:$0xff]  ;;  %v5992_v44 = vld [vmem:[#allocation20_spill] sm:$0xff] }
  0x7f   :  { %v770_v53 = vand.u32 4294901760, %v769_v43  ;;  %v5983_v43 = vld [vmem:[#allocation21_spill] sm:$0xff]  ;;  %v5998_v18 = vld [vmem:[#allocation26_spill] sm:$0xff] }
  0x80   :  { %5978 = vst [vmem:[#allocation107_spill] sm:$0xff] %v3857_v54  ;;  %v3870_v33 = vsub.f32 %v245_v61, %v3857_v54  ;;  %765 = vmatpush2.msra.mxu1 %v764_v21  ;;  %v776_v57 = vand.u32 4294901760, %v775_v26  ;;  %v379_v14 = vand.u32 4294901760, %v3866_v6  ;;  %v5980_v61 = vld [vmem:[#allocation12_spill] sm:$0xff]  ;;  %v5982_v21 = vld [vmem:[#allocation13_spill] sm:$0xff]  ;;  %v5984_v26 = vld [vmem:[#allocation14_spill] sm:$0xff] }
  0x81   :  { %771 = vmatprep.subr.mxu1 %v770_v53  ;;  %v5985_v53 = vld [vmem:[#allocation23_spill] sm:$0xff] }
  0x82   :  { %v5642_v7 = vand.u32 4294901760, %v3870_v33  ;;  %v380_v49 = vsub.f32 %v3866_v6, %v379_v14  ;;  %777 = vmatpush2.msra.mxu1 %v776_v57  ;;  %v5986_v57 = vld [vmem:[#allocation15_spill] sm:$0xff] }
  0x83   :  { %781 = vmatmul.mubr.f32.vlgmr.msra.gmra.mxu1 %v3857_v54  ;;  %991 = vmatprep.subr.mxu1 %v2982_v3  ;;  %v5997_v54 = vld [vmem:[#allocation35_spill] sm:$0xff] }
  0x84   :  { %v386_v62 = vsub.f32 %v3870_v33, %v5642_v7  ;;  %v381_v34 = vand.u32 4294901760, %v380_v49  ;;  %993 = vmatpush1.msra.mxu1 %v2984_v4  ;;  %1121 = vmatprep.mubr.f32.mxu1 %v379_v14  ;;  %v5987_v14 = vld [vmem:[#allocation25_spill] sm:$0xff]  ;;  %v5988_v49 = vld [vmem:[#allocation16_spill] sm:$0xff] }
  0x85   :  { %995 = vmatprep.subr.mxu1 %v2986_v5  ;;  %v5996_v7 = vld [vmem:[#allocation24_spill] sm:$0xff] }
  0x86   :  { %v387_v37 = vand.u32 4294901760, %v386_v62  ;;  %382 = vmatprep.mubr.f32.mxu0 %v381_v34  ;;  %997 = vmatpush1.msra.mxu1 %v2988_v9  ;;  %v5989_v62 = vld [vmem:[#allocation27_spill] sm:$0xff]  ;;  %v5990_v34 = vld [vmem:[#allocation18_spill] sm:$0xff] }
  0x87   :  { %999 = vmatprep.subr.mxu1 %v2990_v10 }
  0x88   :  { %388 = vmatmul.mubr.f32.vlgmr.msra.gmra.mxu0 %v387_v37  ;;  %1001 = vmatpush1.msra.mxu1 %v2992_v11  ;;  %v5991_v37 = vld [vmem:[#allocation29_spill] sm:$0xff] }
  0x89   :  { %792 = vmatpush1.msra.mxu0 %v3015_v23  ;;  %1003 = vmatprep.subr.mxu1 %v2995_v15 }
  0x8a   :  { %795 = vmatprep.subr.mxu0 %v3021_v25  ;;  %1005 = vmatpush1.msra.mxu1 %v2997_v16 }
  0x8b   :  { %798 = vmatpush1.msra.mxu0 %v3035_v31  ;;  %1007 = vmatprep.subr.mxu1 %v2999_v17 }
  0x8c   :  { %801 = vmatprep.subr.mxu0 %v3044_v35  ;;  %1009 = vmatpush1.msra.mxu1 %v3012_v22 }
  0x8d   :  { %804 = vmatpush1.msra.mxu0 %v3057_v40  ;;  %1011 = vmatprep.subr.mxu1 %v3018_v24 }
  0x8e   :  { %807 = vmatprep.subr.mxu0 %v3071_v45  ;;  %1013 = vmatpush1.msra.mxu1 %v3032_v30 }
  0x8f   :  { %810 = vmatpush1.msra.mxu0 %v3097_v59  ;;  %1015 = vmatprep.subr.mxu1 %v3038_v32 }
  0x90   :  { %813 = vmatprep.subr.mxu0 %v3109_v0  ;;  %1017 = vmatpush1.msra.mxu1 %v3047_v36 }
  0x91   :  { %816 = vmatpush1.msra.mxu0 %v3120_v8  ;;  %1019 = vmatprep.subr.mxu1 %v3060_v41 }
  0x92   :  { %819 = vmatprep.subr.mxu0 %v3131_v42  ;;  %1021 = vmatpush1.msra.mxu1 %v3081_v50 }
  0x93   :  { %822 = vmatpush1.msra.mxu0 %v3143_v48  ;;  %1023 = vmatprep.subr.mxu1 %v5980_v61 }
  0x94   :  { %825 = vmatprep.subr.mxu0 %v5979_v39  ;;  %1025 = vmatpush1.msra.mxu1 %v5982_v21 }
  0x95   :  { %828 = vmatpush1.msra.mxu0 %v5981_v28  ;;  %1027 = vmatprep.subr.mxu1 %v5984_v26 }
  0x96   :  { %831 = vmatprep.subr.mxu0 %v5983_v43  ;;  %1029 = vmatpush1.msra.mxu1 %v5986_v57  ;;  %v6000_v57 = vld [vmem:[#allocation28_spill] sm:$0xff] }
  0x97   :  { %834 = vmatpush1.msra.mxu0 %v5985_v53  ;;  %1031 = vmatprep.subr.mxu1 %v5988_v49  ;;  %v5999_v49 = vld [vmem:[#allocation37_spill] sm:$0xff] }
  0x98   :  { %837 = vmatprep.subr.mxu0 %v5987_v14  ;;  %1033 = vmatpush1.msra.mxu1 %v5990_v34  ;;  %v6001_v34 = vld [vmem:[#allocation39_spill] sm:$0xff] }
  0x99   :  { %840 = vmatpush1.msra.mxu0 %v5989_v62  ;;  %1035 = vmatprep.subr.mxu1 %v5992_v44  ;;  %v6003_v44 = vld [vmem:[#allocation41_spill] sm:$0xff] }
  0x9a   :  { %843 = vmatprep.subr.mxu0 %v5991_v37  ;;  %1037 = vmatpush1.msra.mxu1 %v5994_v13  ;;  %v6002_v37 = vld [vmem:[#allocation30_spill] sm:$0xff]  ;;  %v6005_v13 = vld [vmem:[#allocation43_spill] sm:$0xff] }
  0x9b   :  { %846 = vmatpush1.msra.mxu0 %v5993_v63  ;;  %1039 = vmatprep.subr.mxu1 %v5996_v7  ;;  %v6004_v63 = vld [vmem:[#allocation32_spill] sm:$0xff]  ;;  %v6007_v7 = vld [vmem:[#allocation45_spill] sm:$0xff] }
  0x9c   :  { %849 = vmatprep.subr.mxu0 %v5995_v27  ;;  %1041 = vmatpush1.msra.mxu1 %v5998_v18  ;;  %v6006_v27 = vld [vmem:[#allocation34_spill] sm:$0xff]  ;;  %v6009_v18 = vld [vmem:[#allocation47_spill] sm:$0xff] }
  0x9d   :  { %852 = vmatpush1.msra.mxu0 %v5997_v54  ;;  %1043 = vmatprep.subr.mxu1 %v6000_v57  ;;  %v6008_v54 = vld [vmem:[#allocation36_spill] sm:$0xff]  ;;  %v6011_v57 = vld [vmem:[#allocation49_spill] sm:$0xff] }
  0x9e   :  { %855 = vmatprep.subr.mxu0 %v5999_v49  ;;  %1045 = vmatpush1.msra.mxu1 %v6002_v37  ;;  %v6010_v49 = vld [vmem:[#allocation38_spill] sm:$0xff]  ;;  %v6013_v37 = vld [vmem:[#allocation51_spill] sm:$0xff] }
  0x9f   :  { %858 = vmatpush1.msra.mxu0 %v6001_v34  ;;  %1047 = vmatprep.subr.mxu1 %v6004_v63  ;;  %v6012_v34 = vld [vmem:[#allocation40_spill] sm:$0xff]  ;;  %v6015_v63 = vld [vmem:[#allocation53_spill] sm:$0xff] }
  0xa0   :  { %861 = vmatprep.subr.mxu0 %v6003_v44  ;;  %1049 = vmatpush1.msra.mxu1 %v6006_v27  ;;  %v6014_v44 = vld [vmem:[#allocation42_spill] sm:$0xff]  ;;  %v6017_v27 = vld [vmem:[#allocation55_spill] sm:$0xff] }
  0xa1   :  { %864 = vmatpush1.msra.mxu0 %v6005_v13  ;;  %1051 = vmatprep.subr.mxu1 %v6008_v54  ;;  %v6016_v13 = vld [vmem:[#allocation44_spill] sm:$0xff]  ;;  %v6019_v54 = vld [vmem:[#allocation57_spill] sm:$0xff] }
  0xa2   :  { %867 = vmatprep.subr.mxu0 %v6007_v7  ;;  %1053 = vmatpush1.msra.mxu1 %v6010_v49  ;;  %v6018_v7 = vld [vmem:[#allocation46_spill] sm:$0xff]  ;;  %v6021_v49 = vld [vmem:[#allocation59_spill] sm:$0xff] }
  0xa3   :  { %870 = vmatpush1.msra.mxu0 %v6009_v18  ;;  %1055 = vmatprep.subr.mxu1 %v6012_v34  ;;  %v6020_v18 = vld [vmem:[#allocation48_spill] sm:$0xff]  ;;  %v6023_v34 = vld [vmem:[#allocation61_spill] sm:$0xff] }
  0xa4   :  { %873 = vmatprep.subr.mxu0 %v6011_v57  ;;  %1057 = vmatpush2.msra.mxu1 %v6014_v44  ;;  %v6022_v57 = vld [vmem:[#allocation50_spill] sm:$0xff]  ;;  %v6025_v44 = vld [vmem:[#allocation63_spill] sm:$0xff] }
  0xa5   :  { %876 = vmatpush1.msra.mxu0 %v6013_v37  ;;  %1059 = vmatprep.subr.mxu1 %v6016_v13  ;;  %v6024_v37 = vld [vmem:[#allocation52_spill] sm:$0xff]  ;;  %v6027_v13 = vld [vmem:[#allocation65_spill] sm:$0xff] }
  0xa6   :  { %879 = vmatprep.subr.mxu0 %v6015_v63  ;;  %1061 = vmatpush2.msra.mxu1 %v6018_v7  ;;  %v6026_v63 = vld [vmem:[#allocation54_spill] sm:$0xff]  ;;  %v6029_v7 = vld [vmem:[#allocation67_spill] sm:$0xff] }
  0xa7   :  { %882 = vmatpush1.msra.mxu0 %v6017_v27  ;;  %1063 = vmatprep.subr.mxu1 %v6020_v18  ;;  %v6028_v27 = vld [vmem:[#allocation56_spill] sm:$0xff]  ;;  %v6031_v18 = vld [vmem:[#allocation69_spill] sm:$0xff] }
  0xa8   :  { %885 = vmatprep.subr.mxu0 %v6019_v54  ;;  %1065 = vmatpush2.msra.mxu1 %v6022_v57  ;;  %v6030_v54 = vld [vmem:[#allocation58_spill] sm:$0xff]  ;;  %v6033_v57 = vld [vmem:[#allocation71_spill] sm:$0xff] }
  0xa9   :  { %888 = vmatpush2.msra.mxu0 %v6021_v49  ;;  %1067 = vmatprep.subr.mxu1 %v6024_v37  ;;  %v6032_v49 = vld [vmem:[#allocation60_spill] sm:$0xff]  ;;  %v6035_v37 = vld [vmem:[#allocation73_spill] sm:$0xff] }
  0xaa   :  { %891 = vmatprep.subr.mxu0 %v6023_v34  ;;  %1069 = vmatpush2.msra.mxu1 %v6026_v63  ;;  %v6034_v34 = vld [vmem:[#allocation62_spill] sm:$0xff]  ;;  %v6037_v63 = vld [vmem:[#allocation75_spill] sm:$0xff] }
  0xab   :  { %894 = vmatpush2.msra.mxu0 %v6025_v44  ;;  %1071 = vmatprep.subr.mxu1 %v6028_v27  ;;  %v6036_v44 = vld [vmem:[#allocation64_spill] sm:$0xff]  ;;  %v6039_v27 = vld [vmem:[#allocation77_spill] sm:$0xff] }
  0xac   :  { %897 = vmatprep.subr.mxu0 %v6027_v13  ;;  %1073 = vmatpush2.msra.mxu1 %v6030_v54  ;;  %v6038_v13 = vld [vmem:[#allocation66_spill] sm:$0xff]  ;;  %v6041_v54 = vld [vmem:[#allocation79_spill] sm:$0xff] }
  0xad   :  { %900 = vmatpush2.msra.mxu0 %v6029_v7  ;;  %1075 = vmatprep.subr.mxu1 %v6032_v49  ;;  %v6040_v7 = vld [vmem:[#allocation68_spill] sm:$0xff]  ;;  %v6043_v49 = vld [vmem:[#allocation81_spill] sm:$0xff] }
  0xae   :  { %903 = vmatprep.subr.mxu0 %v6031_v18  ;;  %1077 = vmatpush2.msra.mxu1 %v6034_v34  ;;  %v6042_v18 = vld [vmem:[#allocation70_spill] sm:$0xff]  ;;  %v6045_v34 = vld [vmem:[#allocation83_spill] sm:$0xff] }
  0xaf   :  { %906 = vmatpush2.msra.mxu0 %v6033_v57  ;;  %1079 = vmatprep.subr.mxu1 %v6036_v44  ;;  %v6044_v57 = vld [vmem:[#allocation72_spill] sm:$0xff]  ;;  %v6047_v44 = vld [vmem:[#allocation85_spill] sm:$0xff] }
  0xb0   :  { %909 = vmatprep.subr.mxu0 %v6035_v37  ;;  %1081 = vmatpush2.msra.mxu1 %v6038_v13  ;;  %v6046_v37 = vld [vmem:[#allocation74_spill] sm:$0xff] }
  0xb1   :  { %912 = vmatpush2.msra.mxu0 %v6037_v63  ;;  %1083 = vmatprep.subr.mxu1 %v6040_v7  ;;  %v6048_v63 = vld [vmem:[#allocation76_spill] sm:$0xff]  ;;  %v6049_v13 = vld [vmem:[#allocation86_spill] sm:$0xff]  ;;  %v6051_v7 = vld [vmem:[#allocation87_spill] sm:$0xff] }
  0xb2   :  { %915 = vmatprep.subr.mxu0 %v6039_v27  ;;  %1085 = vmatpush2.msra.mxu1 %v6042_v18  ;;  %v6050_v27 = vld [vmem:[#allocation78_spill] sm:$0xff]  ;;  %v6053_v18 = vld [vmem:[#allocation89_spill] sm:$0xff] }
  0xb3   :  { %918 = vmatpush2.msra.mxu0 %v6041_v54  ;;  %1087 = vmatprep.subr.mxu1 %v6044_v57  ;;  %v6052_v54 = vld [vmem:[#allocation80_spill] sm:$0xff]  ;;  %v6055_v57 = vld [vmem:[#allocation91_spill] sm:$0xff] }
  0xb4   :  { %921 = vmatprep.subr.mxu0 %v6043_v49  ;;  %1089 = vmatpush2.msra.mxu1 %v6046_v37  ;;  %v6054_v49 = vld [vmem:[#allocation82_spill] sm:$0xff]  ;;  %v6057_v37 = vld [vmem:[#allocation93_spill] sm:$0xff] }
  0xb5   :  { %924 = vmatpush2.msra.mxu0 %v6045_v34  ;;  %1091 = vmatprep.subr.mxu1 %v6048_v63  ;;  %v6056_v34 = vld [vmem:[#allocation84_spill] sm:$0xff]  ;;  %v6058_v63 = vld [vmem:[#allocation94_spill] sm:$0xff] }
  0xb6   :  { %927 = vmatprep.subr.mxu0 %v6047_v44  ;;  %1093 = vmatpush2.msra.mxu1 %v6050_v27  ;;  %v6060_v27 = vld [vmem:[#allocation88_spill] sm:$0xff] }
  0xb7   :  { %930 = vmatpush2.msra.mxu0 %v6049_v13  ;;  %1095 = vmatprep.subr.mxu1 %v6052_v54  ;;  %v6059_v54 = vld [vmem:[#allocation97_spill] sm:$0xff] }
  0xb8   :  { %933 = vmatprep.subr.mxu0 %v6051_v7  ;;  %1097 = vmatpush2.msra.mxu1 %v6054_v49  ;;  %v6061_v49 = vld [vmem:[#allocation99_spill] sm:$0xff] }
  0xb9   :  { %936 = vmatpush2.msra.mxu0 %v6053_v18  ;;  %1099 = vmatprep.subr.mxu1 %v6056_v34  ;;  %v6063_v34 = vld [vmem:[#allocation92_spill] sm:$0xff] }
  0xba   :  { %939 = vmatprep.subr.mxu0 %v6055_v57  ;;  %981 = vmatprep.mubr.f32.mxu0 %v3866_v6  ;;  %v6062_v57 = vld [vmem:[#allocation90_spill] sm:$0xff]  ;;  %v6064_v6 = vand.u32 4294901760, %v3870_v33 }
  0xbb   :  { %942 = vmatpush2.msra.mxu0 %v6057_v37  ;;  %1101 = vmatpush2.msra.mxu1 %v3652_v51 }
  0xbc   :  { %945 = vmatprep.subr.mxu0 %v6058_v63  ;;  %1103 = vmatprep.subr.mxu1 %v3665_v47 }
  0xbd   :  { %948 = vmatpush2.msra.mxu0 %v3735_v55  ;;  %1105 = vmatpush2.msra.mxu1 %v6060_v27 }
  0xbe   :  { %951 = vmatprep.subr.mxu0 %v6059_v54  ;;  %1107 = vmatprep.subr.mxu1 %v6062_v57 }
  0xbf   :  { %954 = vmatpush2.msra.mxu0 %v6061_v49  ;;  %1109 = vmatpush2.msra.mxu1 %v6063_v34 }
  0xc0   :  { %957 = vmatprep.subr.mxu0 %v3795_v58  ;;  %1111 = vmatprep.subr.mxu1 %v3712_v56 }
  0xc1   :  { %960 = vmatpush2.msra.mxu0 %v3801_v20  ;;  %1113 = vmatpush2.msra.mxu1 %v3731_v29 }
  0xc2   :  { %963 = vmatprep.subr.mxu0 %v3807_v12  ;;  %1115 = vmatprep.subr.mxu1 %v3744_v2  ;;  %v6065_v2 = vld [vmem:[#allocation11_spill] sm:$0xff] }
  0xc3   :  { %966 = vmatpush2.msra.mxu0 %v3811_v1  ;;  %1117 = vmatpush2.msra.mxu1 %v3760_v38  ;;  %v6066_v29 = vand.u32 4294901760, %v6065_v2  ;;  %v6067_v38 = vand.u32 4294901760, %v3015_v23 }
  0xc4   :  { %969 = vmatprep.subr.mxu0 %v3829_v19  ;;  %1125 = vmatmul.mubr.f32.vlgmr.msra.gmra.mxu1 %v6064_v6  ;;  %v6068_v6 = vand.u32 4294901760, %v3021_v25  ;;  %v6074_v25 = vand.u32 4294901760, %v3057_v40  ;;  %v6079_v40 = vand.u32 4294901760, %v3120_v8 }
  0xc5   :  { %972 = vmatpush2.msra.mxu0 %v3833_v52  ;;  %1397 = vmatprep.subr.mxu1 %v2982_v3  ;;  %v6069_v3 = vld [vmem:[#allocation101_spill] sm:$0xff] }
  0xc6   :  { %975 = vmatprep.subr.mxu0 %v3839_v46  ;;  %1399 = vmatpush1.msra.mxu1 %v2984_v4  ;;  %v60_v46 = vrot.slane %v6069_v3, 4  ;;  %v6071_v4 = vld [vmem:[#allocation103_spill] sm:$0xff] }
  0xc7   :  { %978 = vmatpush2.msra.mxu0 %v3843_v60  ;;  %1401 = vmatprep.subr.mxu1 %v2986_v5  ;;  %v6070_v60 = vand.u32 4294901760, %v3035_v31  ;;  %v74_v2 = vrot.slane %v6071_v4, 4  ;;  %v6073_v5 = vld [vmem:[#allocation100_spill] sm:$0xff]  ;;  %v6076_v31 = vand.u32 4294901760, %v3071_v45 }
  0xc8   :  { %984 = vmatmul.mubr.f32.vlgmr.msra.gmra.mxu0 %v3870_v33  ;;  %1134 = vmatprep.subr.mxu0 %v6066_v29  ;;  %v6072_v29 = vand.u32 4294901760, %v3044_v35  ;;  %v53_v23 = vrot.slane %v6073_v5, 4  ;;  %v6078_v35 = vand.u32 4294901760, %v3109_v0  ;;  %v6083_v33 = vand.u32 4294901760, %v5981_v28 }
  0xc9   :  { %1138 = vmatpush1.msra.mxu0 %v6067_v38  ;;  %1403 = vmatpush1.msra.mxu1 %v2988_v9  ;;  %v6075_v9 = vld [vmem:[#allocation102_spill] sm:$0xff]  ;;  %v6086_v28 = vand.u32 4294901760, %v5987_v14  ;;  %v6091_v14 = vld [vmem:[#allocation31_spill] sm:$0xff] }
  0xca   :  { %1142 = vmatprep.subr.mxu0 %v6068_v6  ;;  %1405 = vmatprep.subr.mxu1 %v2990_v10  ;;  %v67_v38 = vrot.slane %v6075_v9, 4  ;;  %v6077_v10 = vand.u32 4294901760, %v3097_v59  ;;  %v54_v45 = vadd.f32 %v53_v23, %v6073_v5  ;;  %v6080_v59 = vand.u32 4294901760, %v3131_v42 }
  0xcb   :  { %1146 = vmatpush1.msra.mxu0 %v6070_v60  ;;  %1407 = vmatpush1.msra.mxu1 %v2992_v11  ;;  %v61_v11 = vadd.f32 %v60_v46, %v6069_v3 }
  0xcc   :  { %1150 = vmatprep.subr.mxu0 %v6072_v29  ;;  %1409 = vmatprep.subr.mxu1 %v2995_v15  ;;  %v75_v15 = vadd.f32 %v74_v2, %v6071_v4  ;;  %v68_v0 = vadd.f32 %v67_v38, %v6075_v9  ;;  %v55_v46 = vrot.slane %v54_v45, 2  ;;  %v6092_v9 = vand.u32 4294901760, %v6091_v14  ;;  %v6130_v14 = vld [vmem:[#allocation40_spill] sm:$0xff] }
  0xcd   :  { %1154 = vmatpush1.msra.mxu0 %v6074_v25  ;;  %1411 = vmatpush1.msra.mxu1 %v2997_v16  ;;  %v62_v16 = vrot.slane %v61_v11, 2 }
  0xce   :  { %1158 = vmatprep.subr.mxu0 %v6076_v31  ;;  %1413 = vmatprep.subr.mxu1 %v2999_v17  ;;  %v76_v17 = vrot.slane %v75_v15, 2  ;;  %v69_v42 = vrot.slane %v68_v0, 2  ;;  %v56_v6 = vadd.f32 %v55_v46, %v54_v45  ;;  %v6094_v31 = vld [vmem:[#allocation33_spill] sm:$0xff] }
  0xcf   :  { %1162 = vmatpush1.msra.mxu0 %v6077_v10  ;;  %1415 = vmatpush1.msra.mxu1 %v3012_v22  ;;  %v6081_v22 = vand.u32 4294901760, %v3143_v48  ;;  %v63_v8 = vadd.f32 %v62_v16, %v61_v11  ;;  %v6084_v48 = vand.u32 4294901760, %v5983_v43  ;;  %v6087_v43 = vand.u32 4294901760, %v5989_v62  ;;  %v6096_v10 = vld [vmem:[#allocation18_spill] sm:$0xff]  ;;  %v6100_v16 = vld [vmem:[#allocation37_spill] sm:$0xff] }
  0xd0   :  { %1166 = vmatprep.subr.mxu0 %v6078_v35  ;;  %1417 = vmatprep.subr.mxu1 %v3018_v24  ;;  %v6082_v24 = vand.u32 4294901760, %v5979_v39  ;;  %v77_v60 = vadd.f32 %v76_v17, %v75_v15  ;;  %v70_v3 = vadd.f32 %v69_v42, %v68_v0  ;;  %v6085_v39 = vand.u32 4294901760, %v5985_v53  ;;  %v6088_v53 = vld [vmem:[#allocation29_spill] sm:$0xff]  ;;  %v6097_v35 = vld [vmem:[#allocation35_spill] sm:$0xff] }
  0xd1   :  { %1170 = vmatpush1.msra.mxu0 %v6079_v40  ;;  %1419 = vmatpush1.msra.mxu1 %v3032_v30  ;;  %v64_v30 = vrot.slane %v63_v8, 1  ;;  %v57_v4 = vrot.slane %v56_v6, 1  ;;  %v6089_v5 = vand.u32 4294901760, %v6088_v53  ;;  %v6095_v62 = vand.u32 4294901760, %v6094_v31  ;;  %v6099_v40 = vld [vmem:[#allocation20_spill] sm:$0xff]  ;;  %v6104_v0 = vld [vmem:[#allocation39_spill] sm:$0xff] }
  0xd2   :  { %1174 = vmatprep.subr.mxu0 %v6080_v59  ;;  %1421 = vmatprep.subr.mxu1 %v3038_v32  ;;  %v78_v32 = vrot.slane %v77_v60, 1  ;;  %v71_v2 = vrot.slane %v70_v3, 1  ;;  %v6098_v15 = vand.u32 4294901760, %v6097_v35  ;;  %v6101_v45 = vand.u32 4294901760, %v6100_v16  ;;  %v6102_v59 = vld [vmem:[#allocation22_spill] sm:$0xff]  ;;  %v6107_v46 = vld [vmem:[#allocation41_spill] sm:$0xff] }
  0xd3   :  { %1178 = vmatpush1.msra.mxu0 %v6081_v22  ;;  %1423 = vmatpush1.msra.mxu1 %v3047_v36  ;;  %v65_v36 = vadd.f32 %v64_v30, %v63_v8  ;;  %v58_v29 = vadd.f32 %v57_v4, %v56_v6  ;;  %v6105_v22 = vand.u32 4294901760, %v6104_v0  ;;  %v6106_v8 = vld [vmem:[#allocation24_spill] sm:$0xff]  ;;  %v6110_v42 = vld [vmem:[#allocation43_spill] sm:$0xff]  ;;  %v6113_v6 = vld [vmem:[#allocation45_spill] sm:$0xff] }
  0xd4   :  { %1182 = vmatprep.subr.mxu0 %v6082_v24  ;;  %1425 = vmatprep.subr.mxu1 %v3060_v41  ;;  %v79_v41 = vadd.f32 %v78_v32, %v77_v60  ;;  %v72_v25 = vadd.f32 %v71_v2, %v70_v3  ;;  %v6108_v24 = vand.u32 4294901760, %v6107_v46  ;;  %v6109_v60 = vld [vmem:[#allocation26_spill] sm:$0xff]  ;;  %v6112_v30 = vld [vmem:[#allocation28_spill] sm:$0xff]  ;;  %v6116_v3 = vld [vmem:[#allocation47_spill] sm:$0xff] }
  0xd5   :  { %1186 = vmatpush1.msra.mxu0 %v6083_v33  ;;  %1427 = vmatpush1.msra.mxu1 %v3081_v50  ;;  %v109_v50 = vmul.f32 0.25, %v65_v36  ;;  %v108_v38 = vmul.f32 0.25, %v58_v29  ;;  %v6111_v33 = vand.u32 4294901760, %v6110_v42  ;;  %v6115_v32 = vld [vmem:[#allocation30_spill] sm:$0xff]  ;;  %v6118_v36 = vld [vmem:[#allocation32_spill] sm:$0xff]  ;;  %v6119_v4 = vld [vmem:[#allocation49_spill] sm:$0xff] }
  0xd6   :  { %1190 = vmatprep.subr.mxu0 %v6084_v48  ;;  %1429 = vmatprep.subr.mxu1 %v5980_v61  ;;  %v6090_v61 = vld [vmem:[#allocation15_spill] sm:$0xff]  ;;  %v111_v23 = vmul.f32 0.25, %v79_v41  ;;  %v110_v11 = vmul.f32 0.25, %v72_v25  ;;  %v6114_v48 = vand.u32 4294901760, %v6113_v6  ;;  %v6121_v41 = vld [vmem:[#allocation34_spill] sm:$0xff]  ;;  %v6125_v29 = vld [vmem:[#allocation53_spill] sm:$0xff] }
  0xd7   :  { %1194 = vmatpush1.msra.mxu0 %v6085_v39  ;;  %1431 = vmatpush1.msra.mxu1 %v5982_v21  ;;  %v6093_v21 = vld [vmem:[#allocation16_spill] sm:$0xff]  ;;  %v6117_v39 = vand.u32 4294901760, %v6116_v3  ;;  %v6122_v2 = vld [vmem:[#allocation51_spill] sm:$0xff]  ;;  %v6126_v53 = vand.u32 4294901760, %v6125_v29  ;;  %v6133_v31 = vld [vmem:[#allocation42_spill] sm:$0xff] }
  0xd8   :  { %1198 = vmatprep.subr.mxu0 %v6086_v28  ;;  %1433 = vmatprep.subr.mxu1 %v5984_v26  ;;  %v4083_v26 = vsel %vm244_vm1, %v111_v23, %v109_v50  ;;  %v4092_v17 = vsel %vm244_vm1, %v110_v11, %v108_v38  ;;  %v6120_v28 = vand.u32 4294901760, %v6119_v4  ;;  %v6124_v50 = vld [vmem:[#allocation36_spill] sm:$0xff]  ;;  %v6128_v23 = vld [vmem:[#allocation55_spill] sm:$0xff]  ;;  %v6138_v16 = vld [vmem:[#allocation61_spill] sm:$0xff] }
  0xd9   :  { %1202 = vmatpush1.msra.mxu0 %v6087_v43  ;;  %1435 = vmatpush1.msra.mxu1 %v6090_v61  ;;  %6103 = vst [vmem:[#allocation17_spill] sm:$0xff] %v4092_v17  ;;  %v6123_v43 = vand.u32 4294901760, %v6122_v2  ;;  %v143_v61 = vld [vmem:[#allocation2 + $0xf8] sm:$0xff]  ;;  %v6129_v25 = vand.u32 4294901760, %v6128_v23  ;;  %v138_v42 = vld [vmem:[#allocation2 + $0xd0] sm:$0xff]  ;;  %v6154_v4 = vld [vmem:[#allocation69_spill] sm:$0xff] }
  0xda   :  { %1206 = vmatprep.subr.mxu0 %v6089_v5  ;;  %1437 = vmatprep.subr.mxu1 %v6093_v21  ;;  %v6127_v5 = vld [vmem:[#allocation38_spill] sm:$0xff]  ;;  %v6131_v21 = vld [vmem:[#allocation57_spill] sm:$0xff]  ;;  %v6136_v35 = vld [vmem:[#allocation44_spill] sm:$0xff] }
  0xdb   :  { %1210 = vmatpush1.msra.mxu0 %v6092_v9  ;;  %1439 = vmatpush1.msra.mxu1 %v6096_v10  ;;  %v142_v9 = vld [vmem:[#allocation2 + $0xf0] sm:$0xff]  ;;  %v6132_v38 = vand.u32 4294901760, %v6131_v21  ;;  %v6144_v46 = vld [vmem:[#allocation48_spill] sm:$0xff]  ;;  %v137_v29 = vld [vmem:[#allocation2 + $0xc8] sm:$0xff] }
  0xdc   :  { %1214 = vmatprep.subr.mxu0 %v6095_v62  ;;  %1441 = vmatprep.subr.mxu1 %v6099_v40  ;;  %v141_v62 = vld [vmem:[#allocation2 + $0xe8] sm:$0xff]  ;;  %v6134_v10 = vld [vmem:[#allocation59_spill] sm:$0xff]  ;;  %v140_v40 = vld [vmem:[#allocation2 + $0xe0] sm:$0xff]  ;;  %v4132_v0 = vand.u32 4294901760, %v142_v9 }
  0xdd   :  { %1218 = vmatpush1.msra.mxu0 %v6098_v15  ;;  %1443 = vmatpush1.msra.mxu1 %v6102_v59  ;;  %v6135_v11 = vand.u32 4294901760, %v6134_v10  ;;  %v4127_v15 = vand.u32 4294901760, %v143_v61  ;;  %v6140_v59 = vld [vmem:[#allocation46_spill] sm:$0xff]  ;;  %v6168_v10 = vld [vmem:[#allocation75_spill] sm:$0xff] }
  0xde   :  { %1222 = vmatprep.subr.mxu0 %v6101_v45  ;;  %1445 = vmatprep.subr.mxu1 %v6106_v8  ;;  %v6139_v45 = vand.u32 4294901760, %v6138_v16  ;;  %6141 = vst [vmem:[#allocation19_spill] sm:$0xff] %v4132_v0  ;;  %v6148_v6 = vld [vmem:[#allocation50_spill] sm:$0xff]  ;;  %v4154_v2 = vsub.f32 %v142_v9, %v4132_v0  ;;  %v4175_v16 = vand.u32 4294901760, %v137_v29  ;;  %v6266_v17 = vld [vmem:[#allocation107_spill] sm:$0xff] }
  0xdf   :  { %1226 = vmatpush1.msra.mxu0 %v6105_v22  ;;  %1447 = vmatpush1.msra.mxu1 %v6109_v60  ;;  %6137 = vst [vmem:[#allocation12_spill] sm:$0xff] %v4127_v15  ;;  %v6142_v22 = vld [vmem:[#allocation63_spill] sm:$0xff] }
  0xe0   :  { %1230 = vmatprep.subr.mxu0 %v6108_v24  ;;  %1449 = vmatprep.subr.mxu1 %v6112_v30  ;;  %v6143_v8 = vand.u32 4294901760, %v6142_v22  ;;  %v4137_v24 = vand.u32 4294901760, %v141_v62  ;;  %v139_v60 = vld [vmem:[#allocation2 + $0xd8] sm:$0xff]  ;;  %6157 = vst [vmem:[#allocation23_spill] sm:$0xff] %v4154_v2  ;;  %6171 = vst [vmem:[#allocation87_spill] sm:$0xff] %v4175_v16  ;;  %v6173_v22 = vld [vmem:[#allocation77_spill] sm:$0xff] }
  0xe1   :  { %1234 = vmatpush1.msra.mxu0 %v6111_v33  ;;  %1451 = vmatpush1.msra.mxu1 %v6115_v32  ;;  %v6146_v33 = vld [vmem:[#allocation65_spill] sm:$0xff]  ;;  %v6150_v32 = vld [vmem:[#allocation67_spill] sm:$0xff] }
  0xe2   :  { %1238 = vmatprep.subr.mxu0 %v6114_v48  ;;  %1453 = vmatprep.subr.mxu1 %v6118_v36  ;;  %6145 = vst [vmem:[#allocation13_spill] sm:$0xff] %v4137_v24  ;;  %v6147_v30 = vand.u32 4294901760, %v6146_v33  ;;  %v4142_v48 = vand.u32 4294901760, %v140_v40  ;;  %v6151_v3 = vand.u32 4294901760, %v6150_v32  ;;  %v4148_v36 = vsub.f32 %v143_v61, %v4127_v15  ;;  %v6178_v32 = vld [vmem:[#allocation79_spill] sm:$0xff] }
  0xe3   :  { %1242 = vmatpush1.msra.mxu0 %v6117_v39  ;;  %1455 = vmatpush1.msra.mxu1 %v6121_v41  ;;  %v6152_v39 = vld [vmem:[#allocation52_spill] sm:$0xff]  ;;  %v6156_v41 = vld [vmem:[#allocation54_spill] sm:$0xff]  ;;  %v4164_v61 = vsub.f32 %v141_v62, %v4137_v24  ;;  %v5654_v33 = vand.u32 4294901760, %v4154_v2 }
  0xe4   :  { %1246 = vmatprep.subr.mxu0 %v6120_v28  ;;  %1457 = vmatprep.subr.mxu1 %v6124_v50  ;;  %6149 = vst [vmem:[#allocation21_spill] sm:$0xff] %v4142_v48  ;;  %6153 = vst [vmem:[#allocation14_spill] sm:$0xff] %v4148_v36  ;;  %v6155_v28 = vand.u32 4294901760, %v6154_v4  ;;  %v4158_v50 = vand.u32 4294901760, %v138_v42  ;;  %v4170_v9 = vsub.f32 %v140_v40, %v4142_v48  ;;  %v135_v62 = vld [vmem:[#allocation2 + $0xb8] sm:$0xff] }
  0xe5   :  { %1250 = vmatpush1.msra.mxu0 %v6123_v43  ;;  %1459 = vmatpush1.msra.mxu1 %v6127_v5  ;;  %v4156_v43 = vand.u32 4294901760, %v139_v60  ;;  %v6160_v5 = vld [vmem:[#allocation71_spill] sm:$0xff]  ;;  %6163 = vst [vmem:[#allocation85_spill] sm:$0xff] %v4164_v61 }
  0xe6   :  { %1254 = vmatprep.subr.mxu0 %v6126_v53  ;;  %1461 = vmatprep.subr.mxu1 %v6130_v14  ;;  %6159 = vst [vmem:[#allocation27_spill] sm:$0xff] %v4158_v50  ;;  %v136_v53 = vld [vmem:[#allocation2 + $0xc0] sm:$0xff]  ;;  %v6161_v23 = vand.u32 4294901760, %v6160_v5  ;;  %6167 = vst [vmem:[#allocation86_spill] sm:$0xff] %v4170_v9  ;;  %v4184_v40 = vsub.f32 %v138_v42, %v4158_v50  ;;  %v6184_v42 = vld [vmem:[#allocation66_spill] sm:$0xff] }
  0xe7   :  { %1258 = vmatpush1.msra.mxu0 %v6129_v25  ;;  %1463 = vmatpush2.msra.mxu1 %v6133_v31  ;;  %6158 = vst [vmem:[#allocation25_spill] sm:$0xff] %v4156_v43  ;;  %v6162_v25 = vld [vmem:[#allocation56_spill] sm:$0xff]  ;;  %v6164_v14 = vld [vmem:[#allocation73_spill] sm:$0xff]  ;;  %v134_v31 = vld [vmem:[#allocation2 + $0xb0] sm:$0xff] }
  0xe8   :  { %1262 = vmatprep.subr.mxu0 %v6132_v38  ;;  %1465 = vmatprep.subr.mxu1 %v6136_v35  ;;  %v6165_v21 = vand.u32 4294901760, %v6164_v14  ;;  %v6166_v38 = vld [vmem:[#allocation58_spill] sm:$0xff]  ;;  %v6170_v35 = vld [vmem:[#allocation60_spill] sm:$0xff]  ;;  %6176 = vst [vmem:[#allocation93_spill] sm:$0xff] %v4184_v40  ;;  %v4193_v4 = vand.u32 4294901760, %v134_v31  ;;  %v6182_v5 = vld [vmem:[#allocation81_spill] sm:$0xff] }
  0xe9   :  { %1266 = vmatpush2.msra.mxu0 %v6135_v11  ;;  %1467 = vmatpush2.msra.mxu1 %v6140_v59  ;;  %v6169_v11 = vand.u32 4294901760, %v6168_v10  ;;  %v5655_v59 = vand.u32 4294901760, %v4148_v36  ;;  %v6186_v14 = vld [vmem:[#allocation83_spill] sm:$0xff] }
  0xea   :  { %1270 = vmatprep.subr.mxu0 %v6139_v45  ;;  %1469 = vmatprep.subr.mxu1 %v6144_v46  ;;  %v4177_v45 = vand.u32 4294901760, %v136_v53  ;;  %v6175_v46 = vld [vmem:[#allocation62_spill] sm:$0xff]  ;;  %6181 = vst [vmem:[#allocation97_spill] sm:$0xff] %v4193_v4 }
  0xeb   :  { %1274 = vmatpush2.msra.mxu0 %v6143_v8  ;;  %1471 = vmatpush2.msra.mxu1 %v6148_v6  ;;  %v6174_v8 = vand.u32 4294901760, %v6173_v22  ;;  %v4188_v6 = vsub.f32 %v139_v60, %v4156_v43  ;;  %v5653_v60 = vand.u32 4294901760, %v4170_v9  ;;  %v131_v22 = vld [vmem:[#allocation2 + $0x98] sm:$0xff] }
  0xec   :  { %1278 = vmatprep.subr.mxu0 %v6147_v30  ;;  %1473 = vmatprep.subr.mxu1 %v6152_v39  ;;  %6172 = vst [vmem:[#allocation89_spill] sm:$0xff] %v4177_v45  ;;  %v133_v30 = vld [vmem:[#allocation2 + $0xa8] sm:$0xff]  ;;  %v6180_v39 = vld [vmem:[#allocation64_spill] sm:$0xff]  ;;  %v4206_v10 = vsub.f32 %v136_v53, %v4177_v45  ;;  %v4224_v53 = vsub.f32 %v4154_v2, %v5654_v33 }
  0xed   :  { %1282 = vmatpush2.msra.mxu0 %v6151_v3  ;;  %1475 = vmatpush2.msra.mxu1 %v6156_v41  ;;  %6177 = vst [vmem:[#allocation94_spill] sm:$0xff] %v4188_v6  ;;  %v6179_v3 = vand.u32 4294901760, %v6178_v32  ;;  %v132_v41 = vld [vmem:[#allocation2 + $0xa0] sm:$0xff]  ;;  %v6192_v32 = vand.u32 4294901760, %v6047_v44  ;;  %v4234_v44 = vsub.f32 %v134_v31, %v4193_v4  ;;  %v129_v31 = vld [vmem:[#allocation2 + $0x88] sm:$0xff] }
  0xee   :  { %1286 = vmatprep.subr.mxu0 %v6155_v28  ;;  %1477 = vmatprep.subr.mxu1 %v6162_v25  ;;  %v5652_v28 = vand.u32 4294901760, %v4164_v61  ;;  %v4199_v25 = vand.u32 4294901760, %v135_v62  ;;  %6189 = vst [vmem:[#allocation99_spill] sm:$0xff] %v4206_v10 }
  0xef   :  { %1290 = vmatpush2.msra.mxu0 %v6161_v23  ;;  %1479 = vmatpush2.msra.mxu1 %v6166_v38  ;;  %v6183_v23 = vand.u32 4294901760, %v6182_v5  ;;  %v6188_v38 = vld [vmem:[#allocation68_spill] sm:$0xff]  ;;  %6197 = vst [vmem:[#allocation101_spill] sm:$0xff] %v4234_v44  ;;  %v6208_v5 = vld [vmem:[#allocation78_spill] sm:$0xff] }
  0xf0   :  { %1294 = vmatprep.subr.mxu0 %v6165_v21  ;;  %1481 = vmatprep.subr.mxu1 %v6170_v35  ;;  %6185 = vst [vmem:[#allocation88_spill] sm:$0xff] %v4199_v25  ;;  %v6187_v21 = vand.u32 4294901760, %v6186_v14  ;;  %v4213_v35 = vand.u32 4294901760, %v133_v30  ;;  %v4239_v14 = vsub.f32 %v4164_v61, %v5652_v28  ;;  %v6203_v28 = vand.u32 4294901760, %v6053_v18 }
  0xf1   :  { %1298 = vmatpush2.msra.mxu0 %v6169_v11  ;;  %1483 = vmatpush2.msra.mxu1 %v6175_v46  ;;  %v4211_v11 = vsub.f32 %v4148_v36, %v5655_v59  ;;  %v4216_v46 = vsub.f32 %v137_v29, %v4175_v16  ;;  %v6196_v29 = vld [vmem:[#allocation72_spill] sm:$0xff]  ;;  %v6206_v59 = vld [vmem:[#allocation91_spill] sm:$0xff]  ;;  %v6244_v61 = vand.u32 4294901760, %v3811_v1 }
  0xf2   :  { %1302 = vmatprep.subr.mxu0 %v6174_v8  ;;  %1485 = vmatprep.subr.mxu1 %v6180_v39  ;;  %6190 = vst [vmem:[#allocation90_spill] sm:$0xff] %v4213_v35  ;;  %v130_v8 = vld [vmem:[#allocation2 + $0x90] sm:$0xff]  ;;  %v4226_v39 = vand.u32 4294901760, %v132_v41  ;;  %v4263_v33 = vsub.f32 %v133_v30, %v4213_v35 }
  0xf3   :  { %1306 = vmatpush2.msra.mxu0 %v6179_v3  ;;  %1487 = vmatpush2.msra.mxu1 %v6184_v42  ;;  %6191 = vst [vmem:[#allocation92_spill] sm:$0xff] %v4216_v46  ;;  %v6193_v3 = vld [vmem:[#allocation70_spill] sm:$0xff]  ;;  %v6195_v42 = vand.u32 4294901760, %v6049_v13  ;;  %v4247_v13 = vsub.f32 %v4170_v9, %v5653_v60  ;;  %v127_v60 = vld [vmem:[#allocation2 + $0x78] sm:$0xff]  ;;  %v6220_v9 = vand.u32 4294901760, %v3735_v55  ;;  %v6225_v55 = vand.u32 4294901760, %v6059_v54 }
  0xf4   :  { %1310 = vmatprep.subr.mxu0 %v6183_v23  ;;  %1489 = vmatprep.subr.mxu1 %v6188_v38  ;;  %6194 = vst [vmem:[#allocation11_spill] sm:$0xff] %v4226_v39  ;;  %v6199_v38 = vld [vmem:[#allocation74_spill] sm:$0xff]  ;;  %6205 = vst [vmem:[#allocation29_spill] sm:$0xff] %v4263_v33  ;;  %v6207_v23 = vand.u32 4294901760, %v6206_v59  ;;  %v4270_v18 = vsub.f32 %v132_v41, %v4226_v39  ;;  %v6212_v59 = vand.u32 4294901760, %v6057_v37  ;;  %v4286_v41 = vand.u32 4294901760, %v129_v31 }
  0xf5   :  { %1314 = vmatpush2.msra.mxu0 %v6187_v21  ;;  %1491 = vmatpush2.msra.mxu1 %v6193_v3  ;;  %v6198_v21 = vand.u32 4294901760, %v6051_v7  ;;  %v4251_v3 = vand.u32 4294901760, %v130_v8  ;;  %v6204_v7 = vld [vmem:[#allocation76_spill] sm:$0xff]  ;;  %v6230_v54 = vand.u32 4294901760, %v4234_v44 }
  0xf6   :  { %1318 = vmatprep.subr.mxu0 %v6192_v32  ;;  %1493 = vmatprep.subr.mxu1 %v6196_v29  ;;  %v4249_v32 = vand.u32 4294901760, %v131_v22  ;;  %v4254_v29 = vsub.f32 %v135_v62, %v4199_v25  ;;  %6209 = vst [vmem:[#allocation15_spill] sm:$0xff] %v4270_v18  ;;  %6214 = vst [vmem:[#allocation31_spill] sm:$0xff] %v4286_v41  ;;  %v4340_v2 = vsub.f32 %v129_v31, %v4286_v41 }
  0xf7   :  { %1322 = vmatpush2.msra.mxu0 %v6195_v42  ;;  %1495 = vmatpush2.msra.mxu1 %v6199_v38  ;;  %6201 = vst [vmem:[#allocation100_spill] sm:$0xff] %v4251_v3  ;;  %v128_v42 = vld [vmem:[#allocation2 + $0x80] sm:$0xff]  ;;  %v126_v38 = vld [vmem:[#allocation2 + $0x70] sm:$0xff]  ;;  %v4296_v37 = vsub.f32 %v130_v8, %v4251_v3  ;;  %v6237_v31 = vand.u32 4294901760, %v4263_v33 }
  0xf8   :  { %1326 = vmatprep.subr.mxu0 %v6198_v21  ;;  %6200 = vst [vmem:[#allocation103_spill] sm:$0xff] %v4249_v32  ;;  %6202 = vst [vmem:[#allocation102_spill] sm:$0xff] %v4254_v29  ;;  %1497 = vmatprep.subr.mxu1 %v6204_v7  ;;  %v6211_v21 = vand.u32 4294901760, %v4184_v40  ;;  %v4288_v62 = vand.u32 4294901760, %v128_v42 }
  0xf9   :  { %1330 = vmatpush2.msra.mxu0 %v6203_v28  ;;  %1499 = vmatpush2.msra.mxu1 %v6208_v5  ;;  %v6210_v28 = vand.u32 4294901760, %v4188_v6  ;;  %v6213_v5 = vld [vmem:[#allocation80_spill] sm:$0xff]  ;;  %6218 = vst [vmem:[#allocation33_spill] sm:$0xff] %v4296_v37  ;;  %6232 = vst [vmem:[#allocation39_spill] sm:$0xff] %v4340_v2 }
  0xfa   :  { %1334 = vmatprep.subr.mxu0 %v6207_v23  ;;  %v4280_v30 = vsub.f32 %v4184_v40, %v6211_v21  ;;  %1501 = vmatprep.subr.mxu1 %v6213_v5  ;;  %6215 = vst [vmem:[#allocation16_spill] sm:$0xff] %v4288_v62  ;;  %v6217_v21 = vld [vmem:[#allocation82_spill] sm:$0xff]  ;;  %v124_v5 = vld [vmem:[#allocation2 + $0x60] sm:$0xff]  ;;  %v4300_v23 = vsub.f32 %v131_v22, %v4249_v32  ;;  %v4315_v40 = vand.u32 4294901760, %v127_v60 }
  0xfb   :  { %v4275_v7 = vsub.f32 %v4188_v6, %v6210_v28  ;;  %1338 = vmatpush2.msra.mxu0 %v6212_v59  ;;  %v6216_v6 = vand.u32 4294901760, %v6058_v63  ;;  %1503 = vmatpush2.msra.mxu1 %v6217_v21  ;;  %v6221_v28 = vld [vmem:[#allocation84_spill] sm:$0xff]  ;;  %v6222_v63 = vand.u32 4294901760, %v4216_v46  ;;  %v6223_v21 = vand.u32 4294901760, %v4206_v10  ;;  %v125_v59 = vld [vmem:[#allocation2 + $0x68] sm:$0xff] }
  0xfc   :  { %6219 = vst [vmem:[#allocation18_spill] sm:$0xff] %v4300_v23  ;;  %1505 = vmatprep.subr.mxu1 %v6221_v28  ;;  %6224 = vst [vmem:[#allocation35_spill] sm:$0xff] %v4315_v40  ;;  %v4330_v22 = vsub.f32 %v128_v42, %v4288_v62  ;;  %v4337_v28 = vand.u32 4294901760, %v124_v5  ;;  %v6247_v1 = vand.u32 4294901760, %v4300_v23 }
  0xfd   :  { %1342 = vmatprep.subr.mxu0 %v6216_v6  ;;  %v4308_v6 = vsub.f32 %v4216_v46, %v6222_v63  ;;  %v4313_v8 = vsub.f32 %v4206_v10, %v6223_v21  ;;  %v4323_v46 = vand.u32 4294901760, %v126_v38  ;;  %v6228_v21 = vand.u32 4294901760, %v6061_v49  ;;  %1507 = vmatpush2.msra.mxu1 %v3652_v51  ;;  %v123_v63 = vld [vmem:[#allocation2 + $0x58] sm:$0xff]  ;;  %v122_v10 = vld [vmem:[#allocation2 + $0x50] sm:$0xff] }
  0xfe   :  { %1346 = vmatpush2.msra.mxu0 %v6220_v9  ;;  %v6226_v9 = vld [vmem:[#allocation106_spill] sm:$0xff]  ;;  %6229 = vst [vmem:[#allocation37_spill] sm:$0xff] %v4330_v22  ;;  %6231 = vst [vmem:[#allocation22_spill] sm:$0xff] %v4337_v28  ;;  %v6233_v49 = vand.u32 4294901760, %v3795_v58  ;;  %1509 = vmatprep.subr.mxu1 %v3665_v47  ;;  %v6234_v51 = vand.u32 4294901760, %v4254_v29  ;;  %v4378_v47 = vand.u32 4294901760, %v123_v63 }
  0xff   :  { %1350 = vmatprep.subr.mxu0 %v6225_v55  ;;  %1388 = vmatprep.mubr.f32.mxu0 %v6226_v9  ;;  %6227 = vst [vmem:[#allocation20_spill] sm:$0xff] %v4323_v46  ;;  %v4335_v55 = vsub.f32 %v4234_v44, %v6230_v54  ;;  %v6236_v44 = vand.u32 4294901760, %v3801_v20  ;;  %v6239_v54 = vand.u32 4294901760, %v3807_v12  ;;  %v4371_v20 = vsub.f32 %v126_v38, %v4323_v46  ;;  %v121_v58 = vld [vmem:[#allocation2 + $0x48] sm:$0xff]  ;;  %v119_v12 = vld [vmem:[#allocation2 + $0x38] sm:$0xff]  ;;  %v118_v38 = vld [vmem:[#allocation2 + $0x30] sm:$0xff] }
 0x100   :  { %1354 = vmatpush2.msra.mxu0 %v6228_v21  ;;  %v4348_v42 = vsub.f32 %v4254_v29, %v6234_v51  ;;  %v4350_v21 = vand.u32 4294901760, %v125_v59  ;;  %1511 = vmatpush2.msra.mxu1 %v6060_v27  ;;  %v4365_v51 = vsub.f32 %v127_v60, %v4315_v40  ;;  %v6241_v27 = vand.u32 4294901760, %v4270_v18  ;;  %6242 = vst [vmem:[#allocation43_spill] sm:$0xff] %v4378_v47  ;;  %v120_v60 = vld [vmem:[#allocation2 + $0x40] sm:$0xff] }
 0x101   :  { %1358 = vmatprep.subr.mxu0 %v6233_v49  ;;  %v4362_v49 = vsub.f32 %v4263_v33, %v6237_v31  ;;  %1513 = vmatprep.subr.mxu1 %v6062_v57  ;;  %6240 = vst [vmem:[#allocation26_spill] sm:$0xff] %v4371_v20  ;;  %v4380_v31 = vand.u32 4294901760, %v122_v10  ;;  %v4387_v57 = vsub.f32 %v124_v5, %v4337_v28  ;;  %v6256_v33 = vld [vmem:[#allocation96_spill] sm:$0xff]  ;;  %v6259_v29 = vld [vmem:[#allocation105_spill] sm:$0xff] }
 0x102   :  { %6235 = vst [vmem:[#allocation24_spill] sm:$0xff] %v4350_v21  ;;  %1362 = vmatpush2.msra.mxu0 %v6236_v44  ;;  %6238 = vst [vmem:[#allocation41_spill] sm:$0xff] %v4365_v51  ;;  %v4376_v44 = vsub.f32 %v4270_v18, %v6241_v27  ;;  %1515 = vmatpush2.msra.mxu1 %v6063_v34  ;;  %v6246_v27 = vand.u32 4294901760, %v3829_v19  ;;  %v4398_v34 = vsub.f32 %v4300_v23, %v6247_v1  ;;  %v6261_v23 = vld [vmem:[#allocation98_spill] sm:$0xff] }
 0x103   :  { %1366 = vmatprep.subr.mxu0 %v6239_v54  ;;  %6243 = vst [vmem:[#allocation28_spill] sm:$0xff] %v4380_v31  ;;  %6245 = vst [vmem:[#allocation45_spill] sm:$0xff] %v4387_v57  ;;  %1517 = vmatprep.subr.mxu1 %v3712_v56  ;;  %v4406_v54 = vsub.f32 %v125_v59, %v4350_v21  ;;  %v6250_v19 = vand.u32 4294901760, %v3833_v52  ;;  %v6251_v56 = vld [vmem:[#allocation95_spill] sm:$0xff]  ;;  %v4412_v18 = vand.u32 4294901760, %v121_v58  ;;  %v4414_v1 = vand.u32 4294901760, %v120_v60 }
 0x104   :  { %1370 = vmatpush2.msra.mxu0 %v6244_v61  ;;  %v6248_v61 = vand.u32 4294901760, %v4296_v37  ;;  %1519 = vmatpush2.msra.mxu1 %v6251_v56  ;;  %v4422_v52 = vsub.f32 %v122_v10, %v4380_v31  ;;  %v116_v56 = vld [vmem:[#allocation2 + $0x20] sm:$0xff]  ;;  %v6260_v36 = vand.u32 4294901760, %v6259_v29  ;;  %v4441_v59 = vand.u32 4294901760, %v119_v12  ;;  %v114_v29 = vld [vmem:[#allocation2 + $0x10] sm:$0xff] }
 0x105   :  { %1374 = vmatprep.subr.mxu0 %v6246_v27  ;;  %6249 = vst [vmem:[#allocation30_spill] sm:$0xff] %v4406_v54  ;;  %6252 = vst [vmem:[#allocation47_spill] sm:$0xff] %v4412_v18  ;;  %1521 = vmatprep.subr.mxu1 %v6256_v33  ;;  %v4426_v27 = vsub.f32 %v123_v63, %v4378_v47  ;;  %v117_v63 = vld [vmem:[#allocation2 + $0x28] sm:$0xff] }
 0x106   :  { %v4403_v5 = vsub.f32 %v4296_v37, %v6248_v61  ;;  %1378 = vmatpush2.msra.mxu0 %v6250_v19  ;;  %6253 = vst [vmem:[#allocation32_spill] sm:$0xff] %v4414_v1  ;;  %v6254_v61 = vld [vmem:[#allocation104_spill] sm:$0xff]  ;;  %6257 = vst [vmem:[#allocation49_spill] sm:$0xff] %v4422_v52  ;;  %1523 = vmatpush2.msra.mxu1 %v6261_v23  ;;  %v4443_v19 = vand.u32 4294901760, %v118_v38  ;;  %v4464_v23 = vsub.f32 %v121_v58, %v4412_v18 }
 0x107   :  { %v6255_v37 = vand.u32 4294901760, %v6254_v61  ;;  %6258 = vst [vmem:[#allocation34_spill] sm:$0xff] %v4426_v27  ;;  %v6263_v61 = vand.u32 4294901760, %v4330_v22  ;;  %6264 = vst [vmem:[#allocation51_spill] sm:$0xff] %v4441_v59  ;;  %1525 = vmatprep.mubr.f32.mxu1 %v6226_v9  ;;  %v6271_v9 = vand.u32 4294901760, %v4371_v20  ;;  %v6273_v58 = vand.u32 4294901760, %v4211_v11 }
 0x108   :  { %6265 = vst [vmem:[#allocation36_spill] sm:$0xff] %v4443_v19  ;;  %6270 = vst [vmem:[#allocation55_spill] sm:$0xff] %v4464_v23  ;;  %1527 = vmatmul.mubr.f32.vlgmr.msra.gmra.mxu1 %v6266_v17 }
 0x109   :  { %1382 = vmatprep.subr.mxu0 %v6255_v37  ;;  %v6262_v37 = vand.u32 4294901760, %v4340_v2  ;;  %v4439_v10 = vsub.f32 %v4330_v22, %v6263_v61  ;;  %v4454_v61 = vsub.f32 %v120_v60, %v4414_v1  ;;  %v6268_v22 = vand.u32 4294901760, %v4365_v51  ;;  %1691 = vmatprep.subr.mxu1 %v6273_v58 }
 0x10a   :  { %1386 = vmatpush2.msra.mxu0 %v6260_v36  ;;  %v115_v36 = vld [vmem:[#allocation2 + $0x18] sm:$0xff]  ;;  %v4471_v60 = vsub.f32 %v4371_v20, %v6271_v9  ;;  %v112_v9 = vld [vmem:[#allocation2] sm:$0xff]  ;;  %v4486_v20 = vsub.f32 %v119_v12, %v4441_v59  ;;  %v6278_v58 = vand.u32 4294901760, %v4387_v57  ;;  %v113_v12 = vld [vmem:[#allocation2 + $0x8] sm:$0xff] }
 0x10b   :  { %v4434_v33 = vsub.f32 %v4340_v2, %v6262_v37  ;;  %1390 = vmatmul.mubr.f32.vlgmr.msra.gmra.mxu0 %v6266_v17  ;;  %1542 = vmatprep.subr.mxu0 %v4127_v15  ;;  %6267 = vst [vmem:[#allocation53_spill] sm:$0xff] %v4454_v61  ;;  %v4459_v2 = vsub.f32 %v4365_v51, %v6268_v22  ;;  %v4461_v15 = vand.u32 4294901760, %v116_v56  ;;  %v4473_v37 = vand.u32 4294901760, %v117_v63 }
 0x10c   :  { %1544 = vmatpush1.msra.mxu0 %v4132_v0  ;;  %v4483_v0 = vsub.f32 %v118_v38, %v4443_v19  ;;  %6275 = vst [vmem:[#allocation42_spill] sm:$0xff] %v4486_v20  ;;  %v6276_v51 = vand.u32 4294901760, %v4224_v53  ;;  %v6277_v22 = vand.u32 4294901760, %v4406_v54  ;;  %v4499_v17 = vsub.f32 %v4387_v57, %v6278_v58  ;;  %v175_v58 = vld [vmem:[#allocation2 + $0x1f8] sm:$0xff] }
 0x10d   :  { %6269 = vst [vmem:[#allocation38_spill] sm:$0xff] %v4461_v15  ;;  %1546 = vmatprep.subr.mxu0 %v4137_v24  ;;  %6272 = vst [vmem:[#allocation40_spill] sm:$0xff] %v4473_v37  ;;  %v4501_v38 = vand.u32 4294901760, %v115_v36  ;;  %v4503_v24 = vand.u32 4294901760, %v114_v29  ;;  %v6281_v53 = vand.u32 4294901760, %v4239_v14  ;;  %v6283_v57 = vand.u32 4294901760, %v4247_v13 }
 0x10e   :  { %1548 = vmatpush1.msra.mxu0 %v4142_v48  ;;  %6274 = vst [vmem:[#allocation57_spill] sm:$0xff] %v4483_v0  ;;  %1697 = vmatpush1.msra.mxu1 %v6276_v51  ;;  %v4494_v11 = vsub.f32 %v4406_v54, %v6277_v22  ;;  %v4510_v22 = vsub.f32 %v116_v56, %v4461_v15  ;;  %v4528_v51 = vand.u32 4294901760, %v112_v9  ;;  %v174_v54 = vld [vmem:[#allocation2 + $0x1f0] sm:$0xff]  ;;  %v6287_v13 = vand.u32 4294901760, %v4275_v7 }
 0x10f   :  { %1550 = vmatprep.subr.mxu0 %v4156_v43  ;;  %6279 = vst [vmem:[#allocation59_spill] sm:$0xff] %v4501_v38  ;;  %6280 = vst [vmem:[#allocation44_spill] sm:$0xff] %v4503_v24  ;;  %1703 = vmatprep.subr.mxu1 %v6281_v53  ;;  %v6285_v53 = vand.u32 4294901760, %v4422_v52  ;;  %v4546_v7 = vsub.f32 %v114_v29, %v4503_v24  ;;  %v4549_v43 = vsub.f32 %v115_v36, %v4501_v38  ;;  %v173_v36 = vld [vmem:[#allocation2 + $0x1e8] sm:$0xff] }
 0x110   :  { %1552 = vmatpush1.msra.mxu0 %v4158_v50  ;;  %6282 = vst [vmem:[#allocation61_spill] sm:$0xff] %v4510_v22  ;;  %1709 = vmatpush1.msra.mxu1 %v6283_v57  ;;  %v6284_v50 = vand.u32 4294901760, %v4426_v27  ;;  %6286 = vst [vmem:[#allocation46_spill] sm:$0xff] %v4528_v51  ;;  %v4533_v57 = vand.u32 4294901760, %v113_v12  ;;  %v4564_v29 = vand.u32 4294901760, %v175_v58 }
 0x111   :  { %1554 = vmatprep.subr.mxu0 %v4175_v16  ;;  %v4526_v56 = vsub.f32 %v4422_v52, %v6285_v53  ;;  %1715 = vmatprep.subr.mxu1 %v6287_v13  ;;  %v6290_v53 = vand.u32 4294901760, %v4280_v30  ;;  %6291 = vst [vmem:[#allocation65_spill] sm:$0xff] %v4546_v7  ;;  %v172_v13 = vld [vmem:[#allocation2 + $0x1e0] sm:$0xff]  ;;  %6292 = vst [vmem:[#allocation50_spill] sm:$0xff] %v4549_v43  ;;  %v4566_v52 = vand.u32 4294901760, %v174_v54 }
 0x112   :  { %v4521_v14 = vsub.f32 %v4426_v27, %v6284_v50  ;;  %1556 = vmatpush1.msra.mxu0 %v4177_v45  ;;  %6288 = vst [vmem:[#allocation63_spill] sm:$0xff] %v4533_v57  ;;  %v4538_v27 = vsub.f32 %v117_v63, %v4473_v37  ;;  %v6293_v63 = vand.u32 4294901760, %v4308_v6  ;;  %v6294_v50 = vand.u32 4294901760, %v4464_v23  ;;  %6296 = vst [vmem:[#allocation67_spill] sm:$0xff] %v4564_v29 }
 0x113   :  { %1558 = vmatprep.subr.mxu0 %v4199_v25  ;;  %1721 = vmatpush1.msra.mxu1 %v6290_v53  ;;  %v6295_v53 = vand.u32 4294901760, %v4454_v61  ;;  %6297 = vst [vmem:[#allocation52_spill] sm:$0xff] %v4566_v52  ;;  %v6298_v6 = vand.u32 4294901760, %v4313_v8  ;;  %v6302_v8 = vand.u32 4294901760, %v4483_v0 }
 0x114   :  { %6289 = vst [vmem:[#allocation48_spill] sm:$0xff] %v4538_v27  ;;  %1560 = vmatpush1.msra.mxu0 %v4193_v4  ;;  %1727 = vmatprep.subr.mxu1 %v6293_v63  ;;  %v4557_v30 = vsub.f32 %v4464_v23, %v6294_v50  ;;  %v4574_v23 = vsub.f32 %v112_v9, %v4528_v51  ;;  %v6301_v4 = vand.u32 4294901760, %v4486_v20  ;;  %v4591_v50 = vand.u32 4294901760, %v172_v13  ;;  %v171_v63 = vld [vmem:[#allocation2 + $0x1d8] sm:$0xff] }
 0x115   :  { %v4562_v45 = vsub.f32 %v4454_v61, %v6295_v53  ;;  %1562 = vmatprep.subr.mxu0 %v4213_v35  ;;  %1733 = vmatpush1.msra.mxu1 %v6298_v6  ;;  %v6300_v61 = vand.u32 4294901760, %v4348_v42  ;;  %v4588_v6 = vsub.f32 %v4483_v0, %v6302_v8  ;;  %v170_v53 = vld [vmem:[#allocation2 + $0x1d0] sm:$0xff]  ;;  %v6304_v42 = vand.u32 4294901760, %v4335_v55 }
 0x116   :  { %6299 = vst [vmem:[#allocation69_spill] sm:$0xff] %v4574_v23  ;;  %1564 = vmatpush1.msra.mxu0 %v4226_v39  ;;  %v4583_v35 = vsub.f32 %v4486_v20, %v6301_v4  ;;  %6303 = vst [vmem:[#allocation54_spill] sm:$0xff] %v4591_v50  ;;  %v4601_v8 = vsub.f32 %v113_v12, %v4533_v57  ;;  %v6307_v9 = vand.u32 4294901760, %v4362_v49  ;;  %v6310_v12 = vand.u32 4294901760, %v4376_v44 }
 0x117   :  { %1739 = vmatprep.subr.mxu1 %v6300_v61  ;;  %1566 = vmatprep.subr.mxu0 %v4249_v32  ;;  %v4596_v61 = vand.u32 4294901760, %v173_v36  ;;  %v4609_v55 = vsub.f32 %v174_v54, %v4566_v52  ;;  %v4612_v4 = vsub.f32 %v175_v58, %v4564_v29  ;;  %v6311_v20 = vand.u32 4294901760, %v4510_v22  ;;  %v169_v54 = vld [vmem:[#allocation2 + $0x1c8] sm:$0xff] }
 0x118   :  { %1745 = vmatpush1.msra.mxu1 %v6304_v42  ;;  %6306 = vst [vmem:[#allocation56_spill] sm:$0xff] %v4601_v8  ;;  %1568 = vmatpush1.msra.mxu0 %v4251_v3  ;;  %v168_v42 = vld [vmem:[#allocation2 + $0x1c0] sm:$0xff]  ;;  %v4624_v32 = vand.u32 4294901760, %v170_v53  ;;  %v6314_v58 = vand.u32 4294901760, %v4398_v34  ;;  %v6317_v0 = vand.u32 4294901760, %v4403_v5  ;;  %v6318_v34 = vand.u32 4294901760, %v4549_v43 }
 0x119   :  { %6305 = vst [vmem:[#allocation71_spill] sm:$0xff] %v4596_v61  ;;  %1751 = vmatprep.subr.mxu1 %v6307_v9  ;;  %6308 = vst [vmem:[#allocation73_spill] sm:$0xff] %v4609_v55  ;;  %1570 = vmatprep.subr.mxu0 %v4286_v41  ;;  %v4620_v49 = vsub.f32 %v4510_v22, %v6311_v20  ;;  %v4622_v9 = vand.u32 4294901760, %v171_v63  ;;  %v6315_v41 = vand.u32 4294901760, %v4538_v27  ;;  %v4659_v5 = vand.u32 4294901760, %v169_v54 }
 0x11a   :  { %6309 = vst [vmem:[#allocation58_spill] sm:$0xff] %v4612_v4  ;;  %1757 = vmatpush1.msra.mxu1 %v6310_v12  ;;  %6313 = vst [vmem:[#allocation60_spill] sm:$0xff] %v4624_v32  ;;  %1572 = vmatpush1.msra.mxu0 %v4288_v62  ;;  %v4638_v22 = vsub.f32 %v172_v13, %v4591_v50  ;;  %v6319_v12 = vand.u32 4294901760, %v4546_v7  ;;  %v167_v13 = vld [vmem:[#allocation2 + $0x1b8] sm:$0xff]  ;;  %v166_v62 = vld [vmem:[#allocation2 + $0x1b0] sm:$0xff] }
 0x11b   :  { %6312 = vst [vmem:[#allocation75_spill] sm:$0xff] %v4622_v9  ;;  %1763 = vmatprep.subr.mxu1 %v6314_v58  ;;  %v4635_v20 = vsub.f32 %v4538_v27, %v6315_v41  ;;  %1574 = vmatprep.subr.mxu0 %v4315_v40  ;;  %v4646_v58 = vsub.f32 %v4549_v43, %v6318_v34  ;;  %v4654_v27 = vand.u32 4294901760, %v168_v42  ;;  %6322 = vst [vmem:[#allocation79_spill] sm:$0xff] %v4659_v5  ;;  %v164_v34 = vld [vmem:[#allocation2 + $0x1a0] sm:$0xff] }
 0x11c   :  { %6316 = vst [vmem:[#allocation77_spill] sm:$0xff] %v4638_v22  ;;  %1769 = vmatpush1.msra.mxu1 %v6317_v0  ;;  %v4651_v44 = vsub.f32 %v4546_v7, %v6319_v12  ;;  %1576 = vmatpush1.msra.mxu0 %v4323_v46  ;;  %v6321_v0 = vand.u32 4294901760, %v4434_v33  ;;  %v4664_v12 = vsub.f32 %v173_v36, %v4596_v61  ;;  %v6324_v41 = vand.u32 4294901760, %v4439_v10  ;;  %v165_v7 = vld [vmem:[#allocation2 + $0x1a8] sm:$0xff] }
 0x11d   :  { %6320 = vst [vmem:[#allocation62_spill] sm:$0xff] %v4654_v27  ;;  %1578 = vmatprep.subr.mxu0 %v4350_v21  ;;  %v4671_v46 = vsub.f32 %v170_v53, %v4624_v32  ;;  %v6326_v33 = vand.u32 4294901760, %v4574_v23  ;;  %v4679_v43 = vsub.f32 %v171_v63, %v4622_v9  ;;  %v6328_v36 = vand.u32 4294901760, %v4459_v2 }
 0x11e   :  { %1775 = vmatprep.subr.mxu1 %v6321_v0  ;;  %6323 = vst [vmem:[#allocation64_spill] sm:$0xff] %v4664_v12  ;;  %1580 = vmatpush1.msra.mxu0 %v4337_v28  ;;  %v4687_v53 = vand.u32 4294901760, %v166_v62  ;;  %v6332_v2 = vand.u32 4294901760, %v4601_v8  ;;  %v4701_v10 = vsub.f32 %v168_v42, %v4654_v27  ;;  %v6334_v21 = vand.u32 4294901760, %v4494_v11  ;;  %v163_v42 = vld [vmem:[#allocation2 + $0x198] sm:$0xff] }
 0x11f   :  { %1781 = vmatpush1.msra.mxu1 %v6324_v41  ;;  %6325 = vst [vmem:[#allocation81_spill] sm:$0xff] %v4671_v46  ;;  %v4676_v0 = vsub.f32 %v4574_v23, %v6326_v33  ;;  %6327 = vst [vmem:[#allocation66_spill] sm:$0xff] %v4679_v43  ;;  %v4685_v41 = vand.u32 4294901760, %v167_v13  ;;  %1582 = vmatprep.subr.mxu0 %v4378_v47  ;;  %v6331_v33 = vand.u32 4294901760, %v4471_v60  ;;  %v6335_v60 = vand.u32 4294901760, %v4612_v4  ;;  %v162_v47 = vld [vmem:[#allocation2 + $0x190] sm:$0xff] }
 0x120   :  { %1787 = vmatprep.subr.mxu1 %v6328_v36  ;;  %6330 = vst [vmem:[#allocation68_spill] sm:$0xff] %v4687_v53  ;;  %v4698_v36 = vsub.f32 %v4601_v8, %v6332_v2  ;;  %6333 = vst [vmem:[#allocation70_spill] sm:$0xff] %v4701_v10  ;;  %1584 = vmatpush1.msra.mxu0 %v4380_v31  ;;  %v6336_v23 = vand.u32 4294901760, %v4609_v55  ;;  %v4717_v8 = vand.u32 4294901760, %v164_v34  ;;  %v6341_v2 = vand.u32 4294901760, %v4521_v14 }
 0x121   :  { %6329 = vst [vmem:[#allocation83_spill] sm:$0xff] %v4685_v41  ;;  %1793 = vmatpush1.msra.mxu1 %v6331_v33  ;;  %v4709_v33 = vsub.f32 %v4612_v4, %v6335_v60  ;;  %1586 = vmatprep.subr.mxu0 %v4412_v18  ;;  %v4723_v60 = vand.u32 4294901760, %v165_v7  ;;  %v160_v18 = vld [vmem:[#allocation2 + $0x180] sm:$0xff]  ;;  %v4742_v4 = vsub.f32 %v167_v13, %v4685_v41  ;;  %v6348_v11 = vand.u32 4294901760, %v4557_v30 }
 0x122   :  { %1799 = vmatprep.subr.mxu1 %v6334_v21  ;;  %v4714_v63 = vsub.f32 %v4609_v55, %v6336_v23  ;;  %6337 = vst [vmem:[#allocation72_spill] sm:$0xff] %v4717_v8  ;;  %v6338_v21 = vand.u32 4294901760, %v4499_v17  ;;  %v4727_v23 = vsub.f32 %v169_v54, %v4659_v5  ;;  %1588 = vmatpush1.msra.mxu0 %v4414_v1  ;;  %v6343_v17 = vand.u32 4294901760, %v4638_v22  ;;  %v161_v1 = vld [vmem:[#allocation2 + $0x188] sm:$0xff] }
 0x123   :  { %6339 = vst [vmem:[#allocation74_spill] sm:$0xff] %v4723_v60  ;;  %v4733_v55 = vsub.f32 %v166_v62, %v4687_v53  ;;  %6344 = vst [vmem:[#allocation78_spill] sm:$0xff] %v4742_v4  ;;  %1590 = vmatprep.subr.mxu0 %v4441_v59  ;;  %v6345_v54 = vand.u32 4294901760, %v4526_v56  ;;  %v1870_v14 = vand.u32 4294901760, %v4698_v36  ;;  %v4748_v62 = vand.u32 4294901760, %v163_v42 }
 0x124   :  { %1805 = vmatpush1.msra.mxu1 %v6338_v21  ;;  %6340 = vst [vmem:[#allocation76_spill] sm:$0xff] %v4727_v23  ;;  %v4738_v21 = vsub.f32 %v4638_v22, %v6343_v17  ;;  %1592 = vmatpush1.msra.mxu0 %v4443_v19  ;;  %v6349_v56 = vand.u32 4294901760, %v4664_v12  ;;  %v6351_v17 = vand.u32 4294901760, %v4562_v45  ;;  %v6352_v30 = vand.u32 4294901760, %v4679_v43  ;;  %v159_v19 = vld [vmem:[#allocation2 + $0x178] sm:$0xff]  ;;  %v156_v45 = vld [vmem:[#allocation2 + $0x160] sm:$0xff] }
 0x125   :  { %1811 = vmatprep.subr.mxu1 %v6341_v2  ;;  %6342 = vst [vmem:[#allocation91_spill] sm:$0xff] %v4733_v55  ;;  %6346 = vst [vmem:[#allocation80_spill] sm:$0xff] %v4748_v62  ;;  %v4750_v2 = vand.u32 4294901760, %v162_v47  ;;  %1594 = vmatprep.subr.mxu0 %v4473_v37  ;;  %v4775_v13 = vand.u32 4294901760, %v160_v18  ;;  %v4789_v22 = vand.u32 4294901760, %v161_v1 }
 0x126   :  { %1817 = vmatpush1.msra.mxu1 %v6345_v54  ;;  %v4761_v36 = vsub.f32 %v4664_v12, %v6349_v56  ;;  %v4764_v54 = vsub.f32 %v164_v34, %v4717_v8  ;;  %v158_v56 = vld [vmem:[#allocation2 + $0x170] sm:$0xff]  ;;  %v4778_v12 = vsub.f32 %v165_v7, %v4723_v60  ;;  %1596 = vmatpush1.msra.mxu0 %v4461_v15  ;;  %v6355_v34 = vand.u32 4294901760, %v4583_v35 }
 0x127   :  { %6347 = vst [vmem:[#allocation82_spill] sm:$0xff] %v4750_v2  ;;  %1823 = vmatprep.subr.mxu1 %v6348_v11  ;;  %v4772_v11 = vsub.f32 %v4679_v43, %v6352_v30  ;;  %6353 = vst [vmem:[#allocation106_spill] sm:$0xff] %v4775_v13  ;;  %1598 = vmatprep.subr.mxu0 %v4501_v38  ;;  %v6358_v7 = vand.u32 4294901760, %v4588_v6  ;;  %v4796_v15 = vsub.f32 %v162_v47, %v4750_v2  ;;  %v157_v38 = vld [vmem:[#allocation2 + $0x168] sm:$0xff] }
 0x128   :  { %6350 = vst [vmem:[#allocation84_spill] sm:$0xff] %v4764_v54  ;;  %1829 = vmatpush1.msra.mxu1 %v6351_v17  ;;  %6354 = vst [vmem:[#allocation95_spill] sm:$0xff] %v4778_v12  ;;  %v6356_v17 = vand.u32 4294901760, %v4671_v46  ;;  %v6360_v35 = vand.u32 4294901760, %v4701_v10  ;;  %1600 = vmatpush1.msra.mxu0 %v4503_v24  ;;  %v6362_v43 = vand.u32 4294901760, %v4635_v20  ;;  %v1894_v6 = vand.u32 4294901760, %v4761_v36 }
 0x129   :  { %1835 = vmatprep.subr.mxu1 %v6355_v34  ;;  %6357 = vst [vmem:[#allocation104_spill] sm:$0xff] %v4789_v22  ;;  %6359 = vst [vmem:[#allocation96_spill] sm:$0xff] %v4796_v15  ;;  %v4811_v47 = vand.u32 4294901760, %v159_v19  ;;  %1602 = vmatprep.subr.mxu0 %v4533_v57  ;;  %v4826_v20 = vsub.f32 %v160_v18, %v4775_v13  ;;  %v4838_v57 = vand.u32 4294901760, %v156_v45  ;;  %v6370_v36 = vand.u32 4294901760, %v4651_v44 }
 0x12a   :  { %v4787_v30 = vsub.f32 %v4671_v46, %v6356_v17  ;;  %1841 = vmatpush1.msra.mxu1 %v6358_v7  ;;  %v4801_v34 = vsub.f32 %v4701_v10, %v6360_v35  ;;  %v4805_v46 = vsub.f32 %v163_v42, %v4748_v62  ;;  %v4813_v7 = vand.u32 4294901760, %v158_v56  ;;  %1604 = vmatpush1.msra.mxu0 %v4528_v51 }
 0x12b   :  { %1847 = vmatprep.subr.mxu1 %v6362_v43  ;;  %6363 = vst [vmem:[#allocation98_spill] sm:$0xff] %v4811_v47  ;;  %v6364_v17 = vand.u32 4294901760, %v4620_v49  ;;  %v1906_v42 = vand.u32 4294901760, %v4772_v11  ;;  %v6365_v10 = vand.u32 4294901760, %v4727_v23  ;;  %6366 = vst [vmem:[#allocation107_spill] sm:$0xff] %v4826_v20  ;;  %v6367_v35 = vand.u32 4294901760, %v4646_v58  ;;  %1606 = vmatprep.subr.mxu0 %v4564_v29 }
 0x12c   :  { %6361 = vst [vmem:[#allocation105_spill] sm:$0xff] %v4805_v46  ;;  %v1912_v49 = vand.u32 4294901760, %v4787_v30  ;;  %6369 = vst [vmem:[#allocation108_spill] sm:$0xff] %v4838_v57  ;;  %v4841_v18 = vsub.f32 %v161_v1, %v4789_v22  ;;  %v6371_v30 = vand.u32 4294901760, %v4733_v55  ;;  %1608 = vmatpush2.msra.mxu0 %v4566_v52  ;;  %v4857_v1 = vsub.f32 %v158_v56, %v4813_v7 }
 0x12d   :  { %1853 = vmatpush1.msra.mxu1 %v6364_v17  ;;  %v4823_v43 = vsub.f32 %v4727_v23, %v6365_v10  ;;  %v6368_v17 = vand.u32 4294901760, %v4742_v4  ;;  %v154_v10 = vld [vmem:[#allocation2 + $0x150] sm:$0xff]  ;;  %v6373_v44 = vand.u32 4294901760, %v4764_v54  ;;  %v4866_v29 = vsub.f32 %v159_v19, %v4811_v47  ;;  %1610 = vmatprep.subr.mxu0 %v4596_v61 }
 0x12e   :  { %1859 = vmatprep.subr.mxu1 %v6367_v35  ;;  %v4850_v35 = vsub.f32 %v4733_v55, %v6371_v30  ;;  %6372 = vst [vmem:[#allocation109_spill] sm:$0xff] %v4857_v1  ;;  %v153_v30 = vld [vmem:[#allocation2 + $0x148] sm:$0xff]  ;;  %v152_v55 = vld [vmem:[#allocation2 + $0x140] sm:$0xff]  ;;  %v6375_v51 = vand.u32 4294901760, %v4676_v0  ;;  %v6376_v56 = vand.u32 4294901760, %v4778_v12  ;;  %1612 = vmatpush2.msra.mxu0 %v4591_v50  ;;  %v6378_v19 = vand.u32 4294901760, %v4709_v33 }
 0x12f   :  { %v4836_v11 = vsub.f32 %v4742_v4, %v6368_v17  ;;  %1865 = vmatpush1.msra.mxu1 %v6370_v36  ;;  %v4852_v17 = vand.u32 4294901760, %v157_v38  ;;  %v155_v4 = vld [vmem:[#allocation2 + $0x158] sm:$0xff]  ;;  %v4862_v36 = vsub.f32 %v4764_v54, %v6373_v44  ;;  %6374 = vst [vmem:[#allocation110_spill] sm:$0xff] %v4866_v29  ;;  %v4877_v44 = vand.u32 4294901760, %v154_v10  ;;  %1614 = vmatprep.subr.mxu0 %v4622_v9 }
 0x130   :  { %1871 = vmatprep.subr.mxu1 %v1870_v14  ;;  %v1918_v14 = vand.u32 4294901760, %v4823_v43  ;;  %v4875_v52 = vsub.f32 %v4778_v12, %v6376_v56  ;;  %v4887_v0 = vand.u32 4294901760, %v155_v4  ;;  %v6380_v56 = vand.u32 4294901760, %v4714_v63  ;;  %1616 = vmatpush2.msra.mxu0 %v4624_v32 }
 0x131   :  { %1877 = vmatpush1.msra.mxu1 %v6375_v51  ;;  %6377 = vst [vmem:[#allocation111_spill] sm:$0xff] %v4877_v44  ;;  %v1930_v54 = vand.u32 4294901760, %v4836_v11  ;;  %v4885_v51 = vsub.f32 %v156_v45, %v4838_v57  ;;  %v1936_v58 = vand.u32 4294901760, %v4850_v35  ;;  %v6381_v50 = vand.u32 4294901760, %v4805_v46  ;;  %v151_v35 = vld [vmem:[#allocation2 + $0x138] sm:$0xff]  ;;  %1618 = vmatprep.subr.mxu0 %v4659_v5 }
 0x132   :  { %1883 = vmatprep.subr.mxu1 %v6378_v19  ;;  %6379 = vst [vmem:[#allocation112_spill] sm:$0xff] %v4887_v0  ;;  %v4899_v11 = vand.u32 4294901760, %v153_v30  ;;  %v4901_v45 = vand.u32 4294901760, %v152_v55  ;;  %v150_v19 = vld [vmem:[#allocation2 + $0x130] sm:$0xff]  ;;  %v1948_v43 = vand.u32 4294901760, %v4862_v36  ;;  %v6384_v63 = vand.u32 4294901760, %v4796_v15  ;;  %1620 = vmatpush2.msra.mxu0 %v4654_v27 }
 0x133   :  { %1889 = vmatpush2.msra.mxu1 %v6380_v56  ;;  %v4897_v33 = vsub.f32 %v4805_v46, %v6381_v50  ;;  %v4912_v50 = vsub.f32 %v157_v38, %v4852_v17  ;;  %v148_v46 = vld [vmem:[#allocation2 + $0x120] sm:$0xff]  ;;  %v6385_v12 = vand.u32 4294901760, %v4738_v21  ;;  %v4919_v36 = vsub.f32 %v154_v10, %v4877_v44  ;;  %v149_v10 = vld [vmem:[#allocation2 + $0x128] sm:$0xff]  ;;  %1622 = vmatprep.subr.mxu0 %v4685_v41 }
 0x134   :  { %6382 = vst [vmem:[#allocation113_spill] sm:$0xff] %v4899_v11  ;;  %6383 = vst [vmem:[#allocation114_spill] sm:$0xff] %v4901_v45  ;;  %1895 = vmatprep.subr.mxu1 %v1894_v6  ;;  %v4908_v56 = vsub.f32 %v4796_v15, %v6384_v63  ;;  %v1942_v6 = vand.u32 4294901760, %v4875_v52  ;;  %v6386_v63 = vand.u32 4294901760, %v4826_v20  ;;  %v4927_v9 = vand.u32 4294901760, %v4083_v26  ;;  %1624 = vmatpush2.msra.mxu0 %v4687_v53 }
 0x135   :  { %1901 = vmatpush2.msra.mxu1 %v6385_v12  ;;  %v6388_v38 = vand.u32 4294901760, %v4841_v18  ;;  %v4935_v52 = vand.u32 4294901760, %v150_v19  ;;  %v4939_v5 = vsub.f32 %v155_v4, %v4887_v0  ;;  %v6390_v4 = vand.u32 4294901760, %v4866_v29  ;;  %1626 = vmatprep.subr.mxu0 %v4723_v60 }
 0x136   :  { %v4924_v15 = vsub.f32 %v4826_v20, %v6386_v63  ;;  %6387 = vst [vmem:[#allocation115_spill] sm:$0xff] %v4927_v9  ;;  %1907 = vmatprep.subr.mxu1 %v1906_v42  ;;  %v1954_v63 = vand.u32 4294901760, %v4897_v33  ;;  %v4944_v42 = vsub.f32 %v152_v55, %v4901_v45  ;;  %v4946_v20 = vand.u32 4294901760, %v151_v35  ;;  %1628 = vmatpush2.msra.mxu0 %v4717_v8  ;;  %v145_v8 = vld [vmem:[#allocation2 + $0x108] sm:$0xff] }
 0x137   :  { %v4933_v12 = vsub.f32 %v4841_v18, %v6388_v38  ;;  %1913 = vmatpush2.msra.mxu1 %v1912_v49  ;;  %v4948_v38 = vand.u32 4294901760, %v148_v46  ;;  %v1960_v21 = vand.u32 4294901760, %v4908_v56  ;;  %v1977_v27 = vsub.f32 %v4866_v29, %v6390_v4  ;;  %v147_v56 = vld [vmem:[#allocation2 + $0x118] sm:$0xff]  ;;  %1630 = vmatprep.subr.mxu0 %v4748_v62 }
 0x138   :  { %6389 = vst [vmem:[#allocation116_spill] sm:$0xff] %v4946_v20  ;;  %1919 = vmatprep.subr.mxu1 %v1918_v14  ;;  %v4957_v33 = vsub.f32 %v153_v30, %v4899_v11  ;;  %v6391_v55 = vand.u32 4294901760, %v4801_v34  ;;  %v1972_v41 = vand.u32 4294901760, %v4924_v15  ;;  %v4963_v53 = vand.u32 4294901760, %v149_v10  ;;  %v146_v14 = vld [vmem:[#allocation2 + $0x110] sm:$0xff]  ;;  %1632 = vmatpush2.msra.mxu0 %v4750_v2 }
 0x139   :  { %v4968_v4 = vsub.f32 %v4083_v26, %v4927_v9  ;;  %v1966_v30 = vand.u32 4294901760, %v4933_v12  ;;  %v4973_v49 = vsub.f32 %v150_v19, %v4935_v52  ;;  %v6392_v34 = vand.u32 4294901760, %v4857_v1  ;;  %v6393_v12 = vld [vmem:[#allocation17_spill] sm:$0xff]  ;;  %1634 = vmatprep.subr.mxu0 %v4789_v22  ;;  %2071 = vmatprep.mubr.f32.mxu1 %v4927_v9 }
 0x13a   :  { %1925 = vmatpush2.msra.mxu1 %v6391_v55  ;;  %v4981_v26 = vsub.f32 %v148_v46, %v4948_v38  ;;  %v4985_v60 = vand.u32 4294901760, %v6393_v12  ;;  %v4988_v19 = vsub.f32 %v151_v35, %v4946_v20  ;;  %v6395_v55 = vand.u32 4294901760, %v4912_v50  ;;  %1636 = vmatpush2.msra.mxu0 %v4775_v13  ;;  %v6428_v9 = vld [vmem:[#allocation33_spill] sm:$0xff] }
 0x13b   :  { %1931 = vmatprep.subr.mxu1 %v1930_v54  ;;  %v1983_v15 = vsub.f32 %v4857_v1, %v6392_v34  ;;  %v1978_v34 = vand.u32 4294901760, %v1977_v27  ;;  %v4994_v62 = vand.u32 4294901760, %v147_v56  ;;  %v144_v54 = vld [vmem:[#allocation2 + $0x100] sm:$0xff]  ;;  %v6396_v1 = vand.u32 4294901760, %v4885_v51  ;;  %1638 = vmatprep.subr.mxu0 %v4811_v47 }
 0x13c   :  { %1937 = vmatpush2.msra.mxu1 %v1936_v58  ;;  %6394 = vst [vmem:[#allocation17_spill] sm:$0xff] %v4985_v60  ;;  %v1989_v58 = vsub.f32 %v4912_v50, %v6395_v55  ;;  %v5001_v29 = vand.u32 4294901760, %v146_v14  ;;  %v6397_v46 = vand.u32 4294901760, %v4939_v5  ;;  %v5018_v27 = vand.u32 4294901760, %v144_v54  ;;  %1640 = vmatpush2.msra.mxu0 %v4813_v7 }
 0x13d   :  { %1943 = vmatprep.subr.mxu1 %v1942_v6  ;;  %v1995_v35 = vsub.f32 %v4885_v51, %v6396_v1  ;;  %v5005_v6 = vsub.f32 %v149_v10, %v4963_v53  ;;  %v1984_v55 = vand.u32 4294901760, %v1983_v15  ;;  %v6398_v1 = vand.u32 4294901760, %v4919_v36  ;;  %1642 = vmatprep.subr.mxu0 %v4852_v17 }
 0x13e   :  { %1949 = vmatpush2.msra.mxu1 %v1948_v43  ;;  %v2001_v22 = vsub.f32 %v4939_v5, %v6397_v46  ;;  %v5011_v43 = vand.u32 4294901760, %v145_v8  ;;  %v1990_v46 = vand.u32 4294901760, %v1989_v58  ;;  %v6399_v2 = vand.u32 4294901760, %v4957_v33  ;;  %1644 = vmatpush2.msra.mxu0 %v4838_v57 }
 0x13f   :  { %1955 = vmatprep.subr.mxu1 %v1954_v63  ;;  %v2007_v10 = vsub.f32 %v4919_v36, %v6398_v1  ;;  %v5022_v63 = vsub.f32 %v6393_v12, %v4985_v60  ;;  %v5031_v1 = vsub.f32 %v147_v56, %v4994_v62  ;;  %v1996_v12 = vand.u32 4294901760, %v1995_v35  ;;  %1646 = vmatprep.subr.mxu0 %v4887_v0 }
 0x140   :  { %1961 = vmatpush2.msra.mxu1 %v1960_v21  ;;  %v2013_v21 = vsub.f32 %v4957_v33, %v6399_v2  ;;  %v5035_v13 = vsub.f32 %v146_v14, %v5001_v29  ;;  %v6400_v15 = vand.u32 4294901760, %v4968_v4  ;;  %v2002_v2 = vand.u32 4294901760, %v2001_v22  ;;  %1648 = vmatpush2.msra.mxu0 %v4877_v44 }
 0x141   :  { %1967 = vmatprep.subr.mxu1 %v1966_v30  ;;  %v6401_v56 = vand.u32 4294901760, %v4944_v42  ;;  %v5047_v35 = vsub.f32 %v145_v8, %v5011_v43  ;;  %v2008_v14 = vand.u32 4294901760, %v2007_v10  ;;  %v6402_v22 = vand.u32 4294901760, %v4988_v19  ;;  %1650 = vmatprep.subr.mxu0 %v4899_v11 }
 0x142   :  { %1973 = vmatpush2.msra.mxu1 %v1972_v41  ;;  %v1672_v30 = vsub.f32 %v4968_v4, %v6400_v15  ;;  %v5051_v15 = vsub.f32 %v144_v54, %v5018_v27  ;;  %v6403_v8 = vand.u32 4294901760, %v4973_v49  ;;  %v6404_v10 = vand.u32 4294901760, %v5005_v6  ;;  %1652 = vmatpush2.msra.mxu0 %v4901_v45 }
 0x143   :  { %1979 = vmatprep.subr.mxu1 %v1978_v34  ;;  %v2019_v47 = vsub.f32 %v4944_v42, %v6401_v56  ;;  %v2025_v34 = vsub.f32 %v4988_v19, %v6402_v22  ;;  %v2014_v56 = vand.u32 4294901760, %v2013_v21  ;;  %v6405_v21 = vand.u32 4294901760, %v4981_v26  ;;  %1654 = vmatprep.subr.mxu0 %v4946_v20 }
 0x144   :  { %1985 = vmatpush2.msra.mxu1 %v1984_v55  ;;  %v2031_v41 = vsub.f32 %v4973_v49, %v6403_v8  ;;  %v1673_v54 = vand.u32 4294901760, %v1672_v30  ;;  %v2037_v58 = vsub.f32 %v5005_v6, %v6404_v10  ;;  %v5827_v22 = vand.u32 4294901760, %v5051_v15  ;;  %1656 = vmatpush2.msra.mxu0 %v4935_v52 }
 0x145   :  { %1991 = vmatprep.subr.mxu1 %v1990_v46  ;;  %v2020_v46 = vand.u32 4294901760, %v2019_v47  ;;  %v2043_v8 = vsub.f32 %v4981_v26, %v6405_v21  ;;  %v2026_v10 = vand.u32 4294901760, %v2025_v34  ;;  %1658 = vmatprep.subr.mxu0 %v4963_v53 }
 0x146   :  { %1997 = vmatpush2.msra.mxu1 %v1996_v12  ;;  %v6406_v12 = vand.u32 4294901760, %v5022_v63  ;;  %v2032_v47 = vand.u32 4294901760, %v2031_v41  ;;  %1674 = vmatprep.mubr.f32.mxu0 %v1673_v54  ;;  %v2038_v55 = vand.u32 4294901760, %v2037_v58  ;;  %v2067_v58 = vsub.f32 %v5051_v15, %v5827_v22  ;;  %v6426_v22 = vld [vmem:[#allocation18_spill] sm:$0xff] }
 0x147   :  { %2003 = vmatprep.subr.mxu1 %v2002_v2  ;;  %v6407_v2 = vand.u32 4294901760, %v5031_v1  ;;  %1660 = vmatpush2.msra.mxu0 %v4948_v38  ;;  %v2044_v34 = vand.u32 4294901760, %v2043_v8 }
 0x148   :  { %2009 = vmatpush2.msra.mxu1 %v2008_v14  ;;  %v1678_v30 = vsub.f32 %v5022_v63, %v6406_v12  ;;  %v6408_v14 = vand.u32 4294901760, %v5035_v13  ;;  %v6409_v12 = vand.u32 4294901760, %v5047_v35  ;;  %1662 = vmatprep.subr.mxu0 %v4994_v62 }
 0x149   :  { %2015 = vmatprep.subr.mxu1 %v2014_v56  ;;  %v2049_v21 = vsub.f32 %v5031_v1, %v6407_v2  ;;  %1664 = vmatpush2.msra.mxu0 %v5001_v29  ;;  %v6410_v2 = vld [vmem:[#allocation14_spill] sm:$0xff] }
 0x14a   :  { %v2055_v20 = vsub.f32 %v5035_v13, %v6408_v14  ;;  %2021 = vmatpush2.msra.mxu1 %v2020_v46  ;;  %v2061_v41 = vsub.f32 %v5047_v35, %v6409_v12  ;;  %v1679_v56 = vand.u32 4294901760, %v1678_v30  ;;  %1666 = vmatprep.subr.mxu0 %v5011_v43  ;;  %v2068_v30 = vand.u32 4294901760, %v2067_v58  ;;  %v6412_v14 = vld [vmem:[#allocation85_spill] sm:$0xff]  ;;  %v6418_v12 = vld [vmem:[#allocation12_spill] sm:$0xff] }
 0x14b   :  { %2027 = vmatprep.subr.mxu1 %v2026_v10  ;;  %v2050_v54 = vand.u32 4294901760, %v2049_v21  ;;  %1668 = vmatpush2.msra.mxu0 %v5018_v27  ;;  %v6411_v10 = vld [vmem:[#allocation23_spill] sm:$0xff]  ;;  %v6414_v21 = vld [vmem:[#allocation94_spill] sm:$0xff]  ;;  %v6421_v58 = vld [vmem:[#allocation101_spill] sm:$0xff] }
 0x14c   :  { %2033 = vmatpush2.msra.mxu1 %v2032_v47  ;;  %v2056_v46 = vand.u32 4294901760, %v2055_v20  ;;  %v2062_v8 = vand.u32 4294901760, %v2061_v41  ;;  %1680 = vmatmul.mubr.f32.vlgmr.msra.gmra.mxu0 %v1679_v56  ;;  %v6413_v47 = vld [vmem:[#allocation86_spill] sm:$0xff]  ;;  %v6415_v20 = vld [vmem:[#allocation93_spill] sm:$0xff]  ;;  %v6420_v56 = vld [vmem:[#allocation19_spill] sm:$0xff] }
 0x14d   :  { %2039 = vmatprep.subr.mxu1 %v2038_v55  ;;  %2081 = vmatprep.subr.mxu0 %v6410_v2  ;;  %v6416_v55 = vld [vmem:[#allocation92_spill] sm:$0xff]  ;;  %v6419_v41 = vld [vmem:[#allocation102_spill] sm:$0xff] }
 0x14e   :  { %2045 = vmatpush2.msra.mxu1 %v2044_v34  ;;  %2084 = vmatpush1.msra.mxu0 %v6411_v10  ;;  %v6417_v34 = vld [vmem:[#allocation99_spill] sm:$0xff] }
 0x14f   :  { %2051 = vmatprep.subr.mxu1 %v2050_v54  ;;  %2087 = vmatprep.subr.mxu0 %v6412_v14  ;;  %v6422_v54 = vld [vmem:[#allocation13_spill] sm:$0xff] }
 0x150   :  { %2057 = vmatpush2.msra.mxu1 %v2056_v46  ;;  %2090 = vmatpush1.msra.mxu0 %v6413_v47  ;;  %v6423_v46 = vld [vmem:[#allocation29_spill] sm:$0xff] }
 0x151   :  { %2063 = vmatprep.subr.mxu1 %v2062_v8  ;;  %2093 = vmatprep.subr.mxu0 %v6414_v21  ;;  %v6424_v8 = vld [vmem:[#allocation15_spill] sm:$0xff] }
 0x152   :  { %2069 = vmatpush2.msra.mxu1 %v2068_v30  ;;  %2096 = vmatpush1.msra.mxu0 %v6415_v20  ;;  %v6425_v30 = vld [vmem:[#allocation25_spill] sm:$0xff] }
 0x153   :  { %2099 = vmatprep.subr.mxu0 %v6416_v55  ;;  %2073 = vmatmul.mubr.f32.vlgmr.msra.gmra.mxu1 %v4985_v60  ;;  %v6427_v60 = vld [vmem:[#allocation27_spill] sm:$0xff] }
 0x154   :  { %2102 = vmatpush1.msra.mxu0 %v6417_v34  ;;  %2283 = vmatprep.subr.mxu1 %v6418_v12 }
 0x155   :  { %2105 = vmatprep.subr.mxu0 %v6419_v41  ;;  %2285 = vmatpush1.msra.mxu1 %v6420_v56  ;;  %v6429_v56 = vld [vmem:[#allocation39_spill] sm:$0xff] }
 0x156   :  { %2108 = vmatpush1.msra.mxu0 %v6421_v58  ;;  %2287 = vmatprep.subr.mxu1 %v6422_v54  ;;  %v6430_v58 = vld [vmem:[#allocation89_spill] sm:$0xff] }
 0x157   :  { %2111 = vmatprep.subr.mxu0 %v6423_v46  ;;  %2289 = vmatpush1.msra.mxu1 %v4142_v48  ;;  %v6431_v54 = vld [vmem:[#allocation37_spill] sm:$0xff] }
 0x158   :  { %2114 = vmatpush1.msra.mxu0 %v6424_v8  ;;  %2291 = vmatprep.subr.mxu1 %v6425_v30  ;;  %v6432_v48 = vld [vmem:[#allocation41_spill] sm:$0xff]  ;;  %v6434_v30 = vld [vmem:[#allocation26_spill] sm:$0xff] }
 0x159   :  { %2117 = vmatprep.subr.mxu0 %v6426_v22  ;;  %2293 = vmatpush1.msra.mxu1 %v6427_v60  ;;  %v6433_v8 = vld [vmem:[#allocation97_spill] sm:$0xff]  ;;  %v6435_v22 = vld [vmem:[#allocation90_spill] sm:$0xff] }
 0x15a   :  { %2120 = vmatpush1.msra.mxu0 %v6428_v9  ;;  %2295 = vmatprep.subr.mxu1 %v4175_v16  ;;  %v6436_v60 = vld [vmem:[#allocation30_spill] sm:$0xff]  ;;  %v6437_v16 = vld [vmem:[#allocation45_spill] sm:$0xff] }
 0x15b   :  { %2123 = vmatprep.subr.mxu0 %v6429_v56  ;;  %2297 = vmatpush1.msra.mxu1 %v6430_v58  ;;  %v6438_v56 = vld [vmem:[#allocation103_spill] sm:$0xff]  ;;  %v6439_v58 = vld [vmem:[#allocation34_spill] sm:$0xff] }
 0x15c   :  { %2126 = vmatpush1.msra.mxu0 %v6431_v54  ;;  %2299 = vmatprep.subr.mxu1 %v4199_v25  ;;  %v6440_v25 = vld [vmem:[#allocation49_spill] sm:$0xff] }
 0x15d   :  { %2129 = vmatprep.subr.mxu0 %v6432_v48  ;;  %2301 = vmatpush1.msra.mxu1 %v6433_v8  ;;  %v6441_v48 = vld [vmem:[#allocation31_spill] sm:$0xff] }
 0x15e   :  { %2132 = vmatpush1.msra.mxu0 %v6434_v30  ;;  %2303 = vmatprep.subr.mxu1 %v6435_v22  ;;  %v6442_v8 = vld [vmem:[#allocation55_spill] sm:$0xff]  ;;  %v6443_v30 = vld [vmem:[#allocation16_spill] sm:$0xff]  ;;  %v6444_v22 = vld [vmem:[#allocation53_spill] sm:$0xff] }
 0x15f   :  { %2135 = vmatprep.subr.mxu0 %v6436_v60  ;;  %2305 = vmatpush1.msra.mxu1 %v4226_v39  ;;  %v6445_v39 = vld [vmem:[#allocation42_spill] sm:$0xff] }
 0x160   :  { %2138 = vmatpush1.msra.mxu0 %v6437_v16  ;;  %2307 = vmatprep.subr.mxu1 %v6438_v56  ;;  %v6446_v16 = vld [vmem:[#allocation20_spill] sm:$0xff]  ;;  %v6447_v56 = vld [vmem:[#allocation57_spill] sm:$0xff] }
 0x161   :  { %2141 = vmatprep.subr.mxu0 %v6439_v58  ;;  %2309 = vmatpush1.msra.mxu1 %v4251_v3  ;;  %v6448_v58 = vld [vmem:[#allocation24_spill] sm:$0xff] }
 0x162   :  { %2144 = vmatpush1.msra.mxu0 %v6440_v25  ;;  %2311 = vmatprep.subr.mxu1 %v6441_v48  ;;  %v6449_v3 = vld [vmem:[#allocation48_spill] sm:$0xff]  ;;  %v6450_v48 = vld [vmem:[#allocation61_spill] sm:$0xff] }
 0x163   :  { %2147 = vmatprep.subr.mxu0 %v6442_v8  ;;  %2313 = vmatpush1.msra.mxu1 %v6443_v30  ;;  %v6451_v8 = vld [vmem:[#allocation43_spill] sm:$0xff]  ;;  %v6452_v30 = vld [vmem:[#allocation50_spill] sm:$0xff] }
 0x164   :  { %2150 = vmatpush1.msra.mxu0 %v6444_v22  ;;  %2315 = vmatprep.subr.mxu1 %v4315_v40  ;;  %v6453_v40 = vld [vmem:[#allocation65_spill] sm:$0xff] }
 0x165   :  { %2153 = vmatprep.subr.mxu0 %v6445_v39  ;;  %2317 = vmatpush1.msra.mxu1 %v6446_v16  ;;  %v6454_v39 = vld [vmem:[#allocation47_spill] sm:$0xff]  ;;  %v6455_v16 = vld [vmem:[#allocation56_spill] sm:$0xff] }
 0x166   :  { %2156 = vmatpush1.msra.mxu0 %v6447_v56  ;;  %2319 = vmatprep.subr.mxu1 %v6448_v58  ;;  %v6456_v56 = vld [vmem:[#allocation32_spill] sm:$0xff]  ;;  %v6457_v58 = vld [vmem:[#allocation69_spill] sm:$0xff] }
 0x167   :  { %2159 = vmatprep.subr.mxu0 %v6449_v3  ;;  %2321 = vmatpush1.msra.mxu1 %v4337_v28  ;;  %v6458_v28 = vld [vmem:[#allocation58_spill] sm:$0xff] }
 0x168   :  { %2162 = vmatpush1.msra.mxu0 %v6450_v48  ;;  %2323 = vmatprep.subr.mxu1 %v6451_v8  ;;  %v6459_v48 = vld [vmem:[#allocation36_spill] sm:$0xff]  ;;  %v6460_v8 = vld [vmem:[#allocation73_spill] sm:$0xff] }
 0x169   :  { %2165 = vmatprep.subr.mxu0 %v6452_v30  ;;  %2325 = vmatpush1.msra.mxu1 %v4380_v31  ;;  %v6461_v31 = vld [vmem:[#allocation64_spill] sm:$0xff] }
 0x16a   :  { %2168 = vmatpush1.msra.mxu0 %v6453_v40  ;;  %2327 = vmatprep.subr.mxu1 %v6454_v39  ;;  %v6462_v40 = vld [vmem:[#allocation38_spill] sm:$0xff]  ;;  %v6463_v39 = vld [vmem:[#allocation77_spill] sm:$0xff] }
 0x16b   :  { %2171 = vmatprep.subr.mxu0 %v6455_v16  ;;  %2329 = vmatpush1.msra.mxu1 %v6456_v56  ;;  %v6464_v16 = vld [vmem:[#allocation59_spill] sm:$0xff]  ;;  %v6465_v56 = vld [vmem:[#allocation66_spill] sm:$0xff] }
 0x16c   :  { %2174 = vmatpush1.msra.mxu0 %v6457_v58  ;;  %2331 = vmatprep.subr.mxu1 %v4441_v59  ;;  %v6466_v59 = vld [vmem:[#allocation81_spill] sm:$0xff] }
 0x16d   :  { %2177 = vmatprep.subr.mxu0 %v6458_v28  ;;  %2333 = vmatpush1.msra.mxu1 %v6459_v48  ;;  %v6467_v28 = vld [vmem:[#allocation63_spill] sm:$0xff]  ;;  %v6468_v48 = vld [vmem:[#allocation46_spill] sm:$0xff] }
 0x16e   :  { %2180 = vmatpush2.msra.mxu0 %v6460_v8  ;;  %2335 = vmatprep.subr.mxu1 %v4473_v37  ;;  %v6469_v37 = vld [vmem:[#allocation70_spill] sm:$0xff] }
 0x16f   :  { %2183 = vmatprep.subr.mxu0 %v6461_v31  ;;  %2337 = vmatpush1.msra.mxu1 %v6462_v40  ;;  %v6470_v31 = vld [vmem:[#allocation67_spill] sm:$0xff]  ;;  %v6471_v40 = vld [vmem:[#allocation78_spill] sm:$0xff] }
 0x170   :  { %2186 = vmatpush2.msra.mxu0 %v6463_v39  ;;  %2339 = vmatprep.subr.mxu1 %v6464_v16  ;;  %v6472_v39 = vld [vmem:[#allocation52_spill] sm:$0xff]  ;;  %v6473_v16 = vld [vmem:[#allocation91_spill] sm:$0xff] }
 0x171   :  { %2189 = vmatprep.subr.mxu0 %v6465_v56  ;;  %2341 = vmatpush1.msra.mxu1 %v4503_v24  ;;  %v6474_v24 = vld [vmem:[#allocation95_spill] sm:$0xff] }
 0x172   :  { %2192 = vmatpush2.msra.mxu0 %v6466_v59  ;;  %2343 = vmatprep.subr.mxu1 %v6467_v28  ;;  %v6475_v59 = vld [vmem:[#allocation54_spill] sm:$0xff]  ;;  %v6476_v28 = vld [vmem:[#allocation84_spill] sm:$0xff] }
 0x173   :  { %2195 = vmatprep.subr.mxu0 %v4727_v23  ;;  %2345 = vmatpush1.msra.mxu1 %v6468_v48  ;;  %v6477_v23 = vld [vmem:[#allocation75_spill] sm:$0xff]  ;;  %v6478_v48 = vld [vmem:[#allocation105_spill] sm:$0xff] }
 0x174   :  { %2198 = vmatpush2.msra.mxu0 %v6469_v37  ;;  %2347 = vmatprep.subr.mxu1 %v6470_v31  ;;  %v6479_v31 = vld [vmem:[#allocation96_spill] sm:$0xff] }
 0x175   :  { %2201 = vmatprep.subr.mxu0 %v6471_v40  ;;  %2349 = vmatpush2.msra.mxu1 %v6472_v39  ;;  %v6480_v40 = vld [vmem:[#allocation79_spill] sm:$0xff]  ;;  %v6481_v39 = vld [vmem:[#allocation62_spill] sm:$0xff] }
 0x176   :  { %2204 = vmatpush2.msra.mxu0 %v6473_v16  ;;  %2351 = vmatprep.subr.mxu1 %v4596_v61  ;;  %v6482_v61 = vld [vmem:[#allocation107_spill] sm:$0xff] }
 0x177   :  { %2207 = vmatprep.subr.mxu0 %v6474_v24  ;;  %2353 = vmatpush2.msra.mxu1 %v6475_v59  ;;  %v6483_v24 = vld [vmem:[#allocation83_spill] sm:$0xff]  ;;  %v6484_v59 = vld [vmem:[#allocation110_spill] sm:$0xff] }
 0x178   :  { %2210 = vmatpush2.msra.mxu0 %v6476_v28  ;;  %2355 = vmatprep.subr.mxu1 %v6477_v23  ;;  %v6485_v28 = vld [vmem:[#allocation68_spill] sm:$0xff]  ;;  %v6486_v23 = vld [vmem:[#allocation109_spill] sm:$0xff] }
 0x179   :  { %2213 = vmatprep.subr.mxu0 %v6478_v48  ;;  %2357 = vmatpush2.msra.mxu1 %v4624_v32  ;;  %v6487_v48 = vld [vmem:[#allocation74_spill] sm:$0xff]  ;;  %v6488_v32 = vld [vmem:[#allocation72_spill] sm:$0xff] }
 0x17a   :  { %2216 = vmatpush2.msra.mxu0 %v6479_v31  ;;  %2359 = vmatprep.subr.mxu1 %v6480_v40  ;;  %v6489_v40 = vld [vmem:[#allocation80_spill] sm:$0xff] }
 0x17b   :  { %2219 = vmatprep.subr.mxu0 %v4841_v18  ;;  %2361 = vmatpush2.msra.mxu1 %v6481_v39  ;;  %v6490_v39 = vld [vmem:[#allocation82_spill] sm:$0xff] }
 0x17c   :  { %2222 = vmatpush2.msra.mxu0 %v6482_v61  ;;  %2363 = vmatprep.subr.mxu1 %v6483_v24  ;;  %v6491_v24 = vld [vmem:[#allocation104_spill] sm:$0xff] }
 0x17d   :  { %2225 = vmatprep.subr.mxu0 %v6484_v59  ;;  %2365 = vmatpush2.msra.mxu1 %v6485_v28  ;;  %v6492_v28 = vld [vmem:[#allocation106_spill] sm:$0xff] }
 0x17e   :  { %2228 = vmatpush2.msra.mxu0 %v6486_v23  ;;  %2367 = vmatprep.subr.mxu1 %v6487_v48  ;;  %v6493_v48 = vld [vmem:[#allocation98_spill] sm:$0xff] }
 0x17f   :  { %2231 = vmatprep.subr.mxu0 %v4912_v50  ;;  %2369 = vmatpush2.msra.mxu1 %v6488_v32 }
 0x180   :  { %2234 = vmatpush2.msra.mxu0 %v4885_v51  ;;  %2371 = vmatprep.subr.mxu1 %v6489_v40 }
 0x181   :  { %2237 = vmatprep.subr.mxu0 %v4939_v5  ;;  %2373 = vmatpush2.msra.mxu1 %v6490_v39 }
 0x182   :  { %2240 = vmatpush2.msra.mxu0 %v4919_v36  ;;  %2375 = vmatprep.subr.mxu1 %v6491_v24 }
 0x183   :  { %2243 = vmatprep.subr.mxu0 %v4957_v33  ;;  %2377 = vmatpush2.msra.mxu1 %v6492_v28 }
 0x184   :  { %2246 = vmatpush2.msra.mxu0 %v4944_v42  ;;  %2379 = vmatprep.subr.mxu1 %v6493_v48 }
 0x185   :  { %2249 = vmatprep.subr.mxu0 %v4988_v19  ;;  %2381 = vmatpush2.msra.mxu1 %v4813_v7 }
 0x186   :  { %2252 = vmatpush2.msra.mxu0 %v4973_v49  ;;  %2383 = vmatprep.subr.mxu1 %v4852_v17 }
 0x187   :  { %2255 = vmatprep.subr.mxu0 %v5005_v6  ;;  %2385 = vmatpush2.msra.mxu1 %v4838_v57  ;;  %v6494_v57 = vld [vmem:[#allocation116_spill] sm:$0xff] }
 0x188   :  { %2258 = vmatpush2.msra.mxu0 %v4981_v26  ;;  %2387 = vmatprep.subr.mxu1 %v4887_v0  ;;  %v6495_v0 = vand.u32 4294901760, %v6410_v2  ;;  %v6499_v2 = vand.u32 4294901760, %v6414_v21 }
 0x189   :  { %2261 = vmatprep.subr.mxu0 %v5031_v1  ;;  %2389 = vmatpush2.msra.mxu1 %v4877_v44  ;;  %v6496_v44 = vand.u32 4294901760, %v6411_v10  ;;  %v6504_v10 = vand.u32 4294901760, %v5022_v63 }
 0x18a   :  { %2264 = vmatpush2.msra.mxu0 %v5035_v13  ;;  %2391 = vmatprep.subr.mxu1 %v4899_v11  ;;  %v6497_v11 = vand.u32 4294901760, %v6412_v14  ;;  %v6505_v14 = vand.u32 4294901760, %v6419_v41 }
 0x18b   :  { %2267 = vmatprep.subr.mxu0 %v5047_v35  ;;  %2273 = vmatprep.mubr.f32.mxu0 %v4968_v4 }
 0x18c   :  { %2270 = vmatpush2.msra.mxu0 %v5051_v15  ;;  %2393 = vmatpush2.msra.mxu1 %v4901_v45  ;;  %v6498_v45 = vand.u32 4294901760, %v6413_v47  ;;  %v6506_v47 = vld [vmem:[#allocation101_spill] sm:$0xff] }
 0x18d   :  { %2276 = vmatmul.mubr.f32.vlgmr.msra.gmra.mxu0 %v5022_v63  ;;  %2395 = vmatprep.subr.mxu1 %v6494_v57  ;;  %v6507_v21 = vand.u32 4294901760, %v6506_v47  ;;  %v6513_v63 = vld [vmem:[#allocation21_spill] sm:$0xff] }
 0x18e   :  { %2426 = vmatprep.subr.mxu0 %v6495_v0  ;;  %2397 = vmatpush2.msra.mxu1 %v4935_v52  ;;  %v6500_v0 = vand.u32 4294901760, %v6415_v20  ;;  %v6508_v20 = vld [vmem:[#allocation19_spill] sm:$0xff]  ;;  %v6523_v47 = vld [vmem:[#allocation89_spill] sm:$0xff] }
 0x18f   :  { %2430 = vmatpush1.msra.mxu0 %v6496_v44  ;;  %2399 = vmatprep.subr.mxu1 %v4963_v53  ;;  %v6501_v44 = vand.u32 4294901760, %v6416_v55  ;;  %v6509_v55 = vand.u32 4294901760, %v6423_v46 }
 0x190   :  { %2434 = vmatprep.subr.mxu0 %v6497_v11  ;;  %2401 = vmatpush2.msra.mxu1 %v4948_v38  ;;  %v6502_v11 = vand.u32 4294901760, %v4968_v4  ;;  %v6510_v4 = vld [vmem:[#allocation13_spill] sm:$0xff] }
 0x191   :  { %2438 = vmatpush1.msra.mxu0 %v6498_v45  ;;  %2403 = vmatprep.subr.mxu1 %v4994_v62  ;;  %v6503_v45 = vand.u32 4294901760, %v6417_v34  ;;  %v6511_v34 = vld [vmem:[#allocation15_spill] sm:$0xff] }
 0x192   :  { %2442 = vmatprep.subr.mxu0 %v6499_v2  ;;  %2405 = vmatpush2.msra.mxu1 %v5001_v29  ;;  %v6512_v2 = vand.u32 4294901760, %v6511_v34  ;;  %v6529_v34 = vld [vmem:[#allocation97_spill] sm:$0xff] }
 0x193   :  { %2446 = vmatpush1.msra.mxu0 %v6500_v0  ;;  %2407 = vmatprep.subr.mxu1 %v5011_v43  ;;  %v6514_v0 = vld [vmem:[#allocation18_spill] sm:$0xff] }
 0x194   :  { %2450 = vmatprep.subr.mxu0 %v6501_v44  ;;  %2409 = vmatpush2.msra.mxu1 %v5018_v27  ;;  %v6515_v41 = vand.u32 4294901760, %v6514_v0  ;;  %v6516_v44 = vld [vmem:[#allocation25_spill] sm:$0xff] }
 0x195   :  { %2413 = vmatprep.mubr.f32.mxu1 %v6502_v11  ;;  %2454 = vmatpush1.msra.mxu0 %v6503_v45  ;;  %v6518_v11 = vld [vmem:[#allocation27_spill] sm:$0xff]  ;;  %v6532_v0 = vld [vmem:[#allocation45_spill] sm:$0xff] }
 0x196   :  { %2417 = vmatmul.mubr.f32.vlgmr.msra.gmra.mxu1 %v6504_v10  ;;  %2458 = vmatprep.subr.mxu0 %v6505_v14  ;;  %v6519_v45 = vld [vmem:[#allocation39_spill] sm:$0xff]  ;;  %v6522_v14 = vand.u32 4294901760, %v6431_v54  ;;  %v6533_v54 = vand.u32 4294901760, %v6532_v0  ;;  %v6553_v0 = vld [vmem:[#allocation61_spill] sm:$0xff] }
 0x197   :  { %2689 = vmatprep.subr.mxu1 %v6418_v12  ;;  %2462 = vmatpush1.msra.mxu0 %v6507_v21  ;;  %v6517_v12 = vand.u32 4294901760, %v6428_v9  ;;  %v6520_v46 = vand.u32 4294901760, %v6519_v45  ;;  %v6521_v10 = vld [vmem:[#allocation87_spill] sm:$0xff]  ;;  %v6524_v21 = vld [vmem:[#allocation41_spill] sm:$0xff]  ;;  %v6538_v45 = vand.u32 4294901760, %v6440_v25 }
 0x198   :  { %2691 = vmatpush1.msra.mxu1 %v6508_v20  ;;  %2466 = vmatprep.subr.mxu0 %v6509_v55  ;;  %v6525_v20 = vand.u32 4294901760, %v6524_v21  ;;  %v6526_v55 = vld [vmem:[#allocation88_spill] sm:$0xff] }
 0x199   :  { %2693 = vmatprep.subr.mxu1 %v6510_v4  ;;  %2470 = vmatpush1.msra.mxu0 %v6512_v2  ;;  %v6527_v4 = vld [vmem:[#allocation26_spill] sm:$0xff]  ;;  %v6530_v2 = vand.u32 4294901760, %v6436_v60  ;;  %v6544_v21 = vld [vmem:[#allocation16_spill] sm:$0xff] }
 0x19a   :  { %2695 = vmatpush1.msra.mxu1 %v6513_v63  ;;  %2474 = vmatprep.subr.mxu0 %v6515_v41  ;;  %v6528_v9 = vand.u32 4294901760, %v6527_v4  ;;  %v6531_v63 = vld [vmem:[#allocation90_spill] sm:$0xff]  ;;  %v6534_v41 = vld [vmem:[#allocation11_spill] sm:$0xff] }
 0x19b   :  { %2697 = vmatprep.subr.mxu1 %v6516_v44  ;;  %2478 = vmatpush1.msra.mxu0 %v6517_v12  ;;  %v6535_v44 = vld [vmem:[#allocation34_spill] sm:$0xff]  ;;  %v6547_v4 = vld [vmem:[#allocation35_spill] sm:$0xff] }
 0x19c   :  { %2699 = vmatpush1.msra.mxu1 %v6518_v11  ;;  %2482 = vmatprep.subr.mxu0 %v6520_v46  ;;  %v6536_v12 = vand.u32 4294901760, %v6535_v44  ;;  %v6537_v11 = vld [vmem:[#allocation103_spill] sm:$0xff]  ;;  %v6539_v46 = vld [vmem:[#allocation100_spill] sm:$0xff] }
 0x19d   :  { %2701 = vmatprep.subr.mxu1 %v6521_v10  ;;  %2486 = vmatpush1.msra.mxu0 %v6522_v14  ;;  %v6540_v10 = vld [vmem:[#allocation55_spill] sm:$0xff] }
 0x19e   :  { %2703 = vmatpush1.msra.mxu1 %v6523_v47  ;;  %2490 = vmatprep.subr.mxu0 %v6525_v20  ;;  %v6541_v60 = vand.u32 4294901760, %v6540_v10  ;;  %v6542_v14 = vld [vmem:[#allocation31_spill] sm:$0xff]  ;;  %v6543_v47 = vand.u32 4294901760, %v6444_v22  ;;  %v6545_v20 = vld [vmem:[#allocation42_spill] sm:$0xff]  ;;  %v6554_v22 = vand.u32 4294901760, %v6553_v0 }
 0x19f   :  { %2705 = vmatprep.subr.mxu1 %v6526_v55  ;;  %2494 = vmatpush1.msra.mxu0 %v6528_v9  ;;  %v6546_v55 = vand.u32 4294901760, %v6545_v20  ;;  %v6548_v9 = vld [vmem:[#allocation57_spill] sm:$0xff]  ;;  %v6557_v44 = vld [vmem:[#allocation43_spill] sm:$0xff]  ;;  %v6569_v20 = vand.u32 4294901760, %v6460_v8 }
 0x1a0   :  { %2707 = vmatpush1.msra.mxu1 %v6529_v34  ;;  %2498 = vmatprep.subr.mxu0 %v6530_v2  ;;  %v6549_v25 = vand.u32 4294901760, %v6548_v9  ;;  %v6550_v34 = vld [vmem:[#allocation20_spill] sm:$0xff]  ;;  %v6551_v2 = vand.u32 4294901760, %v6449_v3  ;;  %v6563_v10 = vld [vmem:[#allocation47_spill] sm:$0xff] }
 0x1a1   :  { %2709 = vmatprep.subr.mxu1 %v6531_v63  ;;  %2502 = vmatpush1.msra.mxu0 %v6533_v54  ;;  %v6552_v63 = vld [vmem:[#allocation24_spill] sm:$0xff]  ;;  %v6555_v54 = vld [vmem:[#allocation22_spill] sm:$0xff]  ;;  %v6578_v0 = vld [vmem:[#allocation59_spill] sm:$0xff] }
 0x1a2   :  { %2711 = vmatpush1.msra.mxu1 %v6534_v41  ;;  %2506 = vmatprep.subr.mxu0 %v6536_v12  ;;  %v6556_v41 = vand.u32 4294901760, %v6452_v30  ;;  %v6558_v12 = vld [vmem:[#allocation65_spill] sm:$0xff] }
 0x1a3   :  { %2713 = vmatprep.subr.mxu1 %v6537_v11  ;;  %2510 = vmatpush1.msra.mxu0 %v6538_v45  ;;  %v6559_v11 = vand.u32 4294901760, %v6558_v12  ;;  %v6560_v45 = vld [vmem:[#allocation28_spill] sm:$0xff]  ;;  %v6584_v12 = vld [vmem:[#allocation63_spill] sm:$0xff] }
 0x1a4   :  { %2715 = vmatpush1.msra.mxu1 %v6539_v46  ;;  %2514 = vmatprep.subr.mxu0 %v6541_v60  ;;  %v6561_v46 = vld [vmem:[#allocation56_spill] sm:$0xff]  ;;  %v6564_v60 = vand.u32 4294901760, %v6457_v58 }
 0x1a5   :  { %2717 = vmatprep.subr.mxu1 %v6542_v14  ;;  %2518 = vmatpush1.msra.mxu0 %v6543_v47  ;;  %v6562_v3 = vand.u32 4294901760, %v6561_v46  ;;  %v6565_v14 = vld [vmem:[#allocation32_spill] sm:$0xff]  ;;  %v6566_v47 = vld [vmem:[#allocation58_spill] sm:$0xff] }
 0x1a6   :  { %2719 = vmatpush1.msra.mxu1 %v6544_v21  ;;  %2522 = vmatprep.subr.mxu0 %v6546_v55  ;;  %v6567_v30 = vand.u32 4294901760, %v6566_v47  ;;  %v6568_v21 = vld [vmem:[#allocation51_spill] sm:$0xff]  ;;  %v6570_v55 = vld [vmem:[#allocation36_spill] sm:$0xff]  ;;  %v6587_v46 = vld [vmem:[#allocation78_spill] sm:$0xff] }
 0x1a7   :  { %2721 = vmatprep.subr.mxu1 %v6547_v4  ;;  %2526 = vmatpush1.msra.mxu0 %v6549_v25  ;;  %v6571_v4 = vld [vmem:[#allocation64_spill] sm:$0xff] }
 0x1a8   :  { %2723 = vmatpush1.msra.mxu1 %v6550_v34  ;;  %2530 = vmatprep.subr.mxu0 %v6551_v2  ;;  %v6572_v9 = vand.u32 4294901760, %v6571_v4  ;;  %v6573_v25 = vld [vmem:[#allocation40_spill] sm:$0xff]  ;;  %v6574_v34 = vld [vmem:[#allocation77_spill] sm:$0xff]  ;;  %v6576_v2 = vld [vmem:[#allocation38_spill] sm:$0xff] }
 0x1a9   :  { %2725 = vmatprep.subr.mxu1 %v6552_v63  ;;  %2534 = vmatpush1.msra.mxu0 %v6554_v22  ;;  %v6575_v58 = vand.u32 4294901760, %v6574_v34  ;;  %v6577_v63 = vand.u32 4294901760, %v6465_v56  ;;  %v6579_v22 = vld [vmem:[#allocation81_spill] sm:$0xff]  ;;  %v6588_v56 = vand.u32 4294901760, %v6587_v46  ;;  %v6603_v34 = vand.u32 4294901760, %v4841_v18 }
 0x1aa   :  { %2727 = vmatpush1.msra.mxu1 %v6555_v54  ;;  %2538 = vmatprep.subr.mxu0 %v6556_v41  ;;  %v6580_v8 = vand.u32 4294901760, %v6579_v22  ;;  %v6581_v54 = vld [vmem:[#allocation44_spill] sm:$0xff]  ;;  %v6608_v22 = vld [vmem:[#allocation83_spill] sm:$0xff]  ;;  %v6611_v18 = vand.u32 4294901760, %v4912_v50  ;;  %v6616_v50 = vand.u32 4294901760, %v4957_v33 }
 0x1ab   :  { %2729 = vmatprep.subr.mxu1 %v6557_v44  ;;  %2542 = vmatpush1.msra.mxu0 %v6559_v11  ;;  %v6582_v41 = vld [vmem:[#allocation76_spill] sm:$0xff]  ;;  %v6585_v11 = vand.u32 4294901760, %v6469_v37  ;;  %v6630_v33 = vld [vmem:[#allocation115_spill] sm:$0xff] }
 0x1ac   :  { %2731 = vmatpush1.msra.mxu1 %v6560_v45  ;;  %2546 = vmatprep.subr.mxu0 %v6562_v3  ;;  %v6583_v44 = vand.u32 4294901760, %v6582_v41  ;;  %v6586_v45 = vld [vmem:[#allocation46_spill] sm:$0xff]  ;;  %v6589_v3 = vld [vmem:[#allocation67_spill] sm:$0xff] }
 0x1ad   :  { %2733 = vmatprep.subr.mxu1 %v6563_v10  ;;  %2550 = vmatpush1.msra.mxu0 %v6564_v60  ;;  %v6590_v10 = vand.u32 4294901760, %v6473_v16  ;;  %v6591_v60 = vld [vmem:[#allocation52_spill] sm:$0xff]  ;;  %v6601_v16 = vand.u32 4294901760, %v6479_v31  ;;  %v6609_v31 = vand.u32 4294901760, %v6486_v23  ;;  %v6615_v23 = vand.u32 4294901760, %v4919_v36 }
 0x1ae   :  { %2735 = vmatpush1.msra.mxu1 %v6565_v14  ;;  %2554 = vmatprep.subr.mxu0 %v6567_v30  ;;  %v6592_v14 = vld [vmem:[#allocation95_spill] sm:$0xff]  ;;  %v6624_v36 = vld [vmem:[#allocation112_spill] sm:$0xff] }
 0x1af   :  { %2737 = vmatprep.subr.mxu1 %v6568_v21  ;;  %2558 = vmatpush2.msra.mxu0 %v6569_v20  ;;  %v6593_v47 = vand.u32 4294901760, %v6592_v14  ;;  %v6594_v30 = vld [vmem:[#allocation71_spill] sm:$0xff]  ;;  %v6595_v21 = vld [vmem:[#allocation84_spill] sm:$0xff]  ;;  %v6597_v20 = vld [vmem:[#allocation54_spill] sm:$0xff] }
 0x1b0   :  { %2739 = vmatpush1.msra.mxu1 %v6570_v55  ;;  %2562 = vmatprep.subr.mxu0 %v6572_v9  ;;  %v6596_v37 = vand.u32 4294901760, %v6595_v21  ;;  %v6598_v55 = vld [vmem:[#allocation105_spill] sm:$0xff]  ;;  %v6600_v9 = vld [vmem:[#allocation75_spill] sm:$0xff] }
 0x1b1   :  { %2741 = vmatprep.subr.mxu1 %v6573_v25  ;;  %2566 = vmatpush2.msra.mxu0 %v6575_v58  ;;  %v6599_v4 = vand.u32 4294901760, %v6598_v55  ;;  %v6602_v25 = vld [vmem:[#allocation60_spill] sm:$0xff]  ;;  %v6604_v58 = vld [vmem:[#allocation79_spill] sm:$0xff] }
 0x1b2   :  { %2743 = vmatpush1.msra.mxu1 %v6576_v2  ;;  %2570 = vmatprep.subr.mxu0 %v6577_v63  ;;  %v6605_v2 = vand.u32 4294901760, %v6482_v61  ;;  %v6606_v63 = vld [vmem:[#allocation62_spill] sm:$0xff]  ;;  %v6613_v61 = vand.u32 4294901760, %v4885_v51  ;;  %v6617_v51 = vand.u32 4294901760, %v4944_v42  ;;  %v6626_v42 = vld [vmem:[#allocation111_spill] sm:$0xff] }
 0x1b3   :  { %2745 = vmatprep.subr.mxu1 %v6578_v0  ;;  %2574 = vmatpush2.msra.mxu0 %v6580_v8  ;;  %v6607_v0 = vand.u32 4294901760, %v6484_v59  ;;  %v6610_v8 = vld [vmem:[#allocation68_spill] sm:$0xff]  ;;  %v6614_v59 = vand.u32 4294901760, %v4939_v5 }
 0x1b4   :  { %2747 = vmatpush1.msra.mxu1 %v6581_v54  ;;  %2578 = vmatprep.subr.mxu0 %v6583_v44  ;;  %v6612_v54 = vld [vmem:[#allocation74_spill] sm:$0xff]  ;;  %v6622_v5 = vld [vmem:[#allocation108_spill] sm:$0xff] }
 0x1b5   :  { %2749 = vmatprep.subr.mxu1 %v6584_v12  ;;  %2582 = vmatpush2.msra.mxu0 %v6585_v11 }
 0x1b6   :  { %2751 = vmatpush1.msra.mxu1 %v6586_v45  ;;  %2586 = vmatprep.subr.mxu0 %v6588_v56 }
 0x1b7   :  { %2753 = vmatprep.subr.mxu1 %v6589_v3  ;;  %2590 = vmatpush2.msra.mxu0 %v6590_v10 }
 0x1b8   :  { %2755 = vmatpush2.msra.mxu1 %v6591_v60  ;;  %2594 = vmatprep.subr.mxu0 %v6593_v47 }
 0x1b9   :  { %2757 = vmatprep.subr.mxu1 %v6594_v30  ;;  %2598 = vmatpush2.msra.mxu0 %v6596_v37 }
 0x1ba   :  { %2759 = vmatpush2.msra.mxu1 %v6597_v20  ;;  %2602 = vmatprep.subr.mxu0 %v6599_v4 }
 0x1bb   :  { %2761 = vmatprep.subr.mxu1 %v6600_v9  ;;  %2606 = vmatpush2.msra.mxu0 %v6601_v16 }
 0x1bc   :  { %2763 = vmatpush2.msra.mxu1 %v6602_v25  ;;  %2610 = vmatprep.subr.mxu0 %v6603_v34 }
 0x1bd   :  { %2765 = vmatprep.subr.mxu1 %v6604_v58  ;;  %2614 = vmatpush2.msra.mxu0 %v6605_v2 }
 0x1be   :  { %2767 = vmatpush2.msra.mxu1 %v6606_v63  ;;  %2618 = vmatprep.subr.mxu0 %v6607_v0 }
 0x1bf   :  { %2769 = vmatprep.subr.mxu1 %v6608_v22  ;;  %2622 = vmatpush2.msra.mxu0 %v6609_v31 }
 0x1c0   :  { %2771 = vmatpush2.msra.mxu1 %v6610_v8  ;;  %2626 = vmatprep.subr.mxu0 %v6611_v18 }
 0x1c1   :  { %2773 = vmatprep.subr.mxu1 %v6612_v54  ;;  %2630 = vmatpush2.msra.mxu0 %v6613_v61 }
 0x1c2   :  { %2775 = vmatpush2.msra.mxu1 %v6488_v32  ;;  %2634 = vmatprep.subr.mxu0 %v6614_v59  ;;  %v6618_v32 = vand.u32 4294901760, %v4988_v19  ;;  %v6632_v19 = vld [vmem:[#allocation17_spill] sm:$0xff] }
 0x1c3   :  { %2777 = vmatprep.subr.mxu1 %v6489_v40  ;;  %2638 = vmatpush2.msra.mxu0 %v6615_v23  ;;  %v6619_v40 = vand.u32 4294901760, %v4973_v49  ;;  %v6628_v49 = vld [vmem:[#allocation113_spill] sm:$0xff] }
 0x1c4   :  { %2779 = vmatpush2.msra.mxu1 %v6490_v39  ;;  %2642 = vmatprep.subr.mxu0 %v6616_v50  ;;  %v6620_v39 = vand.u32 4294901760, %v5005_v6  ;;  %v782_v6 = vpop.f32.mrf.mxu1 }
 0x1c5   :  { %2781 = vmatprep.subr.mxu1 %v6491_v24  ;;  %2646 = vmatpush2.msra.mxu0 %v6617_v51  ;;  %v6621_v24 = vand.u32 4294901760, %v4981_v26  ;;  %v6631_v26 = vld [vmem:[#allocation114_spill] sm:$0xff] }
 0x1c6   :  { %2783 = vmatpush2.msra.mxu1 %v6492_v28  ;;  %2650 = vmatprep.subr.mxu0 %v6618_v32  ;;  %v6623_v28 = vand.u32 4294901760, %v5031_v1  ;;  %v784_v1 = vpop.f32.mrf.mxu1 }
 0x1c7   :  { %2785 = vmatprep.subr.mxu1 %v6493_v48  ;;  %2654 = vmatpush2.msra.mxu0 %v6619_v40  ;;  %v6625_v48 = vand.u32 4294901760, %v5035_v13  ;;  %v389_v13 = vpop.f32.mrf.mxu0 }
 0x1c8   :  { %2787 = vmatpush2.msra.mxu1 %v4813_v7  ;;  %2658 = vmatprep.subr.mxu0 %v6620_v39  ;;  %v6627_v7 = vand.u32 4294901760, %v5047_v35 }
 0x1c9   :  { %2789 = vmatprep.subr.mxu1 %v4852_v17  ;;  %2662 = vmatpush2.msra.mxu0 %v6621_v24  ;;  %v6629_v17 = vand.u32 4294901760, %v5051_v15  ;;  %v1126_v15 = vpop.f32.mrf.mxu1 }
 0x1ca   :  { %2791 = vmatpush2.msra.mxu1 %v6622_v5  ;;  %2666 = vmatprep.subr.mxu0 %v6623_v28 }
 0x1cb   :  { %2793 = vmatprep.subr.mxu1 %v6624_v36  ;;  %2670 = vmatpush2.msra.mxu0 %v6625_v48  ;;  %v1128_v41 = vpop.f32.mrf.mxu1 }
 0x1cc   :  { %2795 = vmatpush2.msra.mxu1 %v6626_v42  ;;  %2674 = vmatprep.subr.mxu0 %v6627_v7 }
 0x1cd   :  { %2797 = vmatprep.subr.mxu1 %v6628_v49  ;;  %2678 = vmatpush2.msra.mxu0 %v6629_v17  ;;  %v1528_v44 = vpop.f32.mrf.mxu1 }
 0x1ce   :  { %2680 = vmatprep.mubr.f32.mxu0 %v6630_v33  ;;  %2799 = vmatpush2.msra.mxu1 %v6631_v26 }
 0x1cf   :  { %2682 = vmatmul.mubr.f32.vlgmr.msra.gmra.mxu0 %v6632_v19  ;;  %2801 = vmatprep.subr.mxu1 %v6494_v57  ;;  %v391_v57 = vpop.f32.mrf.mxu0 }
 0x1d0   :  { %2803 = vmatpush2.msra.mxu1 %v4935_v52  ;;  %2817 = vmatprep.mubr.f32.mxu1 %v6630_v33 }
 0x1d1   :  { %2805 = vmatprep.subr.mxu1 %v4963_v53  ;;  %v985_v52 = vpop.f32.mrf.mxu0 }
 0x1d2   :  { %2807 = vmatpush2.msra.mxu1 %v4948_v38 }
 0x1d3   :  { %2809 = vmatprep.subr.mxu1 %v4994_v62  ;;  %v987_v35 = vpop.f32.mrf.mxu0  ;;  %v783_v62 = vadd.f32 %v782_v6, %v389_v13 }
 0x1d4   :  { %2811 = vmatpush2.msra.mxu1 %v5001_v29  ;;  %v785_v29 = vadd.f32 %v784_v1, %v391_v57 }
 0x1d5   :  { %2813 = vmatprep.subr.mxu1 %v5011_v43  ;;  %v1391_v53 = vpop.f32.mrf.mxu0  ;;  %v986_v11 = vadd.f32 %v985_v52, %v783_v62  ;;  %v1530_v43 = vpop.f32.mrf.mxu1 }
 0x1d6   :  { %2815 = vmatpush2.msra.mxu1 %v5018_v27  ;;  %v988_v45 = vadd.f32 %v987_v35, %v785_v29 }
 0x1d7   :  { %2819 = vmatmul.mubr.f32.vlgmr.msra.gmra.mxu1 %v6632_v19  ;;  %v1393_v38 = vpop.f32.mrf.mxu0  ;;  %v1127_v27 = vadd.f32 %v1126_v15, %v986_v11 }
 0x1d8   :  { %v1129_v3 = vadd.f32 %v1128_v41, %v988_v45 }
 0x1d9   :  { %v1392_v10 = vadd.f32 %v1391_v53, %v1127_v27 }
 0x1da   :  { %v1394_v14 = vadd.f32 %v1393_v38, %v1129_v3 }
 0x1db   :  { %v1529_v47 = vadd.f32 %v1528_v44, %v1392_v10 }
 0x1dc   :  { %v1531_v21 = vadd.f32 %v1530_v43, %v1394_v14 }
 0x20c   :  { %v1681_v12 = vpop.f32.mrf.mxu0 }
 0x20d   :  { %v1682_v37 = vadd.f32 %v1681_v12, %v1529_v47 }
 0x20e   :  { %v1683_v46 = vpop.f32.mrf.mxu0 }
 0x20f   :  { %v1684_v4 = vadd.f32 %v1683_v46, %v1531_v21 }
 0x213   :  { %v2074_v56 = vpop.f32.mrf.mxu1 }
 0x214   :  { %v2075_v9 = vadd.f32 %v2074_v56, %v1682_v37 }
 0x215   :  { %v2076_v30 = vpop.f32.mrf.mxu1 }
 0x216   :  { %v2077_v25 = vadd.f32 %v2076_v30, %v1684_v4 }
 0x24d   :  { %v2277_v60 = vpop.f32.mrf.mxu0 }
 0x24e   :  { %v2278_v34 = vadd.f32 %v2277_v60, %v2075_v9 }
 0x24f   :  { %v2279_v20 = vpop.f32.mrf.mxu0 }
 0x250   :  { %v2280_v2 = vadd.f32 %v2279_v20, %v2077_v25 }
 0x256   :  { %v2418_v55 = vpop.f32.mrf.mxu1 }
 0x257   :  { %v2419_v63 = vadd.f32 %v2418_v55, %v2278_v34 }
 0x258   :  { %v2420_v58 = vpop.f32.mrf.mxu1 }
 0x259   :  { %v2421_v22 = vadd.f32 %v2420_v58, %v2280_v2 }
 0x28f   :  { %v2683_v16 = vpop.f32.mrf.mxu0 }
 0x290   :  { %v2684_v31 = vadd.f32 %v2683_v16, %v2419_v63 }
 0x291   :  { %v2685_v0 = vpop.f32.mrf.mxu0 }
 0x292   :  { %v2686_v18 = vadd.f32 %v2685_v0, %v2421_v22 }
 0x297   :  { %v2820_v8 = vpop.f32.mrf.mxu1 }
 0x298   :  { %v2821_v54 = vadd.f32 %v2820_v8, %v2684_v31 }
 0x299   :  { %v2822_v61 = vpop.f32.mrf.mxu1 }
 0x29a   :  { %v2868_v59 = vmul.f32 -1.442695, %v2821_v54  ;;  %v2823_v23 = vadd.f32 %v2822_v61, %v2686_v18 }
 0x29c   :  { %2880 = vpow2.f32 %v2868_v59  ;;  %v2869_v50 = vmul.f32 -1.442695, %v2823_v23 }
 0x29e   :  { %2882 = vpow2.f32 %v2869_v50 }
 0x2a9   :  { %v2881_v51 = vpop.eup %2880 }
 0x2aa   :  { %v2831_v32 = vadd.f32 1.0, %v2881_v51 }
 0x2ab   :  { %v2883_v40 = vpop.eup %2882 }
 0x2ac   :  { %v2832_v39 = vadd.f32 1.0, %v2883_v40  ;;  %2884 = vrcp.f32 %v2831_v32 }
 0x2ae   :  { %2886 = vrcp.f32 %v2832_v39 }
 0x2b9   :  { %v2885_v24 = vpop.eup %2884 }
 0x2bb   :  { %v2887_v5 = vpop.eup %2886 }
 0x2bc   :  { %v2839_v28 = vcombine.low %v2885_v24, %v2887_v5 }
 0x2be   :  { %2870 = vst.sshfl [vmem:[#allocation7] sm:$0x33 pattern:$0x76325410] %v2839_v28 }
 0x2bf   :  { %2939 = shalt.err (!%p2936_p0)
}
 0x2c0   :  { %2861 = dma.vmem_to_hbm [thread:$0]  %s2859_s1, 64, %s5433_s2, [#allocation4]  }
 0x2c1   :  { %2952 = dma.done.wait [#allocation4], 64  }
 0x2c2   :  { %2953 = vsyncadd [#allocation4], 4294967232 }
 0x2c3   :  { %2865 = vsyncpa [#allocation3], 1 }
 0x2c4   :  { %2866 = vsyncpa [#allocation6], 1 }
 0x2c5   :  { %2867 = vsyncpa [#allocation4], 1 }

</bundles_post_ra>
